<compile_context>
chip_gen: v6e
topology: v6e:2x2x1
jax: 0.10.0
libtpu: 0.0.40
codegen_flags: <defaults>
</compile_context>

<pallas_src>
import functools

import jax
import jax.numpy as jnp
from jax import lax
from jax.experimental import pallas as pl
from jax.experimental.pallas import tpu as pltpu

_EPS = 1e-5
_LANE = 128


def _round_up(x, m):
    return ((x + m - 1) // m) * m


def _cdiv(a, b):
    return -(-a // b)


@functools.lru_cache(maxsize=None)
def _vmem_capacity():
    cap = 64 * 1024 * 1024                      # conservative default (v7x)
    try:
        info = pltpu.get_tpu_info()
        cap = int(getattr(info, "vmem_capacity_bytes", cap))
    except Exception:
        pass
    return cap


@functools.lru_cache(maxsize=None)
def _default_row_tile():
    # v5e/v6e (128 MiB VMEM): bigger tiles amortize grid-step overhead.
    # v7x (64 MiB VMEM): keep tiles <= 1024 rows.
    return 2048 if _vmem_capacity() >= (100 << 20) else 1024


def _compiler_params(num_grid_axes, est_bytes):
    cap = _vmem_capacity()
    limit = int(min(cap * 3 // 4, max(32 << 20, 2 * int(est_bytes))))
    return pltpu.CompilerParams(
        dimension_semantics=("parallel",) * num_grid_axes,
        vmem_limit_bytes=limit)


# ----------------------------------------------------------------------------
# Pallas kernels
# ----------------------------------------------------------------------------
def _kn_conv_s1_kernel(x_ref, w_ref, ws_ref, b_ref, o_ref, *, kh, kw, wp, tile,
                       k_real, eps, apply_relu):
    """Row-tiled fused [ReLU ->] KNConv2d (stride 1).

    x_ref : (rows_in, Cpad) bf16 -- one spatially padded image, flattened
            row-major, resident in VMEM across row tiles.
    w_ref : (kh*kw*Cpad, Coutpad) bf16, tap-major / channel-minor packing.
    ws_ref: (1, Coutpad) f32 column sums of w (for the norm epilogue).
    o_ref : (tile, Coutpad) bf16 -- rows r in [r0, r0+tile) of the flat output;
            columns with w >= Wo are junk and sliced off by the wrapper.

    Math: out = inv_std * (raw_taps @ W - mean * colsum(W)) + b, where
    mean/var come from per-pixel channel sums window-summed over the taps.
    """
    halo = (kh - 1) * wp + (kw - 1)
    win = tile + halo
    r0 = pl.multiple_of(pl.program_id(1) * tile, 8)
    xw = x_ref[pl.ds(r0, win), :]                          # bf16 (win, Cpad)
    if apply_relu:
        xw = jnp.maximum(xw, 0)
    xf = xw.astype(jnp.float32)
    cs = jnp.sum(xf, axis=-1, keepdims=True)               # (win, 1)
    cs2 = jnp.sum(xf * xf, axis=-1, keepdims=True)         # (win, 1)
    c_pad = xw.shape[-1]

    taps = []
    s1 = None
    s2 = None
    for i in range(kh):
        for j in range(kw):
            off = i * wp + j
            taps.append(lax.slice(xw, (off, 0), (off + tile, c_pad)))
            t1 = lax.slice(cs, (off, 0), (off + tile, 1))
            t2 = lax.slice(cs2, (off, 0), (off + tile, 1))
            s1 = t1 if s1 is None else s1 + t1
            s2 = t2 if s2 is None else s2 + t2
    p = jnp.concatenate(taps, axis=-1)                     # bf16 (tile, K)

    inv_k = 1.0 / k_real
    mean = s1 * inv_k
    var = s2 * inv_k - mean * mean
    inv_std = lax.rsqrt(jnp.maximum(var, 0.0) + eps)

    acc = jnp.dot(p, w_ref[...], preferred_element_type=jnp.float32)
    out = inv_std * (acc - mean * ws_ref[...]) + b_ref[...]
    o_ref[...] = out.astype(o_ref.dtype)


def _kn_patch_matmul_kernel(p_ref, w_ref, ws_ref, b_ref, o_ref, *, k_real, eps,
                            apply_relu):
    """Row-tiled [ReLU ->] kernel-norm conv on a pre-built bf16 patch matrix."""
    p = p_ref[...]                                         # bf16 (tm, Kpad)
    if apply_relu:
        p = jnp.maximum(p, 0)
    pf = p.astype(jnp.float32)
    inv_k = 1.0 / k_real
    mean = jnp.sum(pf, axis=-1, keepdims=True) * inv_k
    var = jnp.sum(pf * pf, axis=-1, keepdims=True) * inv_k - mean * mean
    inv_std = lax.rsqrt(jnp.maximum(var, 0.0) + eps)
    acc = jnp.dot(p, w_ref[...], preferred_element_type=jnp.float32)
    out = inv_std * (acc - mean * ws_ref[...]) + b_ref[...]
    o_ref[...] = out.astype(o_ref.dtype)


def _kn1x1_relu_kernel(x_ref, o_ref, *, c_real, eps, mask_pad):
    """KernelNorm2d1x1 (per-pixel norm over channels) followed by ReLU."""
    x = x_ref[...].astype(jnp.float32)
    inv_c = 1.0 / c_real
    mean = jnp.sum(x, axis=-1, keepdims=True) * inv_c
    var = jnp.sum(x * x, axis=-1, keepdims=True) * inv_c - mean * mean
    y = jnp.maximum((x - mean) * lax.rsqrt(jnp.maximum(var, 0.0) + eps), 0.0)
    if mask_pad:
        # Keep zero-padded channels exactly zero (invariant for downstream
        # k_real-based statistics).
        lane = lax.broadcasted_iota(jnp.int32, x.shape, 1)
        y = jnp.where(lane < int(c_real), y, 0.0)
    o_ref[...] = y.astype(o_ref.dtype)


# ----------------------------------------------------------------------------
# Wrappers (NHWC, channel-padded, bf16 activations)
# ----------------------------------------------------------------------------
def _pad4(padding):
    if len(padding) == 2:                       # symmetric (pad_h, pad_w)
        t = b = int(padding[0])
        l = r = int(padding[1])
    else:                                       # F.pad order (l, r, t, b)
        l, r, t, b = (int(v) for v in padding)
    return l, r, t, b


def _spatial_pad(x, padding):
    l, r, t, b = _pad4(padding)
    if (l, r, t, b) == (0, 0, 0, 0):
        return x
    return jnp.pad(x, ((0, 0), (t, b), (l, r), (0, 0)))


def kn_conv2d_s1(x, wmat, wsum, bias, *, cin_real, kh, kw, padding, apply_relu,
                 row_tile=None):
    """Stride-1 KNConv2d on NHWC channel-padded bf16 input (row-tiled)."""
    if row_tile is None:
        row_tile = _default_row_tile()
    n, h, w_in, c_pad = x.shape
    l, r, t, b = _pad4(padding)
    hp, wp = h + t + b, w_in + l + r
    ho, wo = hp - kh + 1, wp - kw + 1
    n_rows = ho * wp                            # includes junk cols (w >= Wo)

    num_tiles = max(1, _cdiv(n_rows, row_tile))
    tile = _round_up(_cdiv(n_rows, num_tiles), 16)
    n_rows_pad = tile * num_tiles
    halo = (kh - 1) * wp + (kw - 1)
    rows_needed = n_rows_pad + halo
    extra_h = _cdiv(max(rows_needed - hp * wp, 0), wp)     # extra zero rows
    # One combined pad: conv's spatial padding + extra bottom rows so that
    # every tap read of every (padded) output row stays in bounds.
    xp = jnp.pad(x, ((0, 0), (t, b + extra_h), (l, r), (0, 0)))
    rows_in = (hp + extra_h) * wp
    x_flat = xp.reshape(n, rows_in, c_pad)

    k_tot, cout_pad = wmat.shape
    kern = functools.partial(_kn_conv_s1_kernel, kh=kh, kw=kw, wp=wp, tile=tile,
                             k_real=float(cin_real * kh * kw), eps=_EPS,
                             apply_relu=apply_relu)
    est = (2 * (rows_in * c_pad * 2 + k_tot * cout_pad * 2
                + tile * cout_pad * 2 + 4 * cout_pad * 4)
           + (tile + halo) * c_pad * 10            # xw/xf/xf^2 temporaries
           + tile * k_tot * 2                      # bf16 tap matrix
           + tile * cout_pad * 8                   # f32 acc + epilogue
           + (4 << 20))
    out = pl.pallas_call(
        kern,
        out_shape=jax.ShapeDtypeStruct((n, n_rows_pad, cout_pad), jnp.bfloat16),
        grid=(n, num_tiles),
        in_specs=[
            pl.BlockSpec((None, rows_in, c_pad), lambda i, tt: (i, 0, 0)),
            pl.BlockSpec((k_tot, cout_pad), lambda i, tt: (0, 0)),
            pl.BlockSpec((1, cout_pad), lambda i, tt: (0, 0)),
            pl.BlockSpec((1, cout_pad), lambda i, tt: (0, 0)),
        ],
        out_specs=pl.BlockSpec((None, tile, cout_pad), lambda i, tt: (i, tt, 0)),
        compiler_params=_compiler_params(2, est),
    )(x_flat, wmat, wsum, bias)
    # Free reshape; the junk-column slice fuses into the consumer.
    out = out[:, :n_rows, :].reshape(n, ho, wp, cout_pad)
    return out[:, :, :wo, :]


def _im2col_nhwc(xp, kh, kw, sh, sw):
    n, hp, wp, c = xp.shape
    ho = (hp - kh) // sh + 1
    wo = (wp - kw) // sw + 1
    taps = []
    for i in range(kh):
        for j in range(kw):
            taps.append(lax.slice(
                xp, (0, i, j, 0),
                (n, i + (ho - 1) * sh + 1, j + (wo - 1) * sw + 1, c),
                (1, sh, sw, 1)))
    p = jnp.concatenate(taps, axis=-1)          # (N, Ho, Wo, kh*kw*C)
    return p.reshape(n * ho * wo, kh * kw * c), ho, wo


def kn_conv2d_im2col(x, wmat, wsum, bias, *, cin_real, kh, kw, stride, padding,
                     apply_relu, tm=None):
    """Generic KNConv2d (only the 3-channel stem uses it; handles stride)."""
    # TODO(synk): the stem still materializes its (small, 3-channel, bf16)
    # im2col patch matrix in HBM; all other conv layers build taps in-kernel.
    if tm is None:
        tm = _default_row_tile()
    n = x.shape[0]
    xp = _spatial_pad(x, padding)
    patches, ho, wo = _im2col_nhwc(xp, kh, kw, stride[0], stride[1])
    m, k = patches.shape
    k_pad, cout_pad = wmat.shape
    num = max(1, _cdiv(m, tm))
    tm_eff = _round_up(_cdiv(m, num), 8)
    mp = tm_eff * num
    if mp != m or k_pad != k:
        patches = jnp.pad(patches, ((0, mp - m), (0, k_pad - k)))
    kern = functools.partial(_kn_patch_matmul_kernel,
                             k_real=float(cin_real * kh * kw), eps=_EPS,
                             apply_relu=apply_relu)
    est = (2 * (tm_eff * k_pad * 2 + k_pad * cout_pad * 2 + tm_eff * cout_pad * 2)
           + tm_eff * k_pad * 8 + tm_eff * cout_pad * 8 + (4 << 20))
    out = pl.pallas_call(
        kern,
        out_shape=jax.ShapeDtypeStruct((mp, cout_pad), jnp.bfloat16),
        grid=(num,),
        in_specs=[
            pl.BlockSpec((tm_eff, k_pad), lambda i: (i, 0)),
            pl.BlockSpec((k_pad, cout_pad), lambda i: (0, 0)),
            pl.BlockSpec((1, cout_pad), lambda i: (0, 0)),
            pl.BlockSpec((1, cout_pad), lambda i: (0, 0)),
        ],
        out_specs=pl.BlockSpec((tm_eff, cout_pad), lambda i: (i, 0)),
        compiler_params=_compiler_params(1, est),
    )(patches, wmat, wsum, bias)
    return out[:m].reshape(n, ho, wo, cout_pad)


def kernel_norm_1x1_relu(x, c_real, tm=None):
    """KernelNorm2d1x1 + ReLU, row-tiled over N*H*W pixels (bf16 in/out)."""
    if tm is None:
        tm = _default_row_tile()
    n, h, w, c_pad = x.shape
    xm = x.reshape(n * h * w, c_pad)
    m = xm.shape[0]
    num = max(1, _cdiv(m, tm))
    tm_eff = _round_up(_cdiv(m, num), 8)
    mp = tm_eff * num
    if mp != m:
        xm = jnp.pad(xm, ((0, mp - m), (0, 0)))
    kern = functools.partial(_kn1x1_relu_kernel, c_real=float(c_real), eps=_EPS,
                             mask_pad=(c_pad != c_real))
    est = 2 * (tm_eff * c_pad * 4) + tm_eff * c_pad * 8 + (4 << 20)
    out = pl.pallas_call(
        kern,
        out_shape=jax.ShapeDtypeStruct((mp, c_pad), jnp.bfloat16),
        grid=(num,),
        in_specs=[pl.BlockSpec((tm_eff, c_pad), lambda i: (i, 0))],
        out_specs=pl.BlockSpec((tm_eff, c_pad), lambda i: (i, 0)),
        compiler_params=_compiler_params(1, est),
    )(xm)
    return out[:m].reshape(n, h, w, c_pad)


def max_pool2d(x, kernel, stride, padding):
    # TODO(synk): pooling uses lax.reduce_window (XLA glue), not a Pallas
    # kernel; not fused into the preceding conv epilogue.
    neg_inf = jnp.asarray(-jnp.inf, x.dtype)
    return lax.reduce_window(
        x, neg_inf, lax.max,
        window_dimensions=(1, kernel[0], kernel[1], 1),
        window_strides=(1, stride[0], stride[1], 1),
        padding=((0, 0), (padding[0], padding[0]),
                 (padding[1], padding[1]), (0, 0)))


# ----------------------------------------------------------------------------
# Parameters (deterministic init, pre-packed / pre-padded / bf16 weights)
# ----------------------------------------------------------------------------
def _prep_conv(key, cin, cout, kh, kw, *, pad_channels=True):
    cout_pad = _round_up(cout, _LANE)
    std = (2.0 / (cout * kh * kw)) ** 0.5       # kaiming_normal_, fan_out, relu
    w = std * jax.random.normal(key, (cout, cin, kh, kw), dtype=jnp.float32)
    wt = jnp.transpose(w, (2, 3, 1, 0))         # (kh, kw, cin, cout)
    if pad_channels:
        cin_pad = _round_up(cin, _LANE)
        wfull = jnp.zeros((kh, kw, cin_pad, cout_pad), jnp.float32)
        wfull = wfull.at[:, :, :cin, :cout].set(wt)
        wmat = wfull.reshape(kh * kw * cin_pad, cout_pad)
    else:                                       # stem: pad K to a lane multiple
        k = kh * kw * cin
        k_pad = _round_up(k, _LANE)
        wmat = jnp.zeros((k_pad, cout_pad), jnp.float32)
        wmat = wmat.at[:k, :cout].set(wt.reshape(k, cout))
    wmat = wmat.astype(jnp.bfloat16)
    wsum = jnp.sum(wmat.astype(jnp.float32), axis=0, keepdims=True)  # colsum(W)
    bias = jnp.zeros((1, cout_pad), jnp.float32)
    return {"w": wmat, "ws": wsum, "b": bias}


def init_knresnet18(key, num_classes=1000, low_resolution=False):
    keys = iter(jax.random.split(key, 32))
    p = {}
    if low_resolution:
        p["block0"] = _prep_conv(next(keys), 3, 64, 3, 3, pad_channels=False)
    else:
        p["block0"] = _prep_conv(next(keys), 3, 64, 7, 7, pad_channels=False)

    def res(cin, cinter):
        return {"conv1": _prep_conv(next(keys), cin, cinter, 2, 2),
                "conv2": _prep_conv(next(keys), cinter, cin, 2, 2)}

    p["res1"] = res(64, 256)
    p["res2"] = res(64, 256)
    p["trans1"] = _prep_conv(next(keys), 64, 256, 2, 2)
    p["res3"] = res(256, 256)
    p["res4"] = res(256, 256)
    p["trans2"] = _prep_conv(next(keys), 256, 512, 2, 2)
    p["res5"] = res(512, 512)
    p["trans3"] = _prep_conv(next(keys), 512, 724, 2, 2)
    p["res6"] = res(724, 724)
    p["conv_f"] = _prep_conv(next(keys), 724, 512, 2, 2)
    bound = 1.0 / (512.0 ** 0.5)
    p["fc_w"] = jax.random.uniform(next(keys), (num_classes, 512),
                                   jnp.float32, -bound, bound)
    p["fc_b"] = jnp.zeros((num_classes,), jnp.float32)
    return p


# ----------------------------------------------------------------------------
# Forward pass
# ----------------------------------------------------------------------------
def knresnet18_forward(params, x_nchw, *, low_resolution=False):
    x = jnp.transpose(x_nchw, (0, 2, 3, 1)).astype(jnp.bfloat16)  # NHWC once

    p0 = params["block0"]
    if low_resolution:
        out = kn_conv2d_im2col(x, p0["w"], p0["ws"], p0["b"], cin_real=3,
                               kh=3, kw=3, stride=(1, 1), padding=(1, 1),
                               apply_relu=False)
    else:
        out = kn_conv2d_im2col(x, p0["w"], p0["ws"], p0["b"], cin_real=3,
                               kh=7, kw=7, stride=(2, 2), padding=(3, 3),
                               apply_relu=False)
        out = max_pool2d(out, (3, 3), (2, 2), (1, 1))

    def conv(o, pp, cin_real, padding):
        return kn_conv2d_s1(o, pp["w"], pp["ws"], pp["b"], cin_real=cin_real,
                            kh=2, kw=2, padding=padding, apply_relu=True)

    def res_block(o, pp, cin_real, cinter_real):
        identity = o
        o = conv(o, pp["conv1"], cin_real, (1, 1))
        o = conv(o, pp["conv2"], cinter_real, (0, 0))
        # TODO(synk): residual add stays a separate (bf16) XLA elementwise op;
        # fusing it into the row-tiled conv epilogue conflicts with the junk
        # output columns / tile boundaries.
        return o + identity

    def trans_block(o, pp, cin_real, padding):
        o = conv(o, pp, cin_real, padding)
        return max_pool2d(o, (2, 2), (2, 2), (0, 0))

    out = res_block(out, params["res1"], 64, 256)
    out = res_block(out, params["res2"], 64, 256)
    out = trans_block(out, params["trans1"], 64, (1, 0, 1, 0))
    out = res_block(out, params["res3"], 256, 256)
    out = res_block(out, params["res4"], 256, 256)
    out = trans_block(out, params["trans2"], 256, (0, 1, 0, 1))
    out = res_block(out, params["res5"], 512, 512)
    out = trans_block(out, params["trans3"], 512,
                      (1, 0, 1, 0) if low_resolution else (2, 1, 2, 1))
    out = res_block(out, params["res6"], 724, 724)
    out = max_pool2d(out, (2, 2), (2, 2), (0, 0))
    out = conv(out, params["conv_f"], 724,
               (1, 1) if low_resolution else (0, 0))
    out = kernel_norm_1x1_relu(out, c_real=512)   # kn_f + relu_f (dropout = id)
    feat = jnp.mean(out.astype(jnp.float32), axis=(1, 2))[:, :512]
    # Final Linear is tiny (N x 512 x num_classes): plain XLA dot.
    return jnp.dot(feat, params["fc_w"].T) + params["fc_b"]


# ----------------------------------------------------------------------------
# Pure-jnp reference for the row-tiled conv (self-check of tiling/halo logic)
# ----------------------------------------------------------------------------
def _ref_kn_conv_s1(x, wmat, bias, *, cin_real, kh, kw, padding, apply_relu):
    xp = _spatial_pad(x, padding).astype(jnp.float32)
    if apply_relu:
        xp = jnp.maximum(xp, 0.0)
    patches, ho, wo = _im2col_nhwc(xp, kh, kw, 1, 1)
    k_real = float(cin_real * kh * kw)
    mean = jnp.sum(patches, -1, keepdims=True) / k_real
    var = jnp.sum(patches * patches, -1, keepdims=True) / k_real - mean * mean
    pn = (patches - mean) * lax.rsqrt(jnp.maximum(var, 0.0) + _EPS)
    out = jnp.dot(pn, wmat.astype(jnp.float32),
                  precision=lax.Precision.HIGHEST) + bias
    return out.reshape(x.shape[0], ho, wo, -1)


if __name__ == "__main__":
    key = jax.random.PRNGKey(0)
    kp, kx, kc = jax.random.split(key, 3)
    num_classes = 10
    low_resolution = True                        # small-image variant
    params = init_knresnet18(kp, num_classes=num_classes,
                             low_resolution=low_resolution)

    # --- self-check: exercise the multi-tile + halo conv path vs reference ---
    cw = params["res1"]["conv1"]
    xc = jnp.zeros((1, 24, 24, 128), jnp.bfloat16)
    xc = xc.at[..., :64].set(
        jax.random.normal(kc, (1, 24, 24, 64), jnp.float32).astype(jnp.bfloat16))
    y_pl = kn_conv2d_s1(xc, cw["w"], cw["ws"], cw["b"], cin_real=64, kh=2, kw=2,
                        padding=(1, 1), apply_relu=True, row_tile=256)
    y_ref = _ref_kn_conv_s1(xc, cw["w"], cw["b"], cin_real=64, kh=2, kw=2,
                            padding=(1, 1), apply_relu=True)
    rel_err = float(jnp.max(jnp.abs(y_pl.astype(jnp.float32) - y_ref))
                    / (jnp.max(jnp.abs(y_ref)) + 1e-6))
    assert rel_err < 3e-2, f"conv self-check failed: rel_err={rel_err}"

    # --- full forward pass ---
    x = jax.random.normal(kx, (2, 3, 16, 16), dtype=jnp.float32)   # NCHW
    fwd = jax.jit(functools.partial(knresnet18_forward,
                                    low_resolution=low_resolution))
    logits = fwd(params, x)
    jax.block_until_ready(logits)
    assert logits.shape == (2, num_classes), logits.shape
    assert bool(jnp.all(jnp.isfinite(logits)))
    print("KERNEL_OK")
</pallas_src>

<mosaic_0001>
module attributes {stable_mosaic.version = 11 : i64} {
  func.func @_kn_conv_s1_kernel(%arg0: i32, %arg1: i32, %arg2: memref<1x702x128xbf16, #tpu.memory_space<vmem>>, %arg3: memref<512x256xbf16, #tpu.memory_space<vmem>>, %arg4: memref<1x256xf32, #tpu.memory_space<vmem>>, %arg5: memref<1x256xf32, #tpu.memory_space<vmem>>, %arg6: memref<1x224x256xbf16, #tpu.memory_space<vmem>>) attributes {dimension_semantics = [#tpu.dimension_semantics<parallel>, #tpu.dimension_semantics<parallel>], iteration_bounds = array<i64: 1, 3>, scalar_prefetch = 0 : i64, scratch_operands = 0 : i64, tpu.core_type = #tpu.core_type<tc>, window_params = [{transform_indices = @transform_0, window_bounds = array<i64: 1, 702, 128>}, {pipeline_mode = #tpu.pipeline_mode<synchronous>, transform_indices = @transform_1, window_bounds = array<i64: 512, 256>}, {pipeline_mode = #tpu.pipeline_mode<synchronous>, transform_indices = @transform_2, window_bounds = array<i64: 1, 256>}, {pipeline_mode = #tpu.pipeline_mode<synchronous>, transform_indices = @transform_3, window_bounds = array<i64: 1, 256>}, {transform_indices = @transform_4, window_bounds = array<i64: 1, 224, 256>}]} {
    %c224_i32 = arith.constant 224 : i32
    %0 = arith.muli %arg1, %c224_i32 : i32
    %1 = tpu.assume_multiple %0, 8 : i32
    %c0 = arith.constant 0 : index
    %2 = arith.index_cast %1 : i32 to index
    %c0_0 = arith.constant 0 : index
    %3 = vector.load %arg2[%c0, %2, %c0_0] : memref<1x702x128xbf16, #tpu.memory_space<vmem>>, vector<1x251x128xbf16>
    %4 = vector.shape_cast %3 : vector<1x251x128xbf16> to vector<251x128xbf16>
    %cst = arith.constant 0.000000e+00 : bf16
    %5 = vector.broadcast %cst : bf16 to vector<251x128xbf16>
    %6 = arith.maximumf %4, %5 : vector<251x128xbf16>
    %7 = arith.extf %6 : vector<251x128xbf16> to vector<251x128xf32>
    %cst_1 = arith.constant dense<0.000000e+00> : vector<251xf32>
    %8 = vector.multi_reduction <add>, %7, %cst_1 [1] : vector<251x128xf32> to vector<251xf32>
    %9 = vector.shape_cast %8 : vector<251xf32> to vector<251x1xf32>
    %10 = arith.mulf %7, %7 : vector<251x128xf32>
    %cst_2 = arith.constant dense<0.000000e+00> : vector<251xf32>
    %11 = vector.multi_reduction <add>, %10, %cst_2 [1] : vector<251x128xf32> to vector<251xf32>
    %12 = vector.shape_cast %11 : vector<251xf32> to vector<251x1xf32>
    %13 = vector.extract_strided_slice %6 {offsets = [0, 0], sizes = [224, 128], strides = [1, 1]} : vector<251x128xbf16> to vector<224x128xbf16>
    %14 = vector.extract_strided_slice %9 {offsets = [0, 0], sizes = [224, 1], strides = [1, 1]} : vector<251x1xf32> to vector<224x1xf32>
    %15 = vector.extract_strided_slice %12 {offsets = [0, 0], sizes = [224, 1], strides = [1, 1]} : vector<251x1xf32> to vector<224x1xf32>
    %16 = vector.extract_strided_slice %6 {offsets = [1, 0], sizes = [224, 128], strides = [1, 1]} : vector<251x128xbf16> to vector<224x128xbf16>
    %17 = vector.extract_strided_slice %9 {offsets = [1, 0], sizes = [224, 1], strides = [1, 1]} : vector<251x1xf32> to vector<224x1xf32>
    %18 = vector.extract_strided_slice %12 {offsets = [1, 0], sizes = [224, 1], strides = [1, 1]} : vector<251x1xf32> to vector<224x1xf32>
    %19 = arith.addf %14, %17 : vector<224x1xf32>
    %20 = arith.addf %15, %18 : vector<224x1xf32>
    %21 = vector.extract_strided_slice %6 {offsets = [26, 0], sizes = [224, 128], strides = [1, 1]} : vector<251x128xbf16> to vector<224x128xbf16>
    %22 = vector.extract_strided_slice %9 {offsets = [26, 0], sizes = [224, 1], strides = [1, 1]} : vector<251x1xf32> to vector<224x1xf32>
    %23 = vector.extract_strided_slice %12 {offsets = [26, 0], sizes = [224, 1], strides = [1, 1]} : vector<251x1xf32> to vector<224x1xf32>
    %24 = arith.addf %19, %22 : vector<224x1xf32>
    %25 = arith.addf %20, %23 : vector<224x1xf32>
    %26 = vector.extract_strided_slice %6 {offsets = [27, 0], sizes = [224, 128], strides = [1, 1]} : vector<251x128xbf16> to vector<224x128xbf16>
    %27 = vector.extract_strided_slice %9 {offsets = [27, 0], sizes = [224, 1], strides = [1, 1]} : vector<251x1xf32> to vector<224x1xf32>
    %28 = vector.extract_strided_slice %12 {offsets = [27, 0], sizes = [224, 1], strides = [1, 1]} : vector<251x1xf32> to vector<224x1xf32>
    %29 = arith.addf %24, %27 : vector<224x1xf32>
    %30 = arith.addf %25, %28 : vector<224x1xf32>
    %31 = tpu.concatenate %13, %16, %21, %26 in 1 : vector<224x128xbf16>, vector<224x128xbf16>, vector<224x128xbf16>, vector<224x128xbf16> -> vector<224x512xbf16>
    %cst_3 = arith.constant 3.906250e-03 : f32
    %32 = vector.broadcast %cst_3 : f32 to vector<224x1xf32>
    %33 = arith.mulf %29, %32 : vector<224x1xf32>
    %cst_4 = arith.constant 3.906250e-03 : f32
    %34 = vector.broadcast %cst_4 : f32 to vector<224x1xf32>
    %35 = arith.mulf %30, %34 : vector<224x1xf32>
    %36 = arith.mulf %33, %33 : vector<224x1xf32>
    %37 = arith.subf %35, %36 : vector<224x1xf32>
    %cst_5 = arith.constant 0.000000e+00 : f32
    %38 = vector.broadcast %cst_5 : f32 to vector<224x1xf32>
    %39 = arith.maximumf %37, %38 : vector<224x1xf32>
    %cst_6 = arith.constant 9.99999974E-6 : f32
    %40 = vector.broadcast %cst_6 : f32 to vector<224x1xf32>
    %41 = arith.addf %39, %40 : vector<224x1xf32>
    %42 = math.rsqrt %41 : vector<224x1xf32>
    %c0_7 = arith.constant 0 : index
    %c0_8 = arith.constant 0 : index
    %43 = vector.load %arg3[%c0_7, %c0_8] : memref<512x256xbf16, #tpu.memory_space<vmem>>, vector<512x256xbf16>
    %cst_9 = arith.constant dense<0.000000e+00> : vector<224x256xf32>
    %44 = tpu.matmul %31, %43, %cst_9 {dimension_numbers = #tpu.dot_dimension_numbers<[1], [0], [0], [1], [0, 0, 1, 1], [], []>} : vector<224x512xbf16>, vector<512x256xbf16>, vector<224x256xf32> -> vector<224x256xf32>
    %c0_10 = arith.constant 0 : index
    %c0_11 = arith.constant 0 : index
    %45 = vector.load %arg4[%c0_10, %c0_11] : memref<1x256xf32, #tpu.memory_space<vmem>>, vector<1x256xf32>
    %46 = vector.broadcast %33 : vector<224x1xf32> to vector<224x256xf32>
    %47 = vector.broadcast %45 : vector<1x256xf32> to vector<224x256xf32>
    %48 = arith.mulf %46, %47 : vector<224x256xf32>
    %49 = arith.subf %44, %48 : vector<224x256xf32>
    %50 = vector.broadcast %42 : vector<224x1xf32> to vector<224x256xf32>
    %51 = arith.mulf %50, %49 : vector<224x256xf32>
    %c0_12 = arith.constant 0 : index
    %c0_13 = arith.constant 0 : index
    %52 = vector.load %arg5[%c0_12, %c0_13] : memref<1x256xf32, #tpu.memory_space<vmem>>, vector<1x256xf32>
    %53 = vector.broadcast %52 : vector<1x256xf32> to vector<224x256xf32>
    %54 = arith.addf %51, %53 : vector<224x256xf32>
    %55 = arith.truncf %54 : vector<224x256xf32> to vector<224x256xbf16>
    %c0_14 = arith.constant 0 : index
    %c0_15 = arith.constant 0 : index
    %c0_16 = arith.constant 0 : index
    %56 = vector.load %arg6[%c0_14, %c0_15, %c0_16] : memref<1x224x256xbf16, #tpu.memory_space<vmem>>, vector<1x224x256xbf16>
    %57 = vector.shape_cast %56 : vector<1x224x256xbf16> to vector<224x256xbf16>
    %58 = vector.shape_cast %55 : vector<224x256xbf16> to vector<1x224x256xbf16>
    tpu.vector_store %arg6[%c0_14, %c0_15, %c0_16], %58 {strides = array<i32>} : memref<1x224x256xbf16, #tpu.memory_space<vmem>>, vector<1x224x256xbf16>,
    return
  }
  func.func @transform_0(%arg0: i32, %arg1: i32) -> (i32, i32, i32) {
    %c0_i32 = arith.constant 0 : i32
    %c0_i32_0 = arith.constant 0 : i32
    %c0_i32_1 = arith.constant 0 : i32
    return %arg0, %c0_i32, %c0_i32_0 : i32, i32, i32
  }
  func.func @transform_1(%arg0: i32, %arg1: i32) -> (i32, i32) {
    %c0_i32 = arith.constant 0 : i32
    %c0_i32_0 = arith.constant 0 : i32
    %c0_i32_1 = arith.constant 0 : i32
    return %c0_i32, %c0_i32_0 : i32, i32
  }
  func.func @transform_2(%arg0: i32, %arg1: i32) -> (i32, i32) {
    %c0_i32 = arith.constant 0 : i32
    %c0_i32_0 = arith.constant 0 : i32
    %c0_i32_1 = arith.constant 0 : i32
    return %c0_i32, %c0_i32_0 : i32, i32
  }
  func.func @transform_3(%arg0: i32, %arg1: i32) -> (i32, i32) {
    %c0_i32 = arith.constant 0 : i32
    %c0_i32_0 = arith.constant 0 : i32
    %c0_i32_1 = arith.constant 0 : i32
    return %c0_i32, %c0_i32_0 : i32, i32
  }
  func.func @transform_4(%arg0: i32, %arg1: i32) -> (i32, i32, i32) {
    %c0_i32 = arith.constant 0 : i32
    %c0_i32_0 = arith.constant 0 : i32
    return %arg0, %arg1, %c0_i32 : i32, i32, i32
  }
}

</mosaic_0001>

<bundles_post_ra>
// kernel: tpu_custom_call.1
= control target key start
LH: loop header
LB: loop body
LE: loop exit
PB: predicated region body
PF: predicated region fallthrough
CT: control target
= control target key end

     0   :  { %9 = vsyncpa [#allocation3], 0  ;;  %s6385_s0 = inlined_call_operand.hbm [shape: bf16[1,702,128], index: 0, kind: input, shape index: {}]   ;;  %s6386_s1 = inlined_call_operand.hbm [shape: bf16[512,256], index: 1, kind: input, shape index: {}]   ;;  %s6387_s2 = inlined_call_operand.vmem [shape: f32[1,256], index: 2, kind: input, shape index: {}]   ;;  %s6388_s3 = inlined_call_operand.vmem [shape: f32[1,256], index: 3, kind: input, shape index: {}]   ;;  %s6389_s4 = inlined_call_operand.hbm [shape: bf16[1,672,256], index: 4, kind: output, shape index: {}]  }
   0x1   :  { %10 = vsyncpa [#allocation6], 0 }
   0x2   :  { %11 = vsyncpa [#allocation4], 0 }
   0x3   :  { %13 = vsyncpa [#allocation4 + $0x1], 0  ;;  %s4002_s15 = smov 0   ;;  %s4004_s16 = smov 0  }
   0x4   :  { %s4006_s17 = smov 0   ;;  %s4008_s18 = smov 0  }
   0x5   :  { %s4010_s19 = smov 0   ;;  %s4012_s20 = smov 0  }
   0x6 LB: > { %s3425_s21 = sadd.s32 4294967295, %s3965_s20   ;;  %s3426_s22 = sadd.s32 4294967294, %s3965_s20   ;;  %s3965_s20 = sphi %s4012_s20, %s19_s20   ;;  %s3961_s19 = sphi %s4010_s19, %s6734_s19   ;;  %s3957_s18 = sphi %s4008_s18, %s6733_s18   ;;  %s3953_s17 = sphi %s4006_s17, %s6732_s17   ;;  %s3949_s16 = sphi %s4004_s16, %s6731_s16   ;;  %s3945_s15 = sphi %s4002_s15, %s6730_s15  }
   0x7   : > { %s28_s23 = sadd.s32 1, %s3961_s19  ;;  %s129_s24 = sadd.s32 1, %s3953_s17 }
   0x8   : > { %p29_p0 = scmp.ge.s32.totalorder %s28_s23, 3  ;;  %p139_p1 = scmp.ne.s32.totalorder %s3953_s17, %s3949_s16 }
   0x9   : > { %p140_p2 = scmp.eq.s32.totalorder %s3425_s21, 2  ;;  %p145_p3 = scmp.ne.s32.totalorder %s3949_s16, %s3945_s15 }
   0xa   : > { %s6736_s23 = smov (%p29_p0, %s28_s23), 0  ;;  %p146_p5 = scmp.eq.s32.totalorder %s3426_s22, 2 }
   0xb   : > { %p4042_p4 = por %p140_p2, %p139_p1  ;;  %s125_s26 = ssub.s32 %s3961_s19, %s6736_s23 }
   0xc   : > { %p3427_p6 = scmp.ge.s32.totalorder %s3965_s20, 1  ;;  %p127_p7 = scmp.eq.s32.totalorder %s125_s26, 0 }
   0xd   : > { %s6465_s25 = scalar_select %p4042_p4, 1, 0 }
   0xe   : > { %p4049_p8 = por %p146_p5, %p145_p3  ;;  %p153_p9 = scmp.lt.s32.totalorder %s3965_s20, 4 }
   0xf   : > { %s4055_s28 = scalar_select %p127_p7, %s3953_s17, %s129_s24  }
  0x10   : > { %s6466_s27 = scalar_select %p4049_p8, 1, 0 }
  0x11   : > { %p4057_p10 = pnand %p3427_p6, %p153_p9  ;;  %p4061_p11 = scmp.eq.s32.totalorder %s3425_s21, 0 }
  0x12   : > { %s3967_s5 = smov [#allocation2]   ;;  %s3968_s8 = smov [#allocation5]  }
  0x13   : > { %p3602_p12 = pneg %p4057_p10  ;;  %s168_s6 = sshll.u32 %s3967_s5, 4  ;;  %s169_s6 = int_to_ptr.vmem [resolvable:$true] %s168_s6 }
  0x14   : > { %s181_s9 = sshll.u32 %s3968_s8, 4  ;;  %s3840_s10 = scalar_lea.vmem %s169_s6, 5632  ;;  %s182_s9 = int_to_ptr.vmem [resolvable:$true] %s181_s9 }
  0x15   : > { %p4069_p13 = pnand %p4061_p11, %p3602_p12  ;;  %p3841_p1 = scmp.ne.s32.totalorder %s169_s6, %s3840_s10 }
  0x16   : > { %p3848_p5 = scmp.lt.s32.totalorder %s169_s6, %s169_s6  ;;  %p3849_p6 = scmp.lt.s32.totalorder %s3840_s10, %s3840_s10 }
  0x17   : > { %p3831_p0 = pneg %p4069_p13 }
  0x18   : > { %p3850_p7 = por %p3849_p6, %p3848_p5 }
  0x19   : > { %p3843_p2 = pnand %p3841_p1, %p3831_p0 }
  0x1b   : > { %p3844_p3 = pneg %p3843_p2 }
  0x1d   : > { %p3851_p9 = pnand %p3850_p7, %p3844_p3 }
  0x1f   : > { %3854 = shalt.err (!%p3851_p9)
}
  0x20   : > { %s3969_s11 = smov 64   ;;  %s3970_s12 = smov 4  }
  0x21   : > { %3605 = dma.hbm_to_vmem [thread:$0]  (!%p4069_p13), %s6385_s0, 5632, %s169_s6, [#allocation3], %s3969_s11, %s3969_s11, %s3970_s12  }
  0x22   : > { %s3866_s21 = scalar_lea.vmem %s182_s9, 8192  ;;  %p3874_p8 = scmp.lt.s32.totalorder %s182_s9, %s182_s9 }
  0x23   : > { %p3867_p12 = scmp.ne.s32.totalorder %s182_s9, %s3866_s21  ;;  %p3875_p4 = scmp.lt.s32.totalorder %s3866_s21, %s3866_s21 }
  0x25   : > { %p3869_p1 = pnand %p3867_p12, %p3831_p0  ;;  %p3876_p5 = por %p3875_p4, %p3874_p8 }
  0x27   : > { %p3870_p2 = pneg %p3869_p1 }
  0x29   : > { %p3877_p3 = pnand %p3876_p5, %p3870_p2 }
  0x2b   : > { %3880 = shalt.err (!%p3877_p3)
}
  0x2c   : > { %s3971_s22 = smov 128   ;;  %s3972_s24 = smov 8  }
  0x2d   : > { %3608 = dma.hbm_to_vmem [thread:$0]  (!%p4069_p13), %s6386_s1, 8192, %s182_s9, [#allocation6], %s3971_s22, %s3971_s22, %s3972_s24  }
  0x2e   : > { %203 = sbr.rel (%p4057_p10) target bundleno = 561 (0x231), region = 36 }
  0x33   : > { %3932 = dma.done.wait (%p4061_p11), [#allocation3], 5632  }
  0x34   : > { %3934 = vsyncadd (%p4061_p11), [#allocation3], 4294961664 }
  0x35   : > { %3936 = dma.done.wait (%p4061_p11), [#allocation6], 8192  }
  0x36   : > { %3938 = vsyncadd (%p4061_p11), [#allocation6], 4294959104  ;;  %s230_s6 = smul.u32 224, %s3957_s18  ;;  %v6394_v0 = vmov 0   ;;  %v3677_v1 = vld [vmem:[#allocation5 + $0x74] ss:$8 sps:$4 sm:$0xff]  }
  0x37   : > { %3676 = vset.pattern.permute.xlu1 %v6394_v0  ;;  %3675 = vset.pattern.permute.xlu0 %v6394_v0  ;;  %v3679_v2 = vld [vmem:[#allocation5 + $0x174] ss:$8 sps:$4 sm:$0xff]   ;;  %v3681_v3 = vld [vmem:[#allocation5 + $0x70] ss:$8 sps:$4 sm:$0xff]   ;;  %v3683_v11 = vld [vmem:[#allocation5 + $0x64] ss:$8 sps:$4 sm:$0xff]  }
  0x38   : > { %s231_s29 = sshra.s32 %s230_s6, 3  ;;  %2251 = vmatprep.subr.bf16.mxu0 %v3677_v1  ;;  %v3682_v4 = vld [vmem:[#allocation5 + $0x170] ss:$8 sps:$4 sm:$0xff]   ;;  %2424 = vmatprep.subr.bf16.mxu1 %v3679_v2  ;;  %v3685_v13 = vld [vmem:[#allocation5 + $0x164] ss:$8 sps:$4 sm:$0xff]   ;;  %vm523_vm2 = vcmask 1046528  }
  0x39   : > { %s3433_s7 = sshll.u32 %s231_s29, 2  ;;  %2252 = vmatpush1.bf16.msra.mxu0 %v3681_v3  ;;  %2425 = vmatpush1.bf16.msra.mxu1 %v3682_v4  ;;  %v3687_v14 = vld [vmem:[#allocation5 + $0x60] ss:$8 sps:$4 sm:$0xff]   ;;  %v3689_v21 = vld [vmem:[#allocation5 + $0x54] ss:$8 sps:$4 sm:$0xff]   ;;  %vm393_vm3 = vcmask 1042432  }
  0x3a   : > { %s4104_s8 = scalar_lea.vmem [#allocation2], %s3433_s7  ;;  %2253 = vmatprep.subr.bf16.mxu0 %v3683_v11  ;;  %v3688_v17 = vld [vmem:[#allocation5 + $0x160] ss:$8 sps:$4 sm:$0xff]   ;;  %2426 = vmatprep.subr.bf16.mxu1 %v3685_v13  ;;  %v3691_v22 = vld [vmem:[#allocation5 + $0x154] ss:$8 sps:$4 sm:$0xff]   ;;  %vm782_vm4 = vcmask 1045504  }
  0x3b   : > { %v237_v5 = vld [vmem:[%s4104_s8 + $0x8] sm:$0xf]  ;;  %v238_v6 = vld [vmem:[%s4104_s8 + $0xc] sm:$0xf]  ;;  %v235_v8 = vld [vmem:[%s4104_s8] sm:$0xf] }
  0x3c   : > { %v269_v7 = vmax.bf16 %v6394_v0, %v237_v5  ;;  %v270_v9 = vmax.bf16 %v6394_v0, %v238_v6  ;;  %v267_v10 = vmax.bf16 %v6394_v0, %v235_v8  ;;  %v236_v18 = vld [vmem:[%s4104_s8 + $0x4] sm:$0xf]  ;;  %v3693_v23 = vld [vmem:[#allocation5 + $0x50] ss:$8 sps:$4 sm:$0xff]   ;;  %v240_v28 = vld [vmem:[%s4104_s8 + $0x14] sm:$0xf] }
  0x3d   : > { %v268_v20 = vmax.bf16 %v6394_v0, %v236_v18  ;;  %2254 = vmatpush1.bf16.msra.mxu0 %v3687_v14  ;;  %2427 = vmatpush1.bf16.msra.mxu1 %v3688_v17  ;;  %v3694_v27 = vld [vmem:[#allocation5 + $0x150] ss:$8 sps:$4 sm:$0xff]   ;;  %v4132_v30 = vmax.bf16 %v6394_v0, %v240_v28  ;;  %v3695_v32 = vld [vmem:[#allocation5 + $0x44] ss:$8 sps:$4 sm:$0xff]   ;;  %vm1326_vm0 = vsmask.f32 7424 }
  0x3e   : > { %v4112_v12 = vunpack.c.l.bf16 %v269_v7  ;;  %v4114_v15 = vcombine.low %v269_v7, %v270_v9  ;;  %v4116_v16 = vunpack.c.l.bf16 %v267_v10  ;;  %v4120_v19 = vunpack.c.l.bf16 %v270_v9  ;;  %2255 = vmatprep.subr.bf16.mxu0 %v3689_v21  ;;  %v239_v29 = vld [vmem:[%s4104_s8 + $0x10] sm:$0xf]  ;;  %2428 = vmatprep.subr.bf16.mxu1 %v3691_v22  ;;  %v3697_v33 = vld [vmem:[#allocation5 + $0x144] ss:$8 sps:$4 sm:$0xff]   ;;  %v3699_v39 = vld [vmem:[#allocation5 + $0x40] ss:$8 sps:$4 sm:$0xff]  }
  0x3f   : > { %v4125_v25 = vunpack.c.l.bf16 %v268_v20  ;;  %v4127_v26 = vcombine.low %v267_v10, %v268_v20  ;;  %v4135_v31 = vmax.bf16 %v6394_v0, %v239_v29  ;;  %v4142_v36 = vunpack.c.l.bf16 %v4132_v30  ;;  %v3700_v40 = vld [vmem:[#allocation5 + $0x140] ss:$8 sps:$4 sm:$0xff]   ;;  %v242_v41 = vld [vmem:[%s4104_s8 + $0x1c] sm:$0xf]  ;;  %v241_v43 = vld [vmem:[%s4104_s8 + $0x18] sm:$0xf] }
  0x40   : > { %335 = vadd.xlane.f32.xlu1 %v4112_v12  ;;  %331 = vadd.xlane.f32.xlu0 %v4116_v16  ;;  %v1335_v24 = vshll.u32 %v4114_v15, 16  ;;  %v4152_v42 = vmax.bf16 %v6394_v0, %v242_v41  ;;  %v4158_v46 = vmax.bf16 %v6394_v0, %v241_v43  ;;  %v3701_v47 = vld [vmem:[#allocation5 + $0x34] ss:$8 sps:$4 sm:$0xff]   ;;  %v3705_v52 = vld [vmem:[#allocation5 + $0x30] ss:$8 sps:$4 sm:$0xff]   ;;  %vm1012_vm5 = vcmask 1044480  }
  0x41   : > { %v1328_v34 = vshrl.u32 %v4127_v26, 16  ;;  %v1330_v35 = vshll.u32 %v4127_v26, 16  ;;  %2256 = vmatpush1.bf16.msra.mxu0 %v3693_v23  ;;  %v4145_v37 = vunpack.c.l.bf16 %v4135_v31  ;;  %v4148_v38 = vcombine.low %v270_v9, %v4135_v31  ;;  %2429 = vmatpush1.bf16.msra.mxu1 %v3694_v27  ;;  %v3703_v51 = vld [vmem:[#allocation5 + $0x134] ss:$8 sps:$4 sm:$0xff]   ;;  %v3706_v53 = vld [vmem:[#allocation5 + $0x130] ss:$8 sps:$4 sm:$0xff]  }
  0x42   : > { %2257 = vmatprep.subr.bf16.mxu0 %v3695_v32  ;;  %v4155_v45 = vrot.slane %v1335_v24, 1  ;;  %2430 = vmatprep.subr.bf16.mxu1 %v3697_v33  ;;  %v4164_v50 = vunpack.c.l.bf16 %v4152_v42  ;;  %v4168_v55 = vunpack.c.l.bf16 %v4158_v46  ;;  %v4172_v56 = vcombine.low %v4132_v30, %v4158_v46  ;;  %v244_v57 = vld [vmem:[%s4104_s8 + $0x24] sm:$0xf]  ;;  %v243_v58 = vld [vmem:[%s4104_s8 + $0x20] sm:$0xf]  ;;  %s225_s12 = sand.u32 1, %s3949_s16  }
  0x43   : > { %v1332_v44 = vrot.slane %v1330_v35, 1  ;;  %v1524_v48 = vshrl.u32 %v4148_v38, 16  ;;  %v1527_v49 = vshll.u32 %v4148_v38, 16  ;;  %v4177_v59 = vmax.bf16 %v6394_v0, %v244_v57  ;;  %v3707_v61 = vld [vmem:[#allocation5 + $0x24] ss:$8 sps:$4 sm:$0xff]   ;;  %s3591_s13 = smul.u32 224, %s225_s12 }
  0x44   : > { %337 = vadd.xlane.f32.xlu1 %v4120_v19  ;;  %333 = vadd.xlane.f32.xlu0 %v4125_v25  ;;  %v4180_v60 = vmax.bf16 %v6394_v0, %v243_v58  ;;  %v3709_v63 = vld [vmem:[#allocation5 + $0x124] ss:$8 sps:$4 sm:$0xff]   ;;  %v1532_v3 = vshrl.u32 %v4172_v56, 16  ;;  %v3711_v5 = vld [vmem:[#allocation5 + $0x20] ss:$8 sps:$4 sm:$0xff]   ;;  %v1535_v17 = vshll.u32 %v4172_v56, 16 }
  0x45   : > { %v1333_v54 = vor.u32 %v1332_v44, %v1328_v34  ;;  %2258 = vmatpush1.bf16.msra.mxu0 %v3699_v39  ;;  %2431 = vmatpush1.bf16.msra.mxu1 %v3700_v40  ;;  %v1526_v1 = vrot.slane %v1524_v48, 1  ;;  %v1529_v2 = vrot.slane %v1527_v49, 2  ;;  %v4187_v4 = vunpack.c.l.bf16 %v4177_v59  ;;  %v246_v6 = vld [vmem:[%s4104_s8 + $0x2c] sm:$0xf]  ;;  %v245_v7 = vld [vmem:[%s4104_s8 + $0x28] sm:$0xf] }
  0x46   : > { %2259 = vmatprep.subr.bf16.mxu0 %v3701_v47  ;;  %2432 = vmatprep.subr.bf16.mxu1 %v3703_v51  ;;  %v4193_v8 = vunpack.c.l.bf16 %v4180_v60  ;;  %v3712_v9 = vld [vmem:[#allocation5 + $0x120] ss:$8 sps:$4 sm:$0xff]   ;;  %v4196_v10 = vmax.bf16 %v6394_v0, %v246_v6  ;;  %v4199_v11 = vmax.bf16 %v6394_v0, %v245_v7  ;;  %v3713_v13 = vld [vmem:[#allocation5 + $0x14] ss:$8 sps:$4 sm:$0xff]   ;;  %v1534_v14 = vrot.slane %v1532_v3, 1  ;;  %s6029_s14 = scalar_lea.vmem [#allocation7], %s3591_s13 }
  0x47   : > { %v1338_v62 = vsel %vm1326_vm0, %v1333_v54, %v4155_v45  ;;  %v3715_v18 = vld [vmem:[#allocation5 + $0x114] ss:$8 sps:$4 sm:$0xff]   ;;  %v247_v23 = vld [vmem:[%s4104_s8 + $0x30] sm:$0xf]  ;;  %v1530_v24 = vor.u32 %v1529_v2, %v1526_v1  ;;  %v1537_v27 = vrot.slane %v1535_v17, 2  ;;  %v4244_v54 = vcombine.low %v4135_v31, %v4132_v30  ;;  %s3590_s21 = smul.u32 3584, %s3957_s18 }
  0x48   : > { %341 = vadd.xlane.f32.xlu1 %v4142_v36  ;;  %339 = vadd.xlane.f32.xlu0 %v4145_v37  ;;  %v248_v20 = vld [vmem:[%s4104_s8 + $0x34] sm:$0xf]  ;;  %v4205_v21 = vunpack.c.l.bf16 %v4196_v10  ;;  %v4213_v28 = vunpack.c.l.bf16 %v4199_v11  ;;  %v3717_v29 = vld [vmem:[#allocation5 + $0x10] ss:$8 sps:$4 sm:$0xff]   ;;  %v4216_v32 = vmax.bf16 %v6394_v0, %v247_v23  ;;  %vm1522_vm1 = vsmask.f32 6400 }
  0x49   : > { %2283 = vmatprep.mubr.bf16.mxu0 %v1338_v62  ;;  %2260 = vmatpush1.bf16.msra.mxu0 %v3705_v52  ;;  %v4208_v22 = vmax.bf16 %v6394_v0, %v248_v20  ;;  %v3718_v33 = vld [vmem:[#allocation5 + $0x110] ss:$8 sps:$4 sm:$0xff]   ;;  %v3719_v34 = vld [vmem:[#allocation5 + $0x4] ss:$8 sps:$4 sm:$0xff]   ;;  %v4218_v39 = vor.u32 %v1537_v27, %v1534_v14  ;;  %v250_v41 = vld [vmem:[%s4104_s8 + $0x3c] sm:$0xf]  ;;  %v4278_v17 = vmul.f32 %v4116_v16, %v4116_v16  ;;  %s6334_s26 = scalar_lea.hbm %s6389_s4, %s3590_s21 }
  0x4a   : > { %2433 = vmatpush1.bf16.msra.mxu1 %v3706_v53  ;;  %2261 = vmatprep.subr.bf16.mxu0 %v3707_v61  ;;  %6470 = vst [vmem:[#allocation11_spill] sm:$0xff] %v4205_v21  ;;  %6471 = vst [vmem:[#allocation12_spill] sm:$0xff] %v4213_v28  ;;  %v3721_v35 = vld [vmem:[#allocation5 + $0x104] ss:$8 sps:$4 sm:$0xff]   ;;  %v249_v43 = vld [vmem:[%s4104_s8 + $0x38] sm:$0xf]  ;;  %v4231_v47 = vmax.bf16 %v6394_v0, %v250_v41  ;;  %v4240_v51 = vunpack.c.l.bf16 %v4216_v32  ;;  %v4286_v20 = vcombine.low %v4177_v59, %v4199_v11 }
  0x4b   : > { %2434 = vmatprep.subr.bf16.mxu1 %v3709_v63  ;;  %v4222_v40 = vcombine.low %v4216_v32, %v4208_v22  ;;  %v4228_v44 = vunpack.c.l.bf16 %v4208_v22  ;;  %v4234_v48 = vmax.bf16 %v6394_v0, %v249_v43  ;;  %v1539_v49 = vsel %vm1522_vm1, %v1530_v24, %v4218_v39  ;;  %v3723_v52 = vld [vmem:[#allocation5] ss:$8 sps:$4 sm:$0xff]   ;;  %6475 = vst [vmem:[#allocation16_spill] sm:$0xff] %v4244_v54  ;;  %v3725_v58 = vld [vmem:[#allocation5 + $0xf4] ss:$8 sps:$4 sm:$0xff]   ;;  %s3338_s22 = sshll.u32 %s6029_s14, 4  ;;  %s6329_s22 = int_to_ptr.vmem [resolvable:$true] %s3338_s22 }
  0x4c   : > { %345 = vadd.xlane.f32.xlu1 %v4164_v50  ;;  %343 = vadd.xlane.f32.xlu0 %v4168_v55  ;;  %6474 = vst [vmem:[#allocation15_spill] sm:$0xff] %v4240_v51  ;;  %v3724_v53 = vld [vmem:[#allocation5 + $0x100] ss:$8 sps:$4 sm:$0xff]   ;;  %v252_v61 = vld [vmem:[%s4104_s8 + $0x44] sm:$0xf]  ;;  %v4254_v63 = vcombine.low %v4152_v42, %v4180_v60  ;;  %v4264_v31 = vunpack.c.l.bf16 %v4231_v47  ;;  %v4291_v24 = vmul.f32 %v4125_v25, %v4125_v25  ;;  %v1343_v16 = vshll.u32 %v4244_v54, 16 }
  0x4d   : > { %2262 = vmatpush1.bf16.msra.mxu0 %v3711_v5  ;;  %6472 = vst [vmem:[#allocation13_spill] sm:$0xff] %v4222_v40  ;;  %6473 = vst [vmem:[#allocation14_spill] sm:$0xff] %v4228_v44  ;;  %v4248_v57 = vcombine.low %v4234_v48, %v4231_v47  ;;  %v251_v62 = vld [vmem:[%s4104_s8 + $0x40] sm:$0xf]  ;;  %v3727_v1 = vld [vmem:[#allocation5 + $0x1f4] ss:$8 sps:$4 sm:$0xff]   ;;  %v4257_v2 = vmax.bf16 %v6394_v0, %v252_v61  ;;  %2456 = vmatprep.mubr.bf16.mxu1 %v1539_v49  ;;  %v4269_v6 = vunpack.c.l.bf16 %v4234_v48 }
  0x4e   : > { %2435 = vmatpush1.bf16.msra.mxu1 %v3712_v9  ;;  %2263 = vmatprep.subr.bf16.mxu0 %v3713_v13  ;;  %v4260_v30 = vmax.bf16 %v6394_v0, %v251_v62  ;;  %6477 = vst [vmem:[#allocation18_spill] sm:$0xff] %v4264_v31  ;;  %v3729_v3 = vld [vmem:[#allocation5 + $0xf0] ss:$8 sps:$4 sm:$0xff]   ;;  %v1339_v5 = vshrl.u32 %v4114_v15, 16  ;;  %v3731_v13 = vld [vmem:[#allocation5 + $0xe4] ss:$8 sps:$4 sm:$0xff]   ;;  %v4295_v27 = vmul.f32 %v4120_v19, %v4120_v19 }
  0x4f   : > { %2436 = vmatprep.subr.bf16.mxu1 %v3715_v18  ;;  %6476 = vst [vmem:[#allocation17_spill] sm:$0xff] %v4248_v57  ;;  %6478 = vst [vmem:[#allocation19_spill] sm:$0xff] %v4269_v6  ;;  %v3730_v7 = vld [vmem:[#allocation5 + $0x1f0] ss:$8 sps:$4 sm:$0xff]   ;;  %v254_v14 = vld [vmem:[%s4104_s8 + $0x4c] sm:$0xf]  ;;  %v4282_v18 = vmul.f32 %v4112_v12, %v4112_v12  ;;  %v4308_v19 = vunpack.c.l.bf16 %v4257_v2  ;;  %v4315_v49 = vmul.f32 %v4142_v36, %v4142_v36 }
  0x50   : > { %349 = vadd.xlane.f32.xlu1 %v4187_v4  ;;  %347 = vadd.xlane.f32.xlu0 %v4193_v8  ;;  %v4273_v9 = vcombine.low %v4260_v30, %v4257_v2  ;;  %v253_v23 = vld [vmem:[%s4104_s8 + $0x48] sm:$0xf]  ;;  %v3733_v12 = vld [vmem:[#allocation5 + $0x1e4] ss:$8 sps:$4 sm:$0xff]   ;;  %v1544_v25 = vshll.u32 %v4254_v63, 16  ;;  %v4311_v43 = vor.u32 %v1339_v5, %v4155_v45  ;;  %v1479_v62 = vrot.slane %v4148_v38, 1 }
  0x51   : > { %2264 = vmatpush1.bf16.msra.mxu0 %v3717_v29  ;;  %v4299_v29 = vmax.bf16 %v6394_v0, %v254_v14  ;;  %6479 = vst [vmem:[#allocation20_spill] sm:$0xff] %v4308_v19  ;;  %v3736_v41 = vld [vmem:[#allocation5 + $0x1e0] ss:$8 sps:$4 sm:$0xff]   ;;  %v256_v36 = vld [vmem:[%s4104_s8 + $0x54] sm:$0xf]  ;;  %v4345_v38 = vmul.f32 %v4164_v50, %v4164_v50  ;;  %v4363_v50 = vmul.f32 %v4168_v55, %v4168_v55  ;;  %s6340_s5 = scalar_lea.sflag [#allocation4], %s225_s12 }
  0x52   : > { %2437 = vmatpush1.bf16.msra.mxu1 %v3718_v33  ;;  %2265 = vmatprep.subr.bf16.mxu0 %v3719_v34  ;;  %v4302_v33 = vmax.bf16 %v6394_v0, %v253_v23  ;;  %v1541_v34 = vshrl.u32 %v4254_v63, 16  ;;  %v255_v61 = vld [vmem:[%s4104_s8 + $0x50] sm:$0xf]  ;;  %v3739_v5 = vld [vmem:[#allocation5 + $0x1d4] ss:$8 sps:$4 sm:$0xff]   ;;  %v1546_v23 = vrot.slane %v1544_v25, 2 }
  0x53   : > { %2438 = vmatprep.subr.bf16.mxu1 %v3721_v35  ;;  %v3735_v35 = vld [vmem:[#allocation5 + $0xe0] ss:$8 sps:$4 sm:$0xff]   ;;  %6483 = vst [vmem:[#allocation24_spill] sm:$0xff] %v4345_v38  ;;  %v257_v25 = vld [vmem:[%s4104_s8 + $0x58] sm:$0xf]  ;;  %6486 = vst [vmem:[#allocation27_spill] sm:$0xff] %v4363_v50 }
  0x54   : > { %353 = vadd.xlane.f32.xlu1 %v4205_v21  ;;  %351 = vadd.xlane.f32.xlu0 %v4213_v28  ;;  %v4331_v45 = vcombine.low %v4302_v33, %v4299_v29  ;;  %v1543_v14 = vrot.slane %v1541_v34, 1  ;;  %v258_v34 = vld [vmem:[%s4104_s8 + $0x5c] sm:$0xf]  ;;  %v3743_v55 = vld [vmem:[#allocation5 + $0xc4] ss:$8 sps:$4 sm:$0xff]   ;;  %s3881_s6 = scalar_lea.vmem %s6329_s22, 3584 }
  0x55   : > { %2266 = vmatpush1.bf16.msra.mxu0 %v3723_v52  ;;  %v4319_v52 = vmul.f32 %v4145_v37, %v4145_v37  ;;  %v3737_v37 = vld [vmem:[#allocation5 + $0xd4] ss:$8 sps:$4 sm:$0xff]   ;;  %p3882_p4 = scmp.ne.s32.totalorder %s6329_s22, %s3881_s6  ;;  %p6728_p8 = scmp.ne.s32.totalorder %s6465_s25, 0 }
  0x56   : > { %2439 = vmatpush1.bf16.msra.mxu1 %v3724_v53  ;;  %2267 = vmatprep.subr.bf16.mxu0 %v3725_v58  ;;  %v4323_v53 = vcombine.low %v4158_v46, %v4152_v42  ;;  %v4327_v58 = vunpack.c.l.bf16 %v4260_v30  ;;  %v288_v42 = vmax.bf16 %v6394_v0, %v256_v36  ;;  %v4338_v46 = vmax.bf16 %v6394_v0, %v255_v61  ;;  %s3974_s29 = smov [#allocation7]  }
  0x57   : > { %2440 = vmatprep.subr.bf16.mxu1 %v3727_v1  ;;  %6480 = vst [vmem:[#allocation21_spill] sm:$0xff] %v4319_v52  ;;  %v4354_v36 = vunpack.c.l.bf16 %v4299_v29  ;;  %v290_v61 = vmax.bf16 %v6394_v0, %v258_v34  ;;  %v289_v1 = vmax.bf16 %v6394_v0, %v257_v25  ;;  %v4380_v34 = vmul.f32 %v4187_v4, %v4187_v4  ;;  %v3745_v0 = vld [vmem:[#allocation5 + $0x1c4] ss:$8 sps:$4 sm:$0xff]   ;;  %p3883_p10 = pnand %p3882_p4, %p6728_p8  ;;  %s3885_s7 = sshll.u32 %s3974_s29, 4  ;;  %s3886_s7 = int_to_ptr.vmem [resolvable:$false] %s3885_s7 }
  0x58   : > { %357 = vadd.xlane.f32.xlu1 %v4228_v44  ;;  %355 = vadd.xlane.f32.xlu0 %v4240_v51  ;;  %6481 = vst [vmem:[#allocation22_spill] sm:$0xff] %v4323_v53  ;;  %6482 = vst [vmem:[#allocation23_spill] sm:$0xff] %v4327_v58  ;;  %v4384_v25 = vcombine.low %v4199_v11, %v4196_v10  ;;  %v4396_v4 = vunpack.c.l.bf16 %v288_v42  ;;  %v259_v51 = vld [vmem:[%s4104_s8 + $0x60] sm:$0xf]  ;;  %v4407_v28 = vunpack.c.l.bf16 %v4338_v46  ;;  %p3888_p13 = scmp.lt.s32.totalorder %s6329_s22, %s3886_s7 }
  0x59   : > { %2268 = vmatpush2.bf16.msra.mxu0 %v3729_v3  ;;  %v4341_v3 = vrot.slane %v1343_v16, 1  ;;  %6485 = vst [vmem:[#allocation26_spill] sm:$0xff] %v4354_v36  ;;  %v3741_v16 = vld [vmem:[#allocation5 + $0xd0] ss:$8 sps:$4 sm:$0xff]   ;;  %6488 = vst [vmem:[#allocation29_spill] sm:$0xff] %v4380_v34  ;;  %v4430_v34 = vunpack.c.l.bf16 %v290_v61  ;;  %p3884_p11 = pneg %p3883_p10 }
  0x5a   : > { %2441 = vmatpush2.bf16.msra.mxu1 %v3730_v7  ;;  %2269 = vmatprep.subr.bf16.mxu0 %v3731_v13  ;;  %v1550_v7 = vshrl.u32 %v4286_v20, 16  ;;  %v4350_v13 = vcombine.low %v4180_v60, %v4177_v59  ;;  %v4367_v59 = vunpack.c.l.bf16 %v4302_v33  ;;  %v3742_v60 = vld [vmem:[#allocation5 + $0x1d0] ss:$8 sps:$4 sm:$0xff]   ;;  %6489 = vst [vmem:[#allocation30_spill] sm:$0xff] %v4384_v25  ;;  %6491 = vst [vmem:[#allocation32_spill] sm:$0xff] %v4396_v4 }
  0x5b   : > { %2442 = vmatprep.subr.bf16.mxu1 %v3733_v12  ;;  %v4357_v12 = vcombine.low %v4338_v46, %v288_v42  ;;  %6493 = vst [vmem:[#allocation33_spill] sm:$0xff] %v4407_v28  ;;  %6495 = vst [vmem:[#allocation34_spill] sm:$0xff] %v4430_v34 }
  0x5c   : > { %361 = vadd.xlane.f32.xlu1 %v4264_v31  ;;  %359 = vadd.xlane.f32.xlu0 %v4269_v6  ;;  %6484 = vst [vmem:[#allocation25_spill] sm:$0xff] %v4350_v13  ;;  %6487 = vst [vmem:[#allocation28_spill] sm:$0xff] %v4367_v59  ;;  %v4374_v6 = vcombine.low %v4196_v10, %v4216_v32  ;;  %v3747_v32 = vld [vmem:[#allocation5 + $0xc0] ss:$8 sps:$4 sm:$0xff]   ;;  %v4386_v31 = vcombine.low %v289_v1, %v290_v61  ;;  %v6492_v10 = vrot.slane %v4172_v56, 1 }
  0x5d   : > { %2270 = vmatpush2.bf16.msra.mxu0 %v3735_v35  ;;  %v4393_v35 = vmul.f32 %v4193_v8, %v4193_v8  ;;  %v1552_v44 = vrot.slane %v1550_v7, 1  ;;  %v3748_v8 = vld [vmem:[#allocation5 + $0x1c0] ss:$8 sps:$4 sm:$0xff]   ;;  %v3749_v7 = vld [vmem:[#allocation5 + $0xb4] ss:$8 sps:$4 sm:$0xff]  }
  0x5e   : > { %2443 = vmatpush2.bf16.msra.mxu1 %v3736_v41  ;;  %2271 = vmatprep.subr.bf16.mxu0 %v3737_v37  ;;  %v4388_v41 = vcombine.low %v288_v42, %v289_v1  ;;  %v260_v37 = vld [vmem:[%s4104_s8 + $0x64] sm:$0xf]  ;;  %v4402_v11 = vsel %vm523_vm2, %v1479_v62, %v6492_v10  ;;  %v4413_v62 = vcombine.low %v4208_v22, %v4234_v48  ;;  %v3751_v10 = vld [vmem:[#allocation5 + $0x1b4] ss:$8 sps:$4 sm:$0xff]   ;;  %v262_v22 = vld [vmem:[%s4104_s8 + $0x6c] sm:$0xf] }
  0x5f   : > { %2444 = vmatprep.subr.bf16.mxu1 %v3739_v5  ;;  %6490 = vst [vmem:[#allocation31_spill] sm:$0xff] %v4393_v35  ;;  %v1351_v5 = vshll.u32 %v4323_v53, 16  ;;  %v261_v48 = vld [vmem:[%s4104_s8 + $0x68] sm:$0xf] }
  0x60   : > { %365 = vadd.xlane.f32.xlu1 %v4308_v19  ;;  %363 = vadd.xlane.f32.xlu0 %v4327_v58  ;;  %v1553_v19 = vshll.u32 %v4286_v20, 16  ;;  %v1347_v58 = vshrl.u32 %v4244_v54, 16  ;;  %v4437_v54 = vcombine.low %v4231_v47, %v4260_v30  ;;  %v263_v47 = vld [vmem:[%s4104_s8 + $0x70] sm:$0xf] }
  0x61   : > { %2272 = vmatpush2.bf16.msra.mxu0 %v3741_v16  ;;  %v4418_v16 = vsel %vm1326_vm0, %v4311_v43, %v4341_v3 }
  0x62   : > { %v1555_v21 = vrot.slane %v1553_v19, 2  ;;  %2445 = vmatpush2.bf16.msra.mxu1 %v3742_v60  ;;  %2273 = vmatprep.subr.bf16.mxu0 %v3743_v55  ;;  %v1547_v60 = vor.u32 %v1546_v23, %v1543_v14  ;;  %v1355_v55 = vshrl.u32 %v4323_v53, 16  ;;  %6496 = vst [vmem:[#allocation35_spill] sm:$0xff] %v4437_v54  ;;  %v4440_v14 = vunpack.c.l.bf16 %v289_v1  ;;  %v3753_v23 = vld [vmem:[#allocation5 + $0xb0] ss:$8 sps:$4 sm:$0xff]  }
  0x63   : > { %2446 = vmatprep.subr.bf16.mxu1 %v3745_v0  ;;  %v1359_v0 = vshll.u32 %v4350_v13, 16  ;;  %v1353_v53 = vrot.slane %v1351_v5, 1  ;;  %v6499_v5 = vrot.slane %v4172_v56, 1 }
  0x64   : > { %369 = vadd.xlane.f32.xlu1 %v4354_v36  ;;  %367 = vadd.xlane.f32.xlu0 %v4367_v59  ;;  %v6494_v36 = vmov 0   ;;  %v1559_v59 = vshrl.u32 %v4374_v6, 16  ;;  %6497 = vst [vmem:[#allocation36_spill] sm:$0xff] %v4440_v14 }
  0x65   : > { %v292_v42 = vmax.bf16 %v6494_v36, %v260_v37  ;;  %v291_v35 = vmax.bf16 %v6494_v36, %v259_v51  ;;  %v1562_v37 = vshll.u32 %v4374_v6, 16  ;;  %v294_v43 = vmax.bf16 %v6494_v36, %v262_v22  ;;  %2274 = vmatpush2.bf16.msra.mxu0 %v3747_v32  ;;  %v3755_v22 = vld [vmem:[#allocation5 + $0xa4] ss:$8 sps:$4 sm:$0xff]  }
  0x66   : > { %v293_v50 = vmax.bf16 %v6494_v36, %v261_v48  ;;  %2447 = vmatpush2.bf16.msra.mxu1 %v3748_v8  ;;  %2275 = vmatprep.subr.bf16.mxu0 %v3749_v7  ;;  %v1561_v30 = vrot.slane %v1559_v59, 1  ;;  %v3757_v32 = vld [vmem:[#allocation5 + $0x1a4] ss:$8 sps:$4 sm:$0xff]   ;;  %v4449_v1 = vmax.bf16 %v6494_v36, %v263_v47  ;;  %v1357_v47 = vor.u32 %v1355_v55, %v1353_v53  ;;  %v266_v59 = vld [vmem:[%s4104_s8 + $0x7c] sm:$0x3] }
  0x67   : > { %v4422_v51 = vcombine.low %v291_v35, %v292_v42  ;;  %v4424_v19 = vcombine.low %v290_v61, %v291_v35  ;;  %v1349_v61 = vor.u32 %v1347_v58, %v4341_v3  ;;  %v1564_v52 = vrot.slane %v1562_v37, 2  ;;  %2448 = vmatprep.subr.bf16.mxu1 %v3751_v10  ;;  %v264_v10 = vld [vmem:[%s4104_s8 + $0x74] sm:$0xf] }
  0x68   : > { %373 = vadd.xlane.f32.xlu1 %v4396_v4  ;;  %371 = vadd.xlane.f32.xlu0 %v4407_v28  ;;  %v3754_v4 = vld [vmem:[#allocation5 + $0x1b0] ss:$8 sps:$4 sm:$0xff]   ;;  %v4443_v48 = vcombine.low %v293_v50, %v294_v43  ;;  %v4445_v38 = vcombine.low %v292_v42, %v293_v50  ;;  %v4453_v58 = vsel %vm1522_vm1, %v4218_v39, %v1547_v60  ;;  %v6498_v3 = vrot.slane %v4254_v63, 1 }
  0x69   : > { %v4464_v7 = vunpack.c.l.bf16 %v292_v42  ;;  %v1556_v37 = vor.u32 %v1555_v21, %v1552_v44  ;;  %v1361_v39 = vrot.slane %v1359_v0, 1  ;;  %v4469_v28 = vcombine.low %v4257_v2, %v4302_v33  ;;  %2276 = vmatpush2.bf16.msra.mxu0 %v3753_v23  ;;  %v3761_v2 = vld [vmem:[#allocation5 + $0x94] ss:$8 sps:$4 sm:$0xff]  }
  0x6a   : > { %v4460_v8 = vsel %vm523_vm2, %v6499_v5, %v6498_v3  ;;  %v4472_v56 = vunpack.c.l.bf16 %v291_v35  ;;  %v3759_v3 = vld [vmem:[#allocation5 + $0xa0] ss:$8 sps:$4 sm:$0xff]   ;;  %v4475_v42 = vcombine.low %v294_v43, %v4449_v1  ;;  %v4479_v21 = vsel %vm1326_vm0, %v1349_v61, %v1353_v53  ;;  %2449 = vmatpush2.bf16.msra.mxu1 %v3754_v4  ;;  %2277 = vmatprep.subr.bf16.mxu0 %v3755_v22  ;;  %v265_v35 = vld [vmem:[%s4104_s8 + $0x78] sm:$0xf]  ;;  %v3763_v23 = vld [vmem:[#allocation5 + $0x194] ss:$8 sps:$4 sm:$0xff]  }
  0x6b   : > { %6500 = vst [vmem:[#allocation37_spill] sm:$0xff] %v4464_v7  ;;  %v3760_v5 = vld [vmem:[#allocation5 + $0x1a0] ss:$8 sps:$4 sm:$0xff]   ;;  %v4483_v44 = vcombine.low %v4299_v29, %v4338_v46  ;;  %v4486_v33 = vmax.bf16 %v6494_v36, %v266_v59  ;;  %v4489_v55 = vor.u32 %v1564_v52, %v1561_v30  ;;  %v1363_v0 = vshrl.u32 %v4350_v13, 16  ;;  %2450 = vmatprep.subr.bf16.mxu1 %v3757_v32  ;;  %v3765_v59 = vld [vmem:[#allocation5 + $0x90] ss:$8 sps:$4 sm:$0xff]  }
  0x6c   : > { %377 = vadd.xlane.f32.xlu1 %v4430_v34  ;;  %375 = vadd.xlane.f32.xlu0 %v4440_v14  ;;  %6501 = vst [vmem:[#allocation38_spill] sm:$0xff] %v4472_v56  ;;  %v296_v53 = vmax.bf16 %v6494_v36, %v264_v10  ;;  %v297_v61 = vmax.bf16 %v6494_v36, %v265_v35  ;;  %v6502_v29 = vrot.slane %v4286_v20, 1  ;;  %v6503_v46 = vrot.slane %v4254_v63, 1  ;;  %s3887_s8 = scalar_lea.vmem %s3886_s7, 7168 }
  0x6d   : > { %v1375_v22 = vshll.u32 %v4222_v40, 16  ;;  %v4503_v52 = vunpack.c.l.bf16 %v294_v43  ;;  %v4506_v30 = vsel %vm1522_vm1, %v1547_v60, %v1556_v37  ;;  %v4509_v32 = vsel %vm1326_vm0, %v1357_v47, %v1361_v39  ;;  %2278 = vmatpush2.bf16.msra.mxu0 %v3759_v3  ;;  %v3766_v60 = vld [vmem:[#allocation5 + $0x190] ss:$8 sps:$4 sm:$0xff]   ;;  %p3889_p0 = scmp.lt.s32.totalorder %s3887_s8, %s3881_s6 }
  0x6e   : > { %v4499_v4 = vsel %vm523_vm2, %v6503_v46, %v6502_v29  ;;  %v1577_v36 = vshrl.u32 %v4437_v54, 16  ;;  %v4513_v63 = vunpack.c.l.bf16 %v293_v50  ;;  %v4515_v10 = vcombine.low %v296_v53, %v297_v61  ;;  %2451 = vmatpush2.bf16.msra.mxu1 %v3760_v5  ;;  %2279 = vmatprep.subr.bf16.mxu0 %v3761_v2  ;;  %v3767_v29 = vld [vmem:[#allocation5 + $0x84] ss:$8 sps:$4 sm:$0xff]  }
  0x6f   : > { %6504 = vst [vmem:[#allocation39_spill] sm:$0xff] %v4503_v52  ;;  %v1367_v43 = vshll.u32 %v4384_v25, 16  ;;  %v330_v47 = vunpack.c.l.bf16 %v4486_v33  ;;  %v4522_v46 = vsel %vm1522_vm1, %v1556_v37, %v4489_v55  ;;  %v4524_v3 = vor.u32 %v1363_v0, %v1361_v39  ;;  %2452 = vmatprep.subr.bf16.mxu1 %v3763_v23  ;;  %p3890_p6 = por %p3889_p0, %p3888_p13 }
  0x70   : > { %381 = vadd.xlane.f32.xlu1 %v4464_v7  ;;  %379 = vadd.xlane.f32.xlu0 %v4472_v56  ;;  %6505 = vst [vmem:[#allocation40_spill] sm:$0xff] %v4513_v63  ;;  %v1568_v50 = vshrl.u32 %v4413_v62, 16  ;;  %v3769_v56 = vld [vmem:[#allocation5 + $0x184] ss:$8 sps:$4 sm:$0xff]   ;;  %v4527_v7 = vrot.slane %v1375_v22, 1  ;;  %v1580_v35 = vshll.u32 %v4437_v54, 16  ;;  %v4533_v14 = vunpack.c.l.bf16 %v296_v53 }
  0x71   : > { %v1379_v5 = vshrl.u32 %v4222_v40, 16  ;;  %v1383_v2 = vshll.u32 %v4248_v57, 16  ;;  %v1579_v37 = vrot.slane %v1577_v36, 1  ;;  %v1586_v39 = vshrl.u32 %v4469_v28, 16  ;;  %2280 = vmatpush2.bf16.msra.mxu0 %v3765_v59  ;;  %v3771_v22 = vld [vmem:[#allocation5 + $0x80] ss:$8 sps:$4 sm:$0xff]   ;;  %p3891_p7 = pnand %p3890_p6, %p3884_p11 }
  0x72   : > { %v1589_v0 = vshll.u32 %v4469_v28, 16  ;;  %v4539_v23 = vunpack.c.l.bf16 %v4449_v1  ;;  %v1582_v34 = vrot.slane %v1580_v35, 2  ;;  %2453 = vmatpush2.bf16.msra.mxu1 %v3766_v60  ;;  %2281 = vmatprep.subr.bf16.mxu0 %v3767_v29  ;;  %v3772_v53 = vld [vmem:[#allocation5 + $0x180] ss:$8 sps:$4 sm:$0xff]   ;;  %v1387_v25 = vshrl.u32 %v4248_v57, 16 }
  0x73   : > { %v1381_v40 = vor.u32 %v1379_v5, %v4527_v7  ;;  %v1385_v54 = vrot.slane %v1383_v2, 1  ;;  %v1588_v36 = vrot.slane %v1586_v39, 1  ;;  %2454 = vmatprep.subr.bf16.mxu1 %v3769_v56  ;;  %v394_v59 = vsel %vm393_vm3, %v330_v47, 0.0 }
  0x74   : > { %385 = vadd.xlane.f32.xlu1 %v4503_v52  ;;  %383 = vadd.xlane.f32.xlu0 %v4513_v63  ;;  %v4542_v52 = vunpack.c.l.bf16 %v297_v61  ;;  %v1591_v13 = vrot.slane %v1589_v0, 2  ;;  %v1391_v35 = vshll.u32 %v4273_v9, 16  ;;  %v1595_v5 = vshrl.u32 %v4483_v44, 16 }
  0x75   : > { %v4547_v63 = vsel %vm1326_vm0, %v1381_v40, %v1385_v54  ;;  %v4552_v60 = vor.u32 %v1582_v34, %v1579_v37  ;;  %v1389_v29 = vor.u32 %v1387_v25, %v1385_v54  ;;  %v1598_v2 = vshll.u32 %v4483_v44, 16  ;;  %2282 = vmatpush2.bf16.msra.mxu0 %v3771_v22 }
  0x76   : > { %6506 = vst [vmem:[#allocation41_spill] sm:$0xff] %v4547_v63  ;;  %v1592_v61 = vor.u32 %v1591_v13, %v1588_v36  ;;  %v1492_v56 = vrot.slane %v4469_v28, 1  ;;  %v1393_v39 = vrot.slane %v1391_v35, 1  ;;  %v1597_v40 = vrot.slane %v1595_v5, 1  ;;  %2455 = vmatpush2.bf16.msra.mxu1 %v3772_v53 }
  0x77   : > { %v1494_v0 = vrot.slane %v4483_v44, 1  ;;  %v4558_v57 = vrot.slane %v1367_v43, 1  ;;  %v4560_v63 = vrot.slane %v1568_v50, 1  ;;  %v1600_v54 = vrot.slane %v1598_v2, 2 }
  0x78   : > { %389 = vadd.xlane.f32.xlu1 %v4533_v14  ;;  %387 = vadd.xlane.f32.xlu0 %v4539_v23  ;;  %v4564_v13 = vsel %vm1522_vm1, %v4552_v60, %v1592_v61  ;;  %v1571_v34 = vshll.u32 %v4413_v62, 16  ;;  %v4568_v25 = vsel %vm1326_vm0, %v1389_v29, %v1393_v39  ;;  %v428_v44 = vmul.f32 %v330_v47, %v330_v47 }
  0x79   : > { %v4573_v37 = vsel %vm523_vm2, %v1492_v56, %v1494_v0  ;;  %2284 = vmatmul.mubr.bf16.vlgmr.msra.gmra.mxu0 %v4127_v26  ;;  %v1601_v43 = vor.u32 %v1600_v54, %v1597_v40  ;;  %v1395_v50 = vshrl.u32 %v4273_v9, 16  ;;  %v1399_v22 = vshll.u32 %v4331_v45, 16  ;;  %2457 = vmatmul.mubr.bf16.vlgmr.msra.gmra.mxu1 %v4402_v11 }
  0x7a   : > { %v1604_v53 = vshrl.u32 %v4388_v41, 16  ;;  %v4582_v36 = vsel %vm393_vm3, %v428_v44, 0.0  ;;  %v1607_v35 = vshll.u32 %v4388_v41, 16  ;;  %v1496_v47 = vrot.slane %v4388_v41, 1  ;;  %2293 = vmatprep.mubr.bf16.mxu0 %v4418_v16  ;;  %2466 = vmatprep.mubr.bf16.mxu1 %v4453_v58 }
  0x7b   : > { %v1403_v26 = vshrl.u32 %v4331_v45, 16  ;;  %v1397_v5 = vor.u32 %v1395_v50, %v1393_v39  ;;  %v1401_v29 = vrot.slane %v1399_v22, 1  ;;  %v1407_v54 = vshll.u32 %v4357_v12, 16 }
  0x7c   : > { %395 = vadd.xlane.f32.xlu1 %v394_v59  ;;  %391 = vadd.xlane.f32.xlu0 %v4542_v52  ;;  %v4590_v59 = vsel %vm1522_vm1, %v1592_v61, %v1601_v43  ;;  %v1606_v2 = vrot.slane %v1604_v53, 1  ;;  %v1609_v11 = vrot.slane %v1607_v35, 2  ;;  %v4593_v40 = vsel %vm523_vm2, %v1494_v0, %v1496_v47 }
  0x7d   : > { %v1613_v41 = vshrl.u32 %v4424_v19, 16  ;;  %v4599_v16 = vsel %vm1326_vm0, %v1397_v5, %v1401_v29  ;;  %v1405_v58 = vor.u32 %v1403_v26, %v1401_v29  ;;  %v1616_v61 = vshll.u32 %v4424_v19, 16 }
  0x7e   : > { %v1498_v39 = vrot.slane %v4424_v19, 1  ;;  %v1610_v44 = vor.u32 %v1609_v11, %v1606_v2  ;;  %v1409_v50 = vrot.slane %v1407_v54, 1  ;;  %v1622_v22 = vshrl.u32 %v4445_v38, 16 }
  0x7f   : > { %v1615_v0 = vrot.slane %v1613_v41, 1  ;;  %v1618_v53 = vrot.slane %v1616_v61, 2  ;;  %v1411_v5 = vshrl.u32 %v4357_v12, 16  ;;  %v1415_v29 = vshll.u32 %v4386_v31, 16 }
  0x80   : > { %431 = vadd.xlane.f32.xlu1 %v4291_v24  ;;  %429 = vadd.xlane.f32.xlu0 %v4278_v17  ;;  %v4606_v35 = vsel %vm523_vm2, %v1496_v47, %v1498_v39  ;;  %v1625_v24 = vshll.u32 %v4445_v38, 16  ;;  %v4611_v26 = vsel %vm1522_vm1, %v1601_v43, %v1610_v44  ;;  %v4614_v19 = vsel %vm1326_vm0, %v1405_v58, %v1409_v50 }
  0x81   : > { %v1624_v17 = vrot.slane %v1622_v22, 1  ;;  %2294 = vmatmul.mubr.bf16.gmra.mxu0 %v4114_v15  ;;  %v1619_v2 = vor.u32 %v1618_v53, %v1615_v0  ;;  %v1413_v11 = vor.u32 %v1411_v5, %v1409_v50  ;;  %v1500_v54 = vrot.slane %v4445_v38, 1  ;;  %2467 = vmatmul.mubr.bf16.gmra.mxu1 %v4460_v8  ;;  %v6507_v53 = vld [vmem:[#allocation21_spill] sm:$0xff] }
  0x82   : > { %v1627_v47 = vrot.slane %v1625_v24, 2  ;;  %v1417_v43 = vrot.slane %v1415_v29, 1  ;;  %v1631_v41 = vshrl.u32 %v4475_v42, 16  ;;  %v1634_v58 = vshll.u32 %v4475_v42, 16  ;;  %2303 = vmatprep.mubr.bf16.mxu0 %v4479_v21  ;;  %2476 = vmatprep.mubr.bf16.mxu1 %v4506_v30 }
  0x83   : > { %v1419_v61 = vshrl.u32 %v4386_v31, 16  ;;  %v4628_v15 = vsel %vm1522_vm1, %v1610_v44, %v1619_v2  ;;  %v4631_v38 = vsel %vm523_vm2, %v1498_v39, %v1500_v54  ;;  %v3463_v21 = vcombine.low %v4486_v33, %v4486_v33 }
  0x84   : > { %435 = vadd.xlane.f32.xlu1 %v4295_v27  ;;  %433 = vadd.xlane.f32.xlu0 %v4282_v18  ;;  %v1628_v27 = vor.u32 %v1627_v47, %v1624_v17  ;;  %v1423_v18 = vshll.u32 %v4422_v51, 16  ;;  %v4635_v8 = vsel %vm1326_vm0, %v1413_v11, %v1417_v43  ;;  %v1633_v50 = vrot.slane %v1631_v41, 1  ;;  %v6508_v41 = vld [vmem:[#allocation24_spill] sm:$0xff] }
  0x85   : > { %v1636_v0 = vrot.slane %v1634_v58, 2  ;;  %v1421_v22 = vor.u32 %v1419_v61, %v1417_v43  ;;  %v1502_v39 = vrot.slane %v4475_v42, 1  ;;  %v1573_v24 = vrot.slane %v1571_v34, 2  ;;  %v6509_v58 = vld [vmem:[#allocation16_spill] sm:$0xff] }
  0x86   : > { %v4641_v30 = vsel %vm1522_vm1, %v1619_v2, %v1628_v27  ;;  %v1425_v44 = vrot.slane %v1423_v18, 1  ;;  %v1640_v17 = vshrl.u32 %v4515_v10, 16  ;;  %v1643_v29 = vshll.u32 %v4515_v10, 16 }
  0x87   : > { %v1637_v5 = vor.u32 %v1636_v0, %v1633_v50  ;;  %v1427_v2 = vshrl.u32 %v4422_v51, 16  ;;  %v1431_v42 = vshll.u32 %v4443_v48, 16  ;;  %v1504_v43 = vrot.slane %v4515_v10, 1  ;;  %v6510_v0 = vld [vmem:[#allocation27_spill] sm:$0xff] }
  0x88   : > { %439 = vadd.xlane.f32.xlu1 %v4315_v49  ;;  %437 = vadd.xlane.f32.xlu0 %v6507_v53  ;;  %v4650_v33 = vsel %vm1326_vm0, %v1421_v22, %v1425_v44  ;;  %v4653_v49 = vsel %vm523_vm2, %v1500_v54, %v1502_v39  ;;  %v1642_v11 = vrot.slane %v1640_v17, 1  ;;  %v1645_v34 = vrot.slane %v1643_v29, 2 }
  0x89   : > { %v4658_v47 = vsel %vm1522_vm1, %v1628_v27, %v1637_v5  ;;  %2304 = vmatmul.mubr.bf16.gmra.mxu0 %v6509_v58  ;;  %v1429_v61 = vor.u32 %v1427_v2, %v1425_v44  ;;  %v1433_v18 = vrot.slane %v1431_v42, 1  ;;  %v1649_v50 = vshrl.u32 %v3463_v21, 16  ;;  %2477 = vmatmul.mubr.bf16.gmra.mxu1 %v4499_v4  ;;  %v6513_v58 = vld [vmem:[#allocation31_spill] sm:$0xff] }
  0x8a   : > { %v1652_v54 = vshll.u32 %v3463_v21, 16  ;;  %v1646_v22 = vor.u32 %v1645_v34, %v1642_v11  ;;  %v4666_v27 = vsel %vm523_vm2, %v1502_v39, %v1504_v43  ;;  %v3448_v53 = vcombine.low %v4449_v1, %v4449_v1  ;;  %2313 = vmatprep.mubr.bf16.mxu0 %v4509_v32  ;;  %2486 = vmatprep.mubr.bf16.mxu1 %v4522_v46  ;;  %v6511_v1 = vld [vmem:[#allocation29_spill] sm:$0xff]  ;;  %v6512_v34 = vld [vmem:[#allocation11_spill] sm:$0xff] }
  0x8b   : > { %v1435_v10 = vshrl.u32 %v4443_v48, 16  ;;  %v4674_v44 = vsel %vm1326_vm0, %v1429_v61, %v1433_v18  ;;  %v1651_v17 = vrot.slane %v1649_v50, 1  ;;  %v1506_v2 = vrot.slane %v3463_v21, 1  ;;  %v6514_v61 = vld [vmem:[#allocation12_spill] sm:$0xff] }
  0x8c   : > { %443 = vadd.xlane.f32.xlu1 %v6508_v41  ;;  %441 = vadd.xlane.f32.xlu0 %v6510_v0  ;;  %v1654_v29 = vrot.slane %v1652_v54, 2  ;;  %v1574_v4 = vor.u32 %v1573_v24, %v4560_v63  ;;  %v4678_v39 = vsel %vm1522_vm1, %v1637_v5, %v1646_v22  ;;  %v1439_v11 = vshll.u32 %v3448_v53, 16  ;;  %v6517_v0 = vld [vmem:[#allocation30_spill] sm:$0xff] }
  0x8d   : > { %v1437_v42 = vor.u32 %v1435_v10, %v1433_v18  ;;  %v408_v32 = vmul.f32 %v6512_v34, %v6512_v34  ;;  %v4684_v46 = vsel %vm523_vm2, %v1504_v43, %v1506_v2  ;;  %v407_v21 = vmul.f32 %v6514_v61, %v6514_v61  ;;  %v6525_v61 = vld [vmem:[#allocation20_spill] sm:$0xff] }
  0x8e   : > { %v1655_v41 = vor.u32 %v1654_v29, %v1651_v17  ;;  %v1441_v63 = vrot.slane %v1439_v11, 1  ;;  %v6515_v24 = vrot.slane %v4374_v6, 1  ;;  %v6516_v5 = vrot.slane %v4286_v20, 1  ;;  %v6518_v17 = vld [vmem:[#allocation22_spill] sm:$0xff]  ;;  %v6527_v6 = vld [vmem:[#allocation35_spill] sm:$0xff] }
  0x8f   : > { %v1370_v43 = vsel %vm1326_vm0, %v4524_v3, %v4558_v57  ;;  %v1575_v54 = vsel %vm1522_vm1, %v4489_v55, %v1574_v4  ;;  %v1371_v53 = vshrl.u32 %v6517_v0, 16  ;;  %v6519_v20 = vld [vmem:[#allocation14_spill] sm:$0xff]  ;;  %v1488_v55 = vrot.slane %v4413_v62, 1 }
  0x90   : > { %447 = vadd.xlane.f32.xlu1 %v6511_v1  ;;  %445 = vadd.xlane.f32.xlu0 %v6513_v58  ;;  %v1487_v18 = vsel %vm523_vm2, %v6516_v5, %v6515_v24  ;;  %v4695_v50 = vsel %vm1522_vm1, %v1646_v22, %v1655_v41  ;;  %v4704_v10 = vsel %vm1326_vm0, %v1437_v42, %v1441_v63  ;;  %v6520_v22 = vld [vmem:[#allocation15_spill] sm:$0xff]  ;;  %v6521_v42 = vld [vmem:[#allocation18_spill] sm:$0xff]  ;;  %v1490_v5 = vrot.slane %v6527_v6, 1 }
  0x91   : > { %2314 = vmatmul.mubr.bf16.gmra.mxu0 %v6518_v17  ;;  %v410_v29 = vmul.f32 %v6519_v20, %v6519_v20  ;;  %2487 = vmatmul.mubr.bf16.gmra.mxu1 %v1487_v18  ;;  %v409_v2 = vmul.f32 %v6520_v22, %v6520_v22  ;;  %v1373_v3 = vor.u32 %v1371_v53, %v4558_v57  ;;  %v6522_v1 = vld [vmem:[#allocation19_spill] sm:$0xff]  ;;  %v6524_v57 = vld [vmem:[#allocation25_spill] sm:$0xff]  ;;  %v6533_v22 = vld [vmem:[#allocation34_spill] sm:$0xff] }
  0x92   : > { %2323 = vmatprep.mubr.bf16.mxu0 %v1370_v43  ;;  %2496 = vmatprep.mubr.bf16.mxu1 %v1575_v54  ;;  %v412_v11 = vmul.f32 %v6521_v42, %v6521_v42  ;;  %v411_v34 = vmul.f32 %v6522_v1, %v6522_v1  ;;  %v1584_v62 = vsel %vm1522_vm1, %v1574_v4, %v4552_v60  ;;  %v6526_v63 = vld [vmem:[#allocation23_spill] sm:$0xff]  ;;  %v6529_v60 = vld [vmem:[#allocation28_spill] sm:$0xff]  ;;  %v6531_v17 = vld [vmem:[#allocation33_spill] sm:$0xff] }
  0x93   : > { %v1378_v58 = vsel %vm1326_vm0, %v1373_v3, %v4527_v7  ;;  %v6528_v7 = vld [vmem:[#allocation26_spill] sm:$0xff]  ;;  %v415_v4 = vmul.f32 %v6529_v60, %v6529_v60  ;;  %v1491_v43 = vsel %vm523_vm2, %v1488_v55, %v1490_v5  ;;  %v6530_v54 = vld [vmem:[#allocation32_spill] sm:$0xff]  ;;  %v417_v20 = vmul.f32 %v6531_v17, %v6531_v17  ;;  %v6535_v42 = vld [vmem:[#allocation13_spill] sm:$0xff] }
  0x94   : > { %451 = vadd.xlane.f32.xlu1 %v408_v32  ;;  %449 = vadd.xlane.f32.xlu0 %v407_v21  ;;  %v6523_v32 = vmov %v6515_v24  ;;  %v414_v21 = vmul.f32 %v6525_v61, %v6525_v61  ;;  %v413_v24 = vmul.f32 %v6526_v63, %v6526_v63  ;;  %v416_v18 = vmul.f32 %v6528_v7, %v6528_v7 }
  0x95   : > { %v1489_v41 = vsel %vm523_vm2, %v6523_v32, %v1488_v55  ;;  %v418_v53 = vmul.f32 %v6530_v54, %v6530_v54  ;;  %v6534_v55 = vld [vmem:[#allocation36_spill] sm:$0xff]  ;;  %v1493_v3 = vsel %vm523_vm2, %v1490_v5, %v1492_v56  ;;  %v6538_v32 = vld [vmem:[#allocation39_spill] sm:$0xff] }
  0x96   : > { %v424_v28 = vmul.f32 %v6538_v32, %v6538_v32  ;;  %v6539_v56 = vld [vmem:[#allocation40_spill] sm:$0xff] }
  0x98   : > { %455 = vadd.xlane.f32.xlu1 %v410_v29  ;;  %453 = vadd.xlane.f32.xlu0 %v409_v2  ;;  %v6532_v29 = vld [vmem:[#allocation41_spill] sm:$0xff]  ;;  %v420_v2 = vmul.f32 %v6533_v22, %v6533_v22 }
  0x99   : > { %2324 = vmatmul.mubr.bf16.gmra.mxu0 %v6524_v57  ;;  %2497 = vmatmul.mubr.bf16.gmra.mxu1 %v1489_v41  ;;  %v423_v41 = vmul.f32 %v6539_v56, %v6539_v56 }
  0x9a   : > { %2333 = vmatprep.mubr.bf16.mxu0 %v1378_v58  ;;  %2506 = vmatprep.mubr.bf16.mxu1 %v1584_v62  ;;  %v6540_v58 = vld [vmem:[#allocation17_spill] sm:$0xff]  ;;  %v426_v62 = vmul.f32 %v4533_v14, %v4533_v14 }
  0x9c   : > { %459 = vadd.xlane.f32.xlu1 %v412_v11  ;;  %457 = vadd.xlane.f32.xlu0 %v411_v34  ;;  %v6536_v11 = vld [vmem:[#allocation37_spill] sm:$0xff] }
  0x9d   : > { %v422_v1 = vmul.f32 %v6536_v11, %v6536_v11 }
  0xa0   : > { %463 = vadd.xlane.f32.xlu1 %v414_v21  ;;  %461 = vadd.xlane.f32.xlu0 %v413_v24 }
  0xa1   : > { %2334 = vmatmul.mubr.bf16.gmra.mxu0 %v6517_v0  ;;  %2507 = vmatmul.mubr.bf16.gmra.mxu1 %v1491_v43  ;;  %v419_v0 = vmul.f32 %v6534_v55, %v6534_v55 }
  0xa2   : > { %2343 = vmatprep.mubr.bf16.mxu0 %v6532_v29  ;;  %2516 = vmatprep.mubr.bf16.mxu1 %v4564_v13  ;;  %v6537_v13 = vld [vmem:[#allocation38_spill] sm:$0xff] }
  0xa3   : > { %v421_v34 = vmul.f32 %v6537_v13, %v6537_v13 }
  0xa4   : > { %467 = vadd.xlane.f32.xlu1 %v416_v18  ;;  %465 = vadd.xlane.f32.xlu0 %v415_v4 }
  0xa8   : > { %471 = vadd.xlane.f32.xlu1 %v418_v53  ;;  %469 = vadd.xlane.f32.xlu0 %v417_v20 }
  0xa9   : > { %2344 = vmatmul.mubr.bf16.gmra.mxu0 %v6535_v42  ;;  %2517 = vmatmul.mubr.bf16.gmra.mxu1 %v1493_v3 }
  0xaa   : > { %2353 = vmatprep.mubr.bf16.mxu0 %v4568_v25  ;;  %2526 = vmatprep.mubr.bf16.mxu1 %v4590_v59  ;;  %v425_v25 = vmul.f32 %v4539_v23, %v4539_v23  ;;  %v427_v59 = vmul.f32 %v4542_v52, %v4542_v52 }
  0xac   : > { %475 = vadd.xlane.f32.xlu1 %v420_v2  ;;  %473 = vadd.xlane.f32.xlu0 %v419_v0 }
  0xb0   : > { %479 = vadd.xlane.f32.xlu1 %v422_v1  ;;  %477 = vadd.xlane.f32.xlu0 %v421_v34 }
  0xb1   : > { %2354 = vmatmul.mubr.bf16.gmra.mxu0 %v6540_v58  ;;  %2527 = vmatmul.mubr.bf16.gmra.mxu1 %v4573_v37 }
  0xb2   : > { %2363 = vmatprep.mubr.bf16.mxu0 %v4599_v16  ;;  %2536 = vmatprep.mubr.bf16.mxu1 %v4611_v26 }
  0xb4   : > { %483 = vadd.xlane.f32.xlu1 %v424_v28  ;;  %481 = vadd.xlane.f32.xlu0 %v423_v41 }
  0xb8   : > { %487 = vadd.xlane.f32.xlu1 %v426_v62  ;;  %485 = vadd.xlane.f32.xlu0 %v425_v25 }
  0xb9   : > { %2364 = vmatmul.mubr.bf16.gmra.mxu0 %v4273_v9  ;;  %2537 = vmatmul.mubr.bf16.gmra.mxu1 %v4593_v40 }
  0xba   : > { %2373 = vmatprep.mubr.bf16.mxu0 %v4614_v19  ;;  %2546 = vmatprep.mubr.bf16.mxu1 %v4628_v15 }
  0xbc   : > { %492 = vadd.xlane.f32.xlu1 %v4582_v36  ;;  %489 = vadd.xlane.f32.xlu0 %v427_v59 }
  0xc1   : > { %2374 = vmatmul.mubr.bf16.gmra.mxu0 %v4331_v45  ;;  %2547 = vmatmul.mubr.bf16.gmra.mxu1 %v4606_v35 }
  0xc2   : > { %2383 = vmatprep.mubr.bf16.mxu0 %v4635_v8  ;;  %2556 = vmatprep.mubr.bf16.mxu1 %v4641_v30 }
  0xc9   : > { %v336_v14 = vpop.xlane.xlu1 %335  ;;  %v332_v52 = vpop.xlane.xlu0 %331  ;;  %2384 = vmatmul.mubr.bf16.gmra.mxu0 %v4357_v12  ;;  %2557 = vmatmul.mubr.bf16.gmra.mxu1 %v4631_v38 }
  0xca   : > { %2393 = vmatprep.mubr.bf16.mxu0 %v4650_v33  ;;  %2566 = vmatprep.mubr.bf16.mxu1 %v4658_v47  ;;  %v527_v37 = vrot.slane %v336_v14, 1  ;;  %v524_v36 = vrot.slane %v332_v52, 1 }
  0xcd   : > { %v338_v9 = vpop.xlane.xlu1 %337  ;;  %v334_v23 = vpop.xlane.xlu0 %333 }
  0xce   : > { %v525_v45 = vrot.slane %v334_v23, 1  ;;  %v529_v35 = vrot.slane %v338_v9, 1  ;;  %v783_v15 = vrot.slane %v338_v9, 2  ;;  %v1013_v24 = vrot.slane %v338_v9, 3 }
  0xd0   : > { %v528_v40 = vsel %vm523_vm2, %v525_v45, %v527_v37  ;;  %v526_v26 = vsel %vm523_vm2, %v524_v36, %v525_v45 }
  0xd1   : > { %v4784_v16 = vpop.xlane.xlu1 %341  ;;  %v4788_v19 = vpop.xlane.xlu0 %339  ;;  %v610_v33 = vadd.f32 %v528_v40, %v334_v23  ;;  %2394 = vmatmul.mubr.bf16.gmra.mxu0 %v4386_v31  ;;  %2567 = vmatmul.mubr.bf16.gmra.mxu1 %v4653_v49  ;;  %v609_v21 = vadd.f32 %v526_v26, %v332_v52  ;;  %v530_v31 = vsel %vm523_vm2, %v527_v37, %v529_v35 }
  0xd2   : > { %v786_v12 = vrot.slane %v4784_v16, 2  ;;  %v1016_v38 = vrot.slane %v4784_v16, 3  ;;  %v784_v8 = vrot.slane %v4788_v19, 2  ;;  %v1014_v30 = vrot.slane %v4788_v19, 3  ;;  %2576 = vmatprep.mubr.bf16.mxu1 %v4678_v39  ;;  %2403 = vmatprep.mubr.bf16.mxu0 %v4674_v44 }
  0xd3   : > { %v531_v47 = vrot.slane %v4788_v19, 1  ;;  %v533_v7 = vrot.slane %v4784_v16, 1  ;;  %v611_v55 = vadd.f32 %v530_v31, %v336_v14 }
  0xd4   : > { %v787_v61 = vsel %vm782_vm4, %v784_v8, %v786_v12  ;;  %v785_v63 = vsel %vm782_vm4, %v783_v15, %v784_v8  ;;  %v1017_v49 = vsel %vm1012_vm5, %v1014_v30, %v1016_v38  ;;  %v1015_v54 = vsel %vm1012_vm5, %v1013_v24, %v1014_v30 }
  0xd5   : > { %v4795_v57 = vpop.xlane.xlu1 %345  ;;  %v4800_v6 = vpop.xlane.xlu0 %343  ;;  %v869_v5 = vadd.f32 %v787_v61, %v610_v33  ;;  %v868_v60 = vadd.f32 %v785_v63, %v609_v21  ;;  %v532_v53 = vsel %vm523_vm2, %v529_v35, %v531_v47  ;;  %v534_v34 = vsel %vm523_vm2, %v531_v47, %v533_v7 }
  0xd6   : > { %v788_v18 = vrot.slane %v4800_v6, 2  ;;  %v790_v4 = vrot.slane %v4795_v57, 2  ;;  %v1018_v39 = vrot.slane %v4800_v6, 3  ;;  %v1020_v29 = vrot.slane %v4795_v57, 3 }
  0xd7   : > { %v1099_v43 = vadd.f32 %v1017_v49, %v869_v5  ;;  %v1098_v44 = vadd.f32 %v1015_v54, %v868_v60  ;;  %v537_v0 = vrot.slane %v4795_v57, 1  ;;  %v612_v42 = vadd.f32 %v532_v53, %v338_v9 }
  0xd8   : > { %v789_v20 = vsel %vm782_vm4, %v786_v12, %v788_v18  ;;  %v535_v11 = vrot.slane %v4800_v6, 1  ;;  %v791_v13 = vsel %vm782_vm4, %v788_v18, %v790_v4  ;;  %v1019_v41 = vsel %vm1012_vm5, %v1016_v38, %v1018_v39 }
  0xd9   : > { %v4812_v17 = vpop.xlane.xlu1 %349  ;;  %v4816_v22 = vpop.xlane.xlu0 %347  ;;  %v1672_v2 = vmul.f32 0.00390625, %v1099_v43  ;;  %v1671_v3 = vmul.f32 0.00390625, %v1098_v44  ;;  %2404 = vmatmul.mubr.bf16.gmra.mxu0 %v4422_v51  ;;  %v870_v1 = vadd.f32 %v789_v20, %v611_v55  ;;  %2577 = vmatmul.mubr.bf16.gmra.mxu1 %v4666_v27  ;;  %v871_v58 = vadd.f32 %v791_v13, %v612_v42 }
  0xda   : > { %v541_v32 = vrot.slane %v4812_v17, 1  ;;  %v792_v28 = vrot.slane %v4816_v22, 2  ;;  %v794_v62 = vrot.slane %v4812_v17, 2  ;;  %v1024_v51 = vrot.slane %v4812_v17, 3  ;;  %2586 = vmatprep.mubr.bf16.mxu1 %v4695_v50  ;;  %2413 = vmatprep.mubr.bf16.mxu0 %v4704_v10 }
  0xdb   : > { %2605 = vperm.xlu1 %3676, %v1672_v2   ;;  %2600 = vperm.xlu0 %3675, %v1671_v3   ;;  %v1100_v59 = vadd.f32 %v1019_v41, %v870_v1  ;;  %v1021_v14 = vsel %vm1012_vm5, %v1018_v39, %v1020_v29  ;;  %v539_v52 = vrot.slane %v4816_v22, 1  ;;  %v1022_v27 = vrot.slane %v4816_v22, 3 }
  0xdc   : > { %v4838_v9 = vmul.f32 %v1672_v2, %v1672_v2  ;;  %v1101_v23 = vadd.f32 %v1021_v14, %v871_v58  ;;  %v4840_v37 = vmul.f32 %v1671_v3, %v1671_v3  ;;  %v793_v12 = vsel %vm782_vm4, %v790_v4, %v792_v28 }
  0xdd   : > { %v4825_v56 = vpop.xlane.xlu1 %353  ;;  %v4831_v25 = vpop.xlane.xlu0 %351  ;;  %v1673_v40 = vmul.f32 0.00390625, %v1100_v59  ;;  %v613_v30 = vadd.f32 %v534_v34, %v4788_v19  ;;  %v536_v33 = vsel %vm523_vm2, %v533_v7, %v535_v11  ;;  %v1023_v21 = vsel %vm1012_vm5, %v1020_v29, %v1022_v27 }
  0xde   : > { %v545_v45 = vrot.slane %v4825_v56, 1  ;;  %v543_v36 = vrot.slane %v4831_v25, 1  ;;  %v798_v35 = vrot.slane %v4825_v56, 2  ;;  %v1028_v50 = vrot.slane %v4825_v56, 3 }
  0xdf   : > { %v796_v10 = vrot.slane %v4831_v25, 2  ;;  %v1026_v15 = vrot.slane %v4831_v25, 3  ;;  %2610 = vperm.xlu1 %3676, %v1673_v40   ;;  %v1674_v61 = vmul.f32 0.00390625, %v1101_v23  ;;  %v795_v63 = vsel %vm782_vm4, %v792_v28, %v794_v62 }
  0xe0   : > { %v872_v24 = vadd.f32 %v793_v12, %v613_v30  ;;  %v1025_v5 = vsel %vm1012_vm5, %v1022_v27, %v1024_v51  ;;  %v544_v19 = vsel %vm523_vm2, %v541_v32, %v543_v36  ;;  %v538_v31 = vsel %vm523_vm2, %v535_v11, %v537_v0 }
  0xe1   : > { %v4847_v26 = vpop.xlane.xlu1 %357  ;;  %v4852_v8 = vpop.xlane.xlu0 %355  ;;  %2414 = vmatmul.mubr.bf16.gmra.mxu0 %v4443_v48  ;;  %2587 = vmatmul.mubr.bf16.gmra.mxu1 %v4684_v46  ;;  %v614_v49 = vadd.f32 %v536_v33, %v4784_v16  ;;  %v4882_v4 = vmul.f32 %v1673_v40, %v1673_v40  ;;  %v618_v39 = vadd.f32 %v544_v19, %v4812_v17 }
  0xe2   : > { %v802_v38 = vrot.slane %v4847_v26, 2  ;;  %v800_v47 = vrot.slane %v4852_v8, 2  ;;  %v1032_v7 = vrot.slane %v4847_v26, 3  ;;  %v1030_v18 = vrot.slane %v4852_v8, 3 }
  0xe3   : > { %v6424_v43 = vrot.slane %v4847_v26, 1  ;;  %2615 = vperm.xlu1 %3676, %v1674_v61   ;;  %v1102_v53 = vadd.f32 %v1023_v21, %v872_v24  ;;  %v6423_v46 = vrot.slane %v4852_v8, 1  ;;  %v873_v44 = vadd.f32 %v795_v63, %v614_v49 }
  0xe4   : > { %v803_v60 = vsel %vm782_vm4, %v800_v47, %v802_v38  ;;  %v615_v20 = vadd.f32 %v538_v31, %v4800_v6  ;;  %v797_v3 = vsel %vm782_vm4, %v794_v62, %v796_v10  ;;  %v4895_v42 = vmul.f32 %v1674_v61, %v1674_v61 }
  0xe5   : > { %v4873_v48 = vpop.xlane.xlu1 %361  ;;  %v4885_v54 = vpop.xlane.xlu0 %359  ;;  %v1675_v2 = vmul.f32 0.00390625, %v1102_v53  ;;  %v877_v55 = vadd.f32 %v803_v60, %v618_v39  ;;  %v1103_v1 = vadd.f32 %v1025_v5, %v873_v44  ;;  %v1033_v13 = vsel %vm1012_vm5, %v1030_v18, %v1032_v7 }
  0xe6   : > { %v6422_v16 = vrot.slane %v4873_v48, 2  ;;  %v804_v29 = vrot.slane %v4885_v54, 2  ;;  %v874_v6 = vadd.f32 %v797_v3, %v615_v20  ;;  %v6433_v34 = vrot.slane %v4873_v48, 1 }
  0xe7   : > { %v6420_v28 = vrot.slane %v4873_v48, 3  ;;  %v6419_v41 = vrot.slane %v4885_v54, 1  ;;  %2620 = vperm.xlu1 %3676, %v1675_v2   ;;  %v1034_v59 = vrot.slane %v4885_v54, 3  ;;  %v1027_v27 = vsel %vm1012_vm5, %v1024_v51, %v1026_v15 }
  0xe8   : > { %v548_v23 = vsel %vm523_vm2, %v545_v45, %v6423_v46  ;;  %v1676_v40 = vmul.f32 0.00390625, %v1103_v1  ;;  %v1107_v12 = vadd.f32 %v1033_v13, %v877_v55  ;;  %v1104_v30 = vadd.f32 %v1027_v27, %v874_v6 }
  0xe9   : > { %v4897_v11 = vpop.xlane.xlu1 %365  ;;  %v4908_v62 = vpop.xlane.xlu0 %363  ;;  %v807_v33 = vsel %vm782_vm4, %v804_v29, %v6422_v16  ;;  %v4927_v61 = vmul.f32 %v1675_v2, %v1675_v2  ;;  %v620_v60 = vadd.f32 %v548_v23, %v4825_v56  ;;  %v1037_v44 = vsel %vm1012_vm5, %v1034_v59, %v6420_v28 }
  0xea   : > { %v557_v58 = vrot.slane %v4897_v11, 1  ;;  %v555_v14 = vrot.slane %v4908_v62, 1  ;;  %v6425_v21 = vrot.slane %v4897_v11, 2  ;;  %v6427_v51 = vrot.slane %v4897_v11, 3 }
  0xeb   : > { %v808_v63 = vrot.slane %v4908_v62, 2  ;;  %2625 = vperm.xlu1 %3676, %v1676_v40   ;;  %v1680_v19 = vmul.f32 0.00390625, %v1107_v12  ;;  %v6428_v53 = vrot.slane %v4908_v62, 3  ;;  %v540_v20 = vsel %vm523_vm2, %v537_v0, %v539_v52 }
  0xec   : > { %v558_v5 = vsel %vm523_vm2, %v555_v14, %v557_v58  ;;  %v4955_v2 = vmul.f32 %v1676_v40, %v1676_v40  ;;  %v1677_v55 = vmul.f32 0.00390625, %v1104_v30  ;;  %v879_v3 = vadd.f32 %v807_v33, %v620_v60 }
  0xed   : > { %v4932_v24 = vpop.xlane.xlu1 %369  ;;  %v4940_v49 = vpop.xlane.xlu0 %367  ;;  %2645 = vperm.xlu0 %3675, %v1680_v19   ;;  %v799_v1 = vsel %vm782_vm4, %v796_v10, %v798_v35  ;;  %v4963_v13 = vadd.f32 %v558_v5, %v4908_v62  ;;  %v552_v0 = vsel %vm523_vm2, %v6424_v43, %v6419_v41  ;;  %v616_v33 = vadd.f32 %v540_v20, %v4795_v57 }
  0xee   : > { %v6421_v31 = vrot.slane %v4932_v24, 1  ;;  %v559_v39 = vrot.slane %v4940_v49, 1  ;;  %v6429_v6 = vrot.slane %v4932_v24, 2  ;;  %v6437_v27 = vrot.slane %v4932_v24, 3 }
  0xef   : > { %v6430_v40 = vrot.slane %v4940_v49, 2  ;;  %2630 = vperm.xlu1 %3676, %v1677_v55   ;;  %v1109_v12 = vadd.f32 %v1037_v44, %v879_v3  ;;  %v1042_v5 = vrot.slane %v4940_v49, 3  ;;  %v811_v28 = vsel %vm782_vm4, %v808_v63, %v6425_v21 }
  0xf0   : > { %v562_v10 = vsel %vm523_vm2, %v559_v39, %v6421_v31  ;;  %v4991_v31 = vmul.f32 %v1680_v19, %v1680_v19  ;;  %v875_v44 = vadd.f32 %v799_v1, %v616_v33  ;;  %v622_v3 = vadd.f32 %v552_v0, %v4847_v26 }
  0xf1   : > { %v4967_v23 = vpop.xlane.xlu1 %373  ;;  %v4980_v30 = vpop.xlane.xlu0 %371  ;;  %v1682_v16 = vmul.f32 0.00390625, %v1109_v12  ;;  %v4995_v57 = vadd.f32 %v562_v10, %v4940_v49  ;;  %v4997_v20 = vmul.f32 %v1677_v55, %v1677_v55  ;;  %v1029_v43 = vsel %vm1012_vm5, %v1026_v15, %v1028_v50 }
  0xf2   : > { %v6426_v60 = vrot.slane %v4967_v23, 1  ;;  %v563_v41 = vrot.slane %v4980_v30, 1  ;;  %v6435_v46 = vrot.slane %v4967_v23, 2  ;;  %v6436_v19 = vrot.slane %v4967_v23, 3 }
  0xf3   : > { %2655 = vperm.xlu0 %3675, %v1682_v16   ;;  %v1105_v1 = vadd.f32 %v1029_v43, %v875_v44  ;;  %v881_v0 = vadd.f32 %v811_v28, %v622_v3  ;;  %v542_v55 = vsel %vm523_vm2, %v539_v52, %v541_v32  ;;  %v816_v10 = vrot.slane %v4980_v30, 2 }
  0xf4   : > { %v566_v15 = vsel %vm523_vm2, %v563_v41, %v6426_v60  ;;  %v1041_v43 = vsel %vm1012_vm5, %v6428_v53, %v6427_v51  ;;  %v801_v17 = vsel %vm782_vm4, %v798_v35, %v800_v47  ;;  %v5033_v44 = vmul.f32 %v1682_v16, %v1682_v16 }
  0xf5   : > { %v5005_v21 = vpop.xlane.xlu1 %377  ;;  %v5008_v12 = vpop.xlane.xlu0 %375  ;;  %v1678_v32 = vmul.f32 0.00390625, %v1105_v1  ;;  %v1111_v52 = vadd.f32 %v1041_v43, %v881_v0  ;;  %v1046_v3 = vrot.slane %v4980_v30, 3  ;;  %v617_v60 = vadd.f32 %v542_v55, %v4816_v22 }
  0xf6   : > { %v6431_v28 = vrot.slane %v5005_v21, 1  ;;  %v6432_v33 = vrot.slane %v5008_v12, 1  ;;  %v556_v51 = vsel %vm523_vm2, %v6433_v34, %v555_v14  ;;  %v5045_v35 = vadd.f32 %v566_v15, %v4980_v30 }
  0xf7   : > { %2635 = vperm.xlu1 %3676, %v1678_v32   ;;  %v1684_v47 = vmul.f32 0.00390625, %v1111_v52  ;;  %v6438_v16 = vrot.slane %v5005_v21, 2  ;;  %v624_v1 = vadd.f32 %v556_v51, %v4873_v48  ;;  %v6441_v22 = vrot.slane %v5005_v21, 3 }
  0xf8   : > { %v6440_v55 = vrot.slane %v5008_v12, 2  ;;  %v876_v43 = vadd.f32 %v801_v17, %v617_v60  ;;  %v815_v14 = vsel %vm782_vm4, %v6430_v40, %v6429_v6  ;;  %v570_v51 = vsel %vm523_vm2, %v6432_v33, %v6431_v28 }
  0xf9   : > { %v5042_v53 = vpop.xlane.xlu1 %381  ;;  %v5049_v0 = vpop.xlane.xlu0 %379  ;;  %2665 = vperm.xlu0 %3675, %v1684_v47   ;;  %v1031_v60 = vsel %vm1012_vm5, %v1028_v50, %v1030_v18  ;;  %v883_v17 = vadd.f32 %v815_v14, %v624_v1  ;;  %v1045_v6 = vsel %vm1012_vm5, %v1042_v5, %v6437_v27  ;;  %v5078_v34 = vmul.f32 %v1678_v32, %v1678_v32 }
  0xfa   : > { %v1106_v52 = vadd.f32 %v1031_v60, %v876_v43  ;;  %v6434_v40 = vrot.slane %v5042_v53, 1  ;;  %v571_v28 = vrot.slane %v5049_v0, 1  ;;  %v546_v50 = vsel %vm523_vm2, %v543_v36, %v545_v45 }
  0xfb   : > { %v1113_v15 = vadd.f32 %v1045_v6, %v883_v17  ;;  %v805_v18 = vsel %vm782_vm4, %v802_v38, %v804_v29  ;;  %v5093_v43 = vadd.f32 %v570_v51, %v5008_v12  ;;  %v619_v6 = vadd.f32 %v546_v50, %v4831_v25 }
  0xfc   : > { %v1679_v32 = vmul.f32 0.00390625, %v1106_v52  ;;  %v560_v56 = vsel %vm523_vm2, %v557_v58, %v559_v39  ;;  %v5101_v45 = vmul.f32 %v1684_v47, %v1684_v47  ;;  %v819_v38 = vsel %vm782_vm4, %v816_v10, %v6435_v46 }
  0xfd   : > { %v5076_v33 = vpop.xlane.xlu1 %385  ;;  %v5090_v1 = vpop.xlane.xlu0 %383  ;;  %v1686_v36 = vmul.f32 0.00390625, %v1113_v15  ;;  %v626_v14 = vadd.f32 %v560_v56, %v4897_v11  ;;  %v6442_v25 = vrot.slane %v5042_v53, 2  ;;  %v6444_v29 = vrot.slane %v5042_v53, 3 }
  0xfe   : > { %2640 = vperm.xlu1 %3676, %v1679_v32   ;;  %v574_v58 = vsel %vm523_vm2, %v571_v28, %v6434_v40  ;;  %v878_v39 = vadd.f32 %v805_v18, %v619_v6  ;;  %v6443_v51 = vrot.slane %v5049_v0, 2  ;;  %v1035_v15 = vsel %vm1012_vm5, %v1032_v7, %v1034_v59 }
  0xff   : > { %2675 = vperm.xlu0 %3675, %v1686_v36   ;;  %v885_v60 = vadd.f32 %v819_v38, %v626_v14  ;;  %v577_v17 = vrot.slane %v5076_v33, 1  ;;  %v6446_v50 = vrot.slane %v5049_v0, 3  ;;  %v1049_v18 = vsel %vm1012_vm5, %v1046_v3, %v6436_v19 }
 0x100   : > { %v1108_v56 = vadd.f32 %v1035_v15, %v878_v39  ;;  %v6439_v6 = vrot.slane %v5090_v1, 1  ;;  %v5135_v40 = vadd.f32 %v574_v58, %v5049_v0  ;;  %v6541_v59 = vrot.slane %v4847_v26, 1 }
 0x101   : > { %v5116_v47 = vpop.xlane.xlu1 %389  ;;  %v5125_v52 = vpop.xlane.xlu0 %387  ;;  %v1115_v7 = vadd.f32 %v1049_v18, %v885_v60  ;;  %v6542_v14 = vrot.slane %v4852_v8, 1  ;;  %v6543_v39 = vrot.slane %v4873_v48, 2  ;;  %v5147_v46 = vmul.f32 %v1679_v32, %v1679_v32 }
 0x102   : > { %v1681_v19 = vmul.f32 0.00390625, %v1108_v56  ;;  %v6544_v58 = vrot.slane %v4932_v24, 1  ;;  %v5168_v56 = vmul.f32 %v1686_v36, %v1686_v36 }
 0x103   : > { %v550_v38 = vsel %vm523_vm2, %v6542_v14, %v6541_v59  ;;  %v809_v15 = vsel %vm782_vm4, %v6543_v39, %v808_v63  ;;  %v1688_v18 = vmul.f32 0.00390625, %v1115_v7  ;;  %v578_v59 = vsel %vm523_vm2, %v6439_v6, %v577_v17 }
 0x104   : > { %v621_v27 = vadd.f32 %v550_v38, %v4852_v8  ;;  %v564_v26 = vsel %vm523_vm2, %v6544_v58, %v563_v41  ;;  %v823_v8 = vsel %vm782_vm4, %v6440_v55, %v6438_v16  ;;  %2650 = vperm.xlu1 %3676, %v1681_v19   ;;  %v6445_v41 = vrot.slane %v5076_v33, 2 }
 0x105   : > { %v5155_v60 = vpop.xlane.xlu1 %395  ;;  %v628_v63 = vadd.f32 %v564_v26, %v4932_v24  ;;  %v5166_v32 = vpop.xlane.xlu0 %391  ;;  %2685 = vperm.xlu0 %3675, %v1688_v18   ;;  %v6545_v58 = vrot.slane %v4908_v62, 3  ;;  %v6546_v26 = vrot.slane %v4873_v48, 3  ;;  %v5180_v36 = vadd.f32 %v578_v59, %v5090_v1 }
 0x106   : > { %v880_v14 = vadd.f32 %v809_v15, %v621_v27  ;;  %v6547_v27 = vrot.slane %v5008_v12, 3  ;;  %v6548_v7 = vrot.slane %v4873_v48, 1  ;;  %v6549_v39 = vrot.slane %v4885_v54, 1 }
 0x107   : > { %v1039_v16 = vsel %vm1012_vm5, %v6546_v26, %v6545_v58  ;;  %v887_v6 = vadd.f32 %v823_v8, %v628_v63  ;;  %v579_v63 = vrot.slane %v5125_v52, 1  ;;  %v6551_v8 = vrot.slane %v4897_v11, 2 }
 0x108   : > { %v1110_v55 = vadd.f32 %v1039_v16, %v880_v14  ;;  %v1053_v15 = vsel %vm1012_vm5, %v6547_v27, %v6441_v22  ;;  %v554_v62 = vsel %vm523_vm2, %v6549_v39, %v6548_v7  ;;  %v6550_v16 = vrot.slane %v4940_v49, 2 }
 0x109   : > { %v5192_v38 = vpop.xlane.xlu1 %431  ;;  %v1117_v58 = vadd.f32 %v1053_v15, %v887_v6  ;;  %v623_v59 = vadd.f32 %v554_v62, %v4885_v54  ;;  %v5201_v26 = vpop.xlane.xlu0 %429  ;;  %v5203_v48 = vmul.f32 %v1681_v19, %v1681_v19  ;;  %v6552_v7 = vrot.slane %v5008_v12, 1 }
 0x10a   : > { %v813_v14 = vsel %vm782_vm4, %v6551_v8, %v6550_v16  ;;  %v1683_v27 = vmul.f32 0.00390625, %v1110_v55  ;;  %v6553_v39 = vrot.slane %v4967_v23, 1  ;;  %v827_v54 = vsel %vm782_vm4, %v6443_v51, %v6442_v25 }
 0x10b   : > { %v1690_v15 = vmul.f32 0.00390625, %v1117_v58  ;;  %v834_v62 = vrot.slane %v5116_v47, 2  ;;  %v882_v16 = vadd.f32 %v813_v14, %v623_v59  ;;  %v5217_v8 = vmul.f32 %v1688_v18, %v1688_v18 }
 0x10c   : > { %v568_v6 = vsel %vm523_vm2, %v6553_v39, %v6552_v7  ;;  %2660 = vperm.xlu1 %3676, %v1683_v27   ;;  %v6447_v55 = vrot.slane %v5116_v47, 3  ;;  %v6449_v22 = vrot.slane %v5125_v52, 2  ;;  %v6554_v7 = vrot.slane %v4897_v11, 3 }
 0x10d   : > { %v630_v19 = vadd.f32 %v568_v6, %v4967_v23  ;;  %v5226_v25 = vpop.xlane.xlu1 %435  ;;  %2695 = vperm.xlu0 %3675, %v1690_v15   ;;  %v580_v58 = vsel %vm523_vm2, %v577_v17, %v579_v63  ;;  %v5230_v6 = vpop.xlane.xlu0 %433  ;;  %v5232_v51 = vmul.f32 %v1683_v27, %v1683_v27  ;;  %v1057_v11 = vsel %vm1012_vm5, %v6446_v50, %v6444_v29 }
 0x10e   : > { %v1043_v39 = vsel %vm1012_vm5, %v6554_v7, %v1042_v5  ;;  %v838_v49 = vrot.slane %v5155_v60, 2  ;;  %v6555_v5 = vrot.slane %v4932_v24, 2  ;;  %v6556_v27 = vrot.slane %v5005_v21, 1 }
 0x10f   : > { %v1112_v18 = vadd.f32 %v1043_v39, %v882_v16  ;;  %v889_v14 = vadd.f32 %v827_v54, %v630_v19  ;;  %v1068_v7 = vrot.slane %v5155_v60, 3  ;;  %v6557_v39 = vrot.slane %v4932_v24, 3 }
 0x110   : > { %v817_v17 = vsel %vm782_vm4, %v6555_v5, %v816_v10  ;;  %v572_v19 = vsel %vm523_vm2, %v6556_v27, %v571_v28  ;;  %v836_v60 = vrot.slane %v5166_v32, 2  ;;  %v667_v30 = vrot.slane %v5192_v38, 1 }
 0x111   : > { %v1685_v63 = vmul.f32 0.00390625, %v1112_v18  ;;  %v1119_v54 = vadd.f32 %v1057_v11, %v889_v14  ;;  %v884_v16 = vadd.f32 %v817_v17, %v4963_v13  ;;  %v1047_v29 = vsel %vm1012_vm5, %v6557_v39, %v1046_v3  ;;  %v5263_v14 = vpop.xlane.xlu1 %439  ;;  %v5286_v50 = vpop.xlane.xlu0 %437 }
 0x112   : > { %v632_v10 = vadd.f32 %v572_v19, %v5005_v21  ;;  %v6558_v13 = vrot.slane %v5090_v1, 2  ;;  %v666_v3 = vrot.slane %v5201_v26, 1  ;;  %v6559_v5 = vrot.slane %v5008_v12, 2 }
 0x113   : > { %2670 = vperm.xlu1 %3676, %v1685_v63   ;;  %v1692_v28 = vmul.f32 0.00390625, %v1119_v54  ;;  %v1114_v11 = vadd.f32 %v1047_v29, %v884_v16  ;;  %v6560_v17 = vrot.slane %v4967_v23, 2  ;;  %v6561_v19 = vrot.slane %v5090_v1, 1 }
 0x114   : > { %v831_v18 = vsel %vm782_vm4, %v6558_v13, %v6445_v41  ;;  %v6562_v39 = vrot.slane %v5042_v53, 1  ;;  %v5278_v13 = vmul.f32 %v1690_v15, %v1690_v15  ;;  %v6564_v16 = vrot.slane %v5076_v33, 3 }
 0x115   : > { %v891_v24 = vadd.f32 %v831_v18, %v632_v10  ;;  %v821_v27 = vsel %vm782_vm4, %v6560_v17, %v6559_v5  ;;  %2705 = vperm.xlu0 %3675, %v1692_v28   ;;  %v1687_v29 = vmul.f32 0.00390625, %v1114_v11  ;;  %v6565_v10 = vrot.slane %v5090_v1, 3 }
 0x116   : > { %v576_v54 = vsel %vm523_vm2, %v6562_v39, %v6561_v19  ;;  %6563 = vst [vmem:[#allocation21_spill] sm:$0xff] %v5278_v13  ;;  %v886_v41 = vadd.f32 %v821_v27, %v4995_v57  ;;  %v6566_v17 = vrot.slane %v5008_v12, 3  ;;  %v6567_v59 = vrot.slane %v4967_v23, 3  ;;  %v5297_v39 = vpop.xlane.xlu1 %443 }
 0x117   : > { %v1061_v18 = vsel %vm1012_vm5, %v6565_v10, %v6564_v16  ;;  %v634_v19 = vadd.f32 %v576_v54, %v5042_v53  ;;  %v835_v11 = vsel %vm782_vm4, %v6449_v22, %v834_v62  ;;  %v5300_v16 = vsel %vm782_vm4, %v834_v62, %v836_v60  ;;  %2680 = vperm.xlu1 %3676, %v1687_v29  }
 0x118   : > { %v1121_v5 = vadd.f32 %v1061_v18, %v891_v24  ;;  %v1051_v15 = vsel %vm1012_vm5, %v6567_v59, %v6566_v17  ;;  %v839_v57 = vsel %vm782_vm4, %v836_v60, %v838_v49  ;;  %v6448_v24 = vrot.slane %v5166_v32, 3 }
 0x119   : > { %v1116_v12 = vadd.f32 %v1051_v15, %v886_v41  ;;  %v5304_v23 = vmul.f32 %v1685_v63, %v1685_v63  ;;  %v668_v27 = vsel %vm523_vm2, %v666_v3, %v667_v30  ;;  %v893_v54 = vadd.f32 %v835_v11, %v634_v19 }
 0x11a   : > { %v1694_v59 = vmul.f32 0.00390625, %v1121_v5  ;;  %v6568_v18 = vrot.slane %v5125_v52, 3  ;;  %v669_v17 = vrot.slane %v5230_v6, 1  ;;  %v6569_v49 = vrot.slane %v5049_v0, 2  ;;  %v5322_v19 = vpop.xlane.xlu1 %447 }
 0x11b   : > { %v1689_v10 = vmul.f32 0.00390625, %v1116_v12  ;;  %v6570_v60 = vrot.slane %v5005_v21, 2  ;;  %v5318_v63 = vmul.f32 %v1692_v28, %v1692_v28  ;;  %v671_v5 = vrot.slane %v5226_v25, 1 }
 0x11c   : > { %v1065_v62 = vsel %vm1012_vm5, %v6568_v18, %v6447_v55  ;;  %2715 = vperm.xlu0 %3675, %v1694_v59   ;;  %v5324_v11 = vmul.f32 %v1687_v29, %v1687_v29  ;;  %v751_v12 = vadd.f32 %v668_v27, %v5201_v26  ;;  %v6572_v18 = vrot.slane %v5049_v0, 3 }
 0x11d   : > { %v825_v41 = vsel %vm782_vm4, %v6570_v60, %v6569_v49  ;;  %6571 = vst [vmem:[#allocation24_spill] sm:$0xff] %v5318_v63  ;;  %v1123_v3 = vadd.f32 %v1065_v62, %v893_v54  ;;  %2690 = vperm.xlu1 %3676, %v1689_v10   ;;  %v6573_v55 = vrot.slane %v5005_v21, 3  ;;  %v636_v49 = vadd.f32 %v580_v58, %v5076_v33  ;;  %v5333_v54 = vpop.xlane.xlu0 %441 }
 0x11e   : > { %v888_v15 = vadd.f32 %v825_v41, %v5045_v35  ;;  %v899_v35 = vrot.slane %v5226_v25, 2  ;;  %v1126_v60 = vrot.slane %v5226_v25, 3  ;;  %v5337_v41 = vmul.f32 %v1694_v59, %v1694_v59 }
 0x11f   : > { %v1055_v28 = vsel %vm1012_vm5, %v6573_v55, %v6572_v18  ;;  %v1696_v62 = vmul.f32 0.00390625, %v1123_v3  ;;  %v670_v26 = vsel %vm523_vm2, %v667_v30, %v669_v17  ;;  %v895_v27 = vadd.f32 %v839_v57, %v636_v49  ;;  %v5346_v18 = vpop.xlane.xlu1 %451 }
 0x120   : > { %v1118_v29 = vadd.f32 %v1055_v28, %v888_v15  ;;  %6574 = vst [vmem:[#allocation16_spill] sm:$0xff] %v5337_v41  ;;  %v902_v0 = vrot.slane %v5263_v14, 2  ;;  %v672_v21 = vsel %vm523_vm2, %v669_v17, %v671_v5  ;;  %v1069_v58 = vsel %vm1012_vm5, %v6448_v24, %v1068_v7 }
 0x121   : > { %2725 = vperm.xlu0 %3675, %v1696_v62   ;;  %v900_v3 = vrot.slane %v5286_v50, 2  ;;  %v1125_v15 = vadd.f32 %v1069_v58, %v895_v27  ;;  %v1129_v59 = vrot.slane %v5263_v14, 3  ;;  %v673_v30 = vrot.slane %v5286_v50, 1  ;;  %v5365_v41 = vpop.xlane.xlu0 %445 }
 0x122   : > { %v1691_v55 = vmul.f32 0.00390625, %v1118_v29  ;;  %v1127_v57 = vrot.slane %v5286_v50, 3  ;;  %v5351_v28 = vmul.f32 %v1689_v10, %v1689_v10  ;;  %v752_v17 = vadd.f32 %v670_v26, %v5192_v38 }
 0x123   : > { %v901_v49 = vsel %vm782_vm4, %v899_v35, %v900_v3  ;;  %v6575_v7 = vrot.slane %v5090_v1, 2  ;;  %v6576_v29 = vrot.slane %v5042_v53, 2  ;;  %v753_v27 = vadd.f32 %v672_v21, %v5230_v6 }
 0x124   : > { %2700 = vperm.xlu1 %3676, %v1691_v55   ;;  %v5361_v58 = vmul.f32 0.00390625, %v1125_v15  ;;  %v675_v22 = vrot.slane %v5263_v14, 1  ;;  %v903_v10 = vsel %vm782_vm4, %v900_v3, %v902_v0  ;;  %v5367_v38 = vmul.f32 %v1696_v62, %v1696_v62 }
 0x125   : > { %v829_v24 = vsel %vm782_vm4, %v6576_v29, %v6575_v7  ;;  %v984_v26 = vadd.f32 %v901_v49, %v751_v12  ;;  %v985_v35 = vadd.f32 %v903_v10, %v752_v17  ;;  %v6579_v63 = vrot.slane %v5090_v1, 3  ;;  %v5374_v29 = vpop.xlane.xlu1 %455 }
 0x126   : > { %6577 = vst [vmem:[#allocation27_spill] sm:$0xff] %v5361_v58  ;;  %6578 = vst [vmem:[#allocation29_spill] sm:$0xff] %v5367_v38  ;;  %v6580_v13 = vrot.slane %v5042_v53, 3  ;;  %2735 = vperm.xlu0 %3675, %v5361_v58   ;;  %v674_v6 = vsel %vm523_vm2, %v671_v5, %v673_v30  ;;  %v1128_v21 = vsel %vm1012_vm5, %v1126_v60, %v1127_v57  ;;  %v906_v53 = vrot.slane %v5297_v39, 2 }
 0x127   : > { %v1130_v3 = vsel %vm1012_vm5, %v1127_v57, %v1129_v59  ;;  %v890_v62 = vadd.f32 %v829_v24, %v5093_v43  ;;  %v5381_v12 = vmul.f32 %v1691_v55, %v1691_v55  ;;  %v1211_v15 = vadd.f32 %v1128_v21, %v984_v26 }
 0x128   : > { %v1059_v7 = vsel %vm1012_vm5, %v6580_v13, %v6579_v63  ;;  %v1212_v1 = vadd.f32 %v1130_v3, %v985_v35  ;;  %v1133_v13 = vrot.slane %v5297_v39, 3  ;;  %v904_v63 = vrot.slane %v5333_v54, 2  ;;  %v5400_v3 = vpop.xlane.xlu0 %449 }
 0x129   : > { %v1120_v17 = vadd.f32 %v1059_v7, %v890_v62  ;;  %v1131_v49 = vrot.slane %v5333_v54, 3  ;;  %v676_v5 = vsel %vm523_vm2, %v673_v30, %v675_v22  ;;  %v754_v60 = vadd.f32 %v674_v6, %v5226_v25  ;;  %v5389_v43 = vpop.xlane.xlu1 %459 }
 0x12a   : > { %v1699_v57 = vmul.f32 0.00390625, %v1211_v15  ;;  %v1700_v10 = vmul.f32 0.00390625, %v1212_v1  ;;  %v677_v55 = vrot.slane %v5333_v54, 1  ;;  %v905_v26 = vsel %vm782_vm4, %v902_v0, %v904_v63 }
 0x12b   : > { %v5391_v24 = vmul.f32 0.00390625, %v1120_v17  ;;  %v6581_v35 = vrot.slane %v5125_v52, 2  ;;  %v6582_v7 = vrot.slane %v5076_v33, 2  ;;  %v907_v6 = vsel %vm782_vm4, %v904_v63, %v906_v53 }
 0x12c   : > { %v1755_v25 = vsub.f32 %v1699_v57, %v4840_v37  ;;  %v1756_v30 = vsub.f32 %v1700_v10, %v4838_v9  ;;  %v986_v62 = vadd.f32 %v905_v26, %v753_v27  ;;  %v679_v15 = vrot.slane %v5297_v39, 1 }
 0x12d   : > { %v833_v21 = vsel %vm782_vm4, %v6582_v7, %v6581_v35  ;;  %2710 = vperm.xlu1 %3676, %v5391_v24   ;;  %v987_v0 = vadd.f32 %v907_v6, %v754_v60  ;;  %v1132_v1 = vsel %vm1012_vm5, %v1129_v59, %v1131_v49  ;;  %v1134_v17 = vsel %vm1012_vm5, %v1131_v49, %v1133_v13  ;;  %v5410_v37 = vpop.xlane.xlu1 %463  ;;  %v5422_v6 = vpop.xlane.xlu0 %453 }
 0x12e   : > { %v1783_v58 = vmax.f32 %v1755_v25, 0.0  ;;  %v1784_v35 = vmax.f32 %v1756_v30, 0.0  ;;  %v1213_v7 = vadd.f32 %v1132_v1, %v986_v62  ;;  %v892_v38 = vadd.f32 %v833_v21, %v5135_v40 }
 0x12f   : > { %v678_v9 = vsel %vm523_vm2, %v675_v22, %v677_v55  ;;  %v1214_v63 = vadd.f32 %v1134_v17, %v987_v0  ;;  %v6583_v27 = vrot.slane %v5125_v52, 3  ;;  %v6584_v57 = vrot.slane %v5076_v33, 3 }
 0x130   : > { %v683_v59 = vrot.slane %v5322_v19, 1  ;;  %v1811_v10 = vadd.f32 1e-05, %v1783_v58  ;;  %v1812_v49 = vadd.f32 1e-05, %v1784_v35  ;;  %v1701_v26 = vmul.f32 0.00390625, %v1213_v7 }
 0x131   : > { %v1063_v60 = vsel %vm1012_vm5, %v6584_v57, %v6583_v27  ;;  %v1702_v30 = vmul.f32 0.00390625, %v1214_v63  ;;  %v910_v40 = vrot.slane %v5322_v19, 2  ;;  %v681_v21 = vrot.slane %v5365_v41, 1  ;;  %v5435_v7 = vpop.xlane.xlu1 %467 }
 0x132   : > { %v1122_v25 = vadd.f32 %v1063_v60, %v892_v38  ;;  %v908_v22 = vrot.slane %v5365_v41, 2  ;;  %3773 = vrsqrt.f32 %v1811_v10  ;;  %v1757_v33 = vsub.f32 %v1701_v26, %v4882_v4 }
 0x133   : > { %v1135_v62 = vrot.slane %v5365_v41, 3  ;;  %v755_v58 = vadd.f32 %v676_v5, %v5286_v50  ;;  %3775 = vrsqrt.f32 %v1812_v49  ;;  %v1758_v38 = vsub.f32 %v1702_v30, %v4895_v42 }
 0x134   : > { %v5425_v52 = vmul.f32 0.00390625, %v1122_v25  ;;  %v1137_v0 = vrot.slane %v5322_v19, 3  ;;  %v680_v1 = vsel %vm523_vm2, %v677_v55, %v679_v15  ;;  %v756_v17 = vadd.f32 %v678_v9, %v5263_v14 }
 0x135   : > { %v1785_v35 = vmax.f32 %v1757_v33, 0.0  ;;  %v682_v4 = vsel %vm523_vm2, %v679_v15, %v681_v21  ;;  %v1786_v63 = vmax.f32 %v1758_v38, 0.0  ;;  %v684_v27 = vsel %vm523_vm2, %v681_v21, %v683_v59 }
 0x136   : > { %2720 = vperm.xlu1 %3676, %v5425_v52   ;;  %v909_v50 = vsel %vm782_vm4, %v906_v53, %v908_v22  ;;  %v911_v42 = vsel %vm782_vm4, %v908_v22, %v910_v40  ;;  %v1136_v55 = vsel %vm1012_vm5, %v1133_v13, %v1135_v62  ;;  %v1138_v9 = vsel %vm1012_vm5, %v1135_v62, %v1137_v0  ;;  %v5449_v53 = vpop.xlane.xlu0 %457  ;;  %v5456_v62 = vpop.xlane.xlu1 %471 }
 0x137   : > { %v1813_v5 = vadd.f32 1e-05, %v1785_v35  ;;  %v988_v57 = vadd.f32 %v909_v50, %v755_v58  ;;  %v989_v60 = vadd.f32 %v911_v42, %v756_v17  ;;  %v1814_v14 = vadd.f32 1e-05, %v1786_v63 }
 0x138   : > { %v894_v15 = vadd.f32 %v5300_v16, %v5180_v36  ;;  %v6585_v10 = vrot.slane %v5166_v32, 3  ;;  %v6586_v49 = vrot.slane %v5116_v47, 3  ;;  %v687_v21 = vrot.slane %v5346_v18, 1 }
 0x139   : > { %3777 = vrsqrt.f32 %v1813_v5  ;;  %v1215_v25 = vadd.f32 %v1136_v55, %v988_v57  ;;  %v1216_v30 = vadd.f32 %v1138_v9, %v989_v60  ;;  %v914_v22 = vrot.slane %v5346_v18, 2 }
 0x13a   : > { %v1067_v26 = vsel %vm1012_vm5, %v6586_v49, %v6585_v10  ;;  %3779 = vrsqrt.f32 %v1814_v14  ;;  %v685_v33 = vrot.slane %v5400_v3, 1  ;;  %v757_v36 = vadd.f32 %v680_v1, %v5333_v54  ;;  %v5477_v60 = vpop.xlane.xlu0 %461 }
 0x13b   : > { %v1124_v13 = vadd.f32 %v1067_v26, %v894_v15  ;;  %v1703_v32 = vmul.f32 0.00390625, %v1215_v25  ;;  %v1704_v16 = vmul.f32 0.00390625, %v1216_v30  ;;  %v912_v47 = vrot.slane %v5400_v3, 2  ;;  %v5483_v26 = vpop.xlane.xlu1 %475 }
 0x13c   : > { %v5460_v58 = vmul.f32 %v5391_v24, %v5391_v24  ;;  %v1141_v17 = vrot.slane %v5346_v18, 3  ;;  %v1139_v35 = vrot.slane %v5400_v3, 3  ;;  %v758_v63 = vadd.f32 %v682_v4, %v5297_v39 }
 0x13d   : > { %v5462_v38 = vmul.f32 0.00390625, %v1124_v13  ;;  %v759_v54 = vadd.f32 %v684_v27, %v5365_v41  ;;  %v1759_v1 = vsub.f32 %v1703_v32, %v4927_v61  ;;  %v1760_v50 = vsub.f32 %v1704_v16, %v4955_v2 }
 0x13e   : > { %v686_v42 = vsel %vm523_vm2, %v683_v59, %v685_v33  ;;  %v688_v24 = vsel %vm523_vm2, %v685_v33, %v687_v21  ;;  %v913_v5 = vsel %vm782_vm4, %v910_v40, %v912_v47  ;;  %v915_v57 = vsel %vm782_vm4, %v912_v47, %v914_v22  ;;  %v5489_v33 = vpop.f32.mrf.mxu0  ;;  %v5492_v47 = vpop.f32.mrf.mxu1 }
 0x13f   : > { %2730 = vperm.xlu1 %3676, %v5462_v38   ;;  %v1787_v39 = vmax.f32 %v1759_v1, 0.0  ;;  %v1788_v41 = vmax.f32 %v1760_v50, 0.0  ;;  %v990_v4 = vadd.f32 %v913_v5, %v757_v36  ;;  %v991_v61 = vadd.f32 %v915_v57, %v758_v63  ;;  %v3774_v27 = vpop.eup %3773  ;;  %v5497_v50 = vpop.xlane.xlu0 %465 }
 0x140   : > { %v1140_v2 = vsel %vm1012_vm5, %v1137_v0, %v1139_v35  ;;  %v1142_v55 = vsel %vm1012_vm5, %v1139_v35, %v1141_v17  ;;  %v691_v59 = vrot.slane %v5374_v29, 1  ;;  %v918_v14 = vrot.slane %v5374_v29, 2  ;;  %v3776_v9 = vpop.eup %3775  ;;  %v5499_v5 = vpop.f32.mrf.mxu0 }
 0x141   : > { %v1815_v15 = vadd.f32 1e-05, %v1787_v39  ;;  %v1816_v40 = vadd.f32 1e-05, %v1788_v41  ;;  %v1217_v10 = vadd.f32 %v1140_v2, %v990_v4  ;;  %v1218_v49 = vadd.f32 %v1142_v55, %v991_v61  ;;  %2868 = vperm.xlu0 %3675, %v3776_v9   ;;  %v5503_v41 = vpop.f32.mrf.mxu1  ;;  %v5515_v9 = vpop.xlane.xlu1 %479 }
 0x142   : > { %v1145_v25 = vrot.slane %v5374_v29, 3  ;;  %v689_v30 = vrot.slane %v5422_v6, 1  ;;  %v916_v13 = vrot.slane %v5422_v6, 2  ;;  %v1143_v0 = vrot.slane %v5422_v6, 3 }
 0x143   : > { %2863 = vperm.xlu1 %3676, %v3774_v27   ;;  %3781 = vrsqrt.f32 %v1815_v15  ;;  %v760_v36 = vadd.f32 %v686_v42, %v5322_v19  ;;  %v1705_v32 = vmul.f32 0.00390625, %v1217_v10  ;;  %v1706_v16 = vmul.f32 0.00390625, %v1218_v49  ;;  %v5517_v15 = vpop.f32.mrf.mxu1 }
 0x144   : > { %3783 = vrsqrt.f32 %v1816_v40  ;;  %v761_v35 = vadd.f32 %v688_v24, %v5400_v3  ;;  %v917_v63 = vsel %vm782_vm4, %v914_v22, %v916_v13  ;;  %v919_v1 = vsel %vm782_vm4, %v916_v13, %v918_v14 }
 0x145   : > { %v1761_v57 = vsub.f32 %v1705_v32, %v4997_v20  ;;  %v1762_v39 = vsub.f32 %v1706_v16, %v5078_v34  ;;  %v992_v19 = vadd.f32 %v917_v63, %v759_v54  ;;  %v993_v42 = vadd.f32 %v919_v1, %v760_v36  ;;  %v5513_v20 = vpop.f32.mrf.mxu0  ;;  %v5525_v16 = vpop.f32.mrf.mxu1 }
 0x146   : > { %v3778_v4 = vpop.eup %3777  ;;  %v690_v3 = vsel %vm523_vm2, %v687_v21, %v689_v30  ;;  %v1144_v22 = vsel %vm1012_vm5, %v1141_v17, %v1143_v0  ;;  %v1146_v24 = vsel %vm1012_vm5, %v1143_v0, %v1145_v25  ;;  %v922_v61 = vrot.slane %v5389_v43, 2 }
 0x147   : > { %v3780_v34 = vpop.eup %3779  ;;  %v1789_v54 = vmax.f32 %v1761_v57, 0.0  ;;  %v1790_v27 = vmax.f32 %v1762_v39, 0.0  ;;  %v1219_v2 = vadd.f32 %v1144_v22, %v992_v19  ;;  %v1220_v55 = vadd.f32 %v1146_v24, %v993_v42  ;;  %2873 = vperm.xlu1 %3676, %v3778_v4   ;;  %v5523_v49 = vpop.f32.mrf.mxu0 }
 0x148   : > { %v6451_v21 = vrot.slane %v5389_v43, 3  ;;  %v693_v17 = vrot.slane %v5449_v53, 1  ;;  %v920_v40 = vrot.slane %v5449_v53, 2  ;;  %v1147_v10 = vrot.slane %v5449_v53, 3  ;;  %2878 = vperm.xlu0 %3675, %v3780_v34   ;;  %v5533_v19 = vpop.xlane.xlu0 %469 }
 0x149   : > { %v1817_v13 = vadd.f32 1e-05, %v1789_v54  ;;  %v1818_v0 = vadd.f32 1e-05, %v1790_v27  ;;  %v1707_v36 = vmul.f32 0.00390625, %v1219_v2  ;;  %v1708_v32 = vmul.f32 0.00390625, %v1220_v55  ;;  %v5535_v42 = vpop.f32.mrf.mxu0 }
 0x14a   : > { %v762_v63 = vadd.f32 %v690_v3, %v5346_v18  ;;  %v695_v1 = vrot.slane %v5389_v43, 1  ;;  %v921_v57 = vsel %vm782_vm4, %v918_v14, %v920_v40  ;;  %v923_v39 = vsel %vm782_vm4, %v920_v40, %v922_v61  ;;  %v5542_v3 = vpop.f32.mrf.mxu1 }
 0x14b   : > { %3785 = vrsqrt.f32 %v1817_v13  ;;  %v692_v4 = vsel %vm523_vm2, %v689_v30, %v691_v59  ;;  %v1763_v22 = vsub.f32 %v1707_v36, %v5147_v46  ;;  %v1764_v18 = vsub.f32 %v1708_v32, %v4991_v31  ;;  %v5547_v54 = vpop.f32.mrf.mxu0  ;;  %v5555_v31 = vpop.xlane.xlu1 %483 }
 0x14c   : > { %3787 = vrsqrt.f32 %v1818_v0  ;;  %v694_v14 = vsel %vm523_vm2, %v691_v59, %v693_v17  ;;  %v994_v24 = vadd.f32 %v921_v57, %v761_v35  ;;  %v995_v34 = vadd.f32 %v923_v39, %v762_v63  ;;  %v5557_v55 = vpop.f32.mrf.mxu1 }
 0x14d   : > { %v1791_v27 = vmax.f32 %v1763_v22, 0.0  ;;  %v1792_v2 = vmax.f32 %v1764_v18, 0.0  ;;  %v1148_v30 = vsel %vm1012_vm5, %v1145_v25, %v1147_v10  ;;  %v1150_v46 = vsel %vm1012_vm5, %v1147_v10, %v6451_v21  ;;  %v5561_v0 = vpop.f32.mrf.mxu0 }
 0x14e   : > { %v696_v59 = vsel %vm523_vm2, %v693_v17, %v695_v1  ;;  %v1221_v35 = vadd.f32 %v1148_v30, %v994_v24  ;;  %v1222_v40 = vadd.f32 %v1150_v46, %v995_v34  ;;  %v6452_v13 = vrot.slane %v5410_v37, 1  ;;  %v5565_v57 = vpop.f32.mrf.mxu1  ;;  %v5569_v24 = vpop.xlane.xlu0 %473 }
 0x14f   : > { %v1819_v36 = vadd.f32 1e-05, %v1791_v27  ;;  %v1820_v32 = vadd.f32 1e-05, %v1792_v2  ;;  %v926_v25 = vrot.slane %v5410_v37, 2  ;;  %v697_v63 = vrot.slane %v5477_v60, 1  ;;  %v5571_v34 = vpop.f32.mrf.mxu0 }
 0x150   : > { %v3782_v10 = vpop.eup %3781  ;;  %v763_v39 = vadd.f32 %v692_v4, %v5422_v6  ;;  %v1709_v22 = vmul.f32 0.00390625, %v1221_v35  ;;  %v1710_v18 = vmul.f32 0.00390625, %v1222_v40  ;;  %v924_v17 = vrot.slane %v5477_v60, 2  ;;  %v5576_v21 = vpop.f32.mrf.mxu1 }
 0x151   : > { %v3784_v30 = vpop.eup %3783  ;;  %3789 = vrsqrt.f32 %v1819_v36  ;;  %v764_v27 = vadd.f32 %v694_v14, %v5374_v29  ;;  %v1153_v2 = vrot.slane %v5410_v37, 3  ;;  %v1151_v46 = vrot.slane %v5477_v60, 3  ;;  %2883 = vperm.xlu1 %3676, %v3782_v10   ;;  %6587 = vst [vmem:[#allocation11_spill] sm:$0xff] %v5576_v21 }
 0x152   : > { %3791 = vrsqrt.f32 %v1820_v32  ;;  %v765_v6 = vadd.f32 %v696_v59, %v5449_v53  ;;  %v1765_v4 = vsub.f32 %v1709_v22, %v5203_v48  ;;  %v1766_v35 = vsub.f32 %v1710_v18, %v5033_v44  ;;  %2888 = vperm.xlu0 %3675, %v3784_v30   ;;  %v5589_v32 = vpop.xlane.xlu1 %487  ;;  %v5591_v53 = vpop.f32.mrf.mxu0 }
 0x153   : > { %v698_v40 = vsel %vm523_vm2, %v695_v1, %v697_v63  ;;  %v700_v29 = vsel %vm523_vm2, %v697_v63, %v6452_v13  ;;  %v925_v14 = vsel %vm782_vm4, %v922_v61, %v924_v17  ;;  %v927_v36 = vsel %vm782_vm4, %v924_v17, %v926_v25  ;;  %6588 = vst [vmem:[#allocation31_spill] sm:$0xff] %v5591_v53  ;;  %v5593_v22 = vpop.f32.mrf.mxu1 }
 0x154   : > { %v1793_v48 = vmax.f32 %v1765_v4, 0.0  ;;  %v1794_v59 = vmax.f32 %v1766_v35, 0.0  ;;  %v996_v44 = vadd.f32 %v925_v14, %v763_v39  ;;  %v997_v10 = vadd.f32 %v927_v36, %v764_v27  ;;  %v5601_v4 = vpop.xlane.xlu0 %477  ;;  %v5607_v36 = vpop.f32.mrf.mxu0 }
 0x155   : > { %v6589_v1 = vrot.slane %v5389_v43, 3  ;;  %v1154_v18 = vsel %vm1012_vm5, %v1151_v46, %v1153_v2  ;;  %v930_v17 = vrot.slane %v5435_v7, 2  ;;  %v701_v27 = vrot.slane %v5497_v50, 1  ;;  %6590 = vst [vmem:[#allocation12_spill] sm:$0xff] %v5607_v36 }
 0x156   : > { %v1821_v30 = vadd.f32 1e-05, %v1793_v48  ;;  %v1822_v13 = vadd.f32 1e-05, %v1794_v59  ;;  %v1224_v53 = vadd.f32 %v1154_v18, %v997_v10  ;;  %v928_v35 = vrot.slane %v5497_v50, 2  ;;  %v5615_v39 = vpop.xlane.xlu1 %492 }
 0x157   : > { %v1152_v63 = vsel %vm1012_vm5, %v6589_v1, %v1151_v46  ;;  %v1155_v14 = vrot.slane %v5497_v50, 3  ;;  %v766_v1 = vadd.f32 %v698_v40, %v5389_v43  ;;  %v6591_v40 = vrot.slane %v5410_v37, 1 }
 0x158   : > { %v1223_v21 = vadd.f32 %v1152_v63, %v996_v44  ;;  %v3786_v46 = vpop.eup %3785  ;;  %3793 = vrsqrt.f32 %v1821_v30  ;;  %v1712_v59 = vmul.f32 0.00390625, %v1224_v53  ;;  %v5610_v44 = vpop.f32.mrf.mxu1  ;;  %v767_v63 = vadd.f32 %v700_v29, %v5477_v60 }
 0x159   : > { %v3788_v10 = vpop.eup %3787  ;;  %3795 = vrsqrt.f32 %v1822_v13  ;;  %v929_v18 = vsel %vm782_vm4, %v926_v25, %v928_v35  ;;  %v931_v61 = vsel %vm782_vm4, %v928_v35, %v930_v17  ;;  %2893 = vperm.xlu1 %3676, %v3786_v46   ;;  %v702_v13 = vsel %vm523_vm2, %v6591_v40, %v701_v27  ;;  %v5627_v35 = vpop.f32.mrf.mxu0 }
 0x15a   : > { %v1711_v48 = vmul.f32 0.00390625, %v1223_v21  ;;  %v1768_v30 = vsub.f32 %v1712_v59, %v5101_v45  ;;  %v998_v43 = vadd.f32 %v929_v18, %v765_v6  ;;  %v999_v21 = vadd.f32 %v931_v61, %v766_v1  ;;  %2898 = vperm.xlu0 %3675, %v3788_v10   ;;  %v5629_v61 = vpop.xlane.xlu0 %481  ;;  %v5631_v1 = vpop.f32.mrf.mxu1 }
 0x15b   : > { %v1156_v60 = vsel %vm1012_vm5, %v1153_v2, %v1155_v14  ;;  %v6592_v25 = vrot.slane %v5435_v7, 3  ;;  %v6453_v53 = vrot.slane %v5456_v62, 2  ;;  %6593 = vst [vmem:[#allocation30_spill] sm:$0xff] %v5631_v1  ;;  %v705_v2 = vrot.slane %v5533_v19, 1  ;;  %v5637_v10 = vpop.permute.xlu1 %2605  ;;  %v5645_v1 = vpop.f32.mrf.mxu0 }
 0x15c   : > { %v1767_v36 = vsub.f32 %v1711_v48, %v5232_v51  ;;  %v1796_v46 = vmax.f32 %v1768_v30, 0.0  ;;  %v1225_v45 = vadd.f32 %v1156_v60, %v998_v43  ;;  %v932_v59 = vrot.slane %v5533_v19, 2  ;;  %6594 = vst [vmem:[#allocation22_spill] sm:$0xff] %v5645_v1 }
 0x15d   : > { %v1158_v29 = vsel %vm1012_vm5, %v1155_v14, %v6592_v25  ;;  %v1159_v14 = vrot.slane %v5533_v19, 3  ;;  %v768_v60 = vadd.f32 %v702_v13, %v5410_v37  ;;  %v707_v25 = vrot.slane %v5456_v62, 1  ;;  %v5652_v13 = vpop.f32.mrf.mxu1 }
 0x15e   : > { %v1795_v51 = vmax.f32 %v1767_v36, 0.0  ;;  %v1226_v6 = vadd.f32 %v1158_v29, %v999_v21  ;;  %v3790_v18 = vpop.eup %3789  ;;  %v1824_v36 = vadd.f32 1e-05, %v1796_v46  ;;  %v1713_v30 = vmul.f32 0.00390625, %v1225_v45  ;;  %6596 = vst [vmem:[#allocation14_spill] sm:$0xff] %v5652_v13 }
 0x15f   : > { %v3792_v21 = vpop.eup %3791  ;;  %v933_v29 = vsel %vm782_vm4, %v930_v17, %v932_v59  ;;  %v935_v48 = vsel %vm782_vm4, %v932_v59, %v6453_v53  ;;  %2903 = vperm.xlu1 %3676, %v3790_v18   ;;  %v6598_v1 = vrot.slane %v5435_v7, 3 }
 0x160   : > { %v1823_v40 = vadd.f32 1e-05, %v1795_v51  ;;  %v1714_v43 = vmul.f32 0.00390625, %v1226_v6  ;;  %v6595_v51 = vrot.slane %v5435_v7, 1  ;;  %v1769_v45 = vsub.f32 %v1713_v30, %v5304_v23  ;;  %2908 = vperm.xlu0 %3675, %v3792_v21   ;;  %v5663_v30 = vpop.xlane.xlu0 %485 }
 0x161   : > { %v1000_v59 = vadd.f32 %v933_v29, %v767_v63  ;;  %v1001_v18 = vadd.f32 %v935_v48, %v768_v60  ;;  %v6599_v23 = vrot.slane %v5456_v62, 3  ;;  %v5667_v63 = vpop.f32.mrf.mxu0  ;;  %v5669_v48 = vpop.permute.xlu1 %2610 }
 0x162   : > { %3797 = vrsqrt.f32 %v1823_v40  ;;  %v704_v46 = vsel %vm523_vm2, %v701_v27, %v6595_v51  ;;  %v1770_v37 = vsub.f32 %v1714_v43, %v5168_v56  ;;  %v6597_v17 = vmov %v6595_v51  ;;  %6600 = vst [vmem:[#allocation15_spill] sm:$0xff] %v5667_v63 }
 0x163   : > { %3799 = vrsqrt.f32 %v1824_v36  ;;  %v706_v6 = vsel %vm523_vm2, %v6597_v17, %v705_v2  ;;  %v1797_v53 = vmax.f32 %v1769_v45, 0.0  ;;  %v1160_v27 = vsel %vm1012_vm5, %v6598_v1, %v1159_v14 }
 0x164   : > { %v1798_v40 = vmax.f32 %v1770_v37, 0.0  ;;  %v1162_v56 = vsel %vm1012_vm5, %v1159_v14, %v6599_v23  ;;  %v708_v36 = vsel %vm523_vm2, %v705_v2, %v707_v25  ;;  %v1227_v43 = vadd.f32 %v1160_v27, %v1000_v59  ;;  %v5673_v37 = vpop.f32.mrf.mxu1 }
 0x165   : > { %v1228_v21 = vadd.f32 %v1162_v56, %v1001_v18  ;;  %v711_v51 = vrot.slane %v5483_v26, 1  ;;  %v1825_v60 = vadd.f32 1e-05, %v1797_v53  ;;  %v938_v1 = vrot.slane %v5483_v26, 2  ;;  %6601 = vst [vmem:[#allocation18_spill] sm:$0xff] %v5673_v37  ;;  %v3794_v14 = vpop.eup %3793 }
 0x166   : > { %v1826_v29 = vadd.f32 1e-05, %v1798_v40  ;;  %v709_v45 = vrot.slane %v5569_v24, 1  ;;  %v769_v17 = vadd.f32 %v704_v46, %v5497_v50  ;;  %v1715_v2 = vmul.f32 0.00390625, %v1227_v43  ;;  %v3796_v27 = vpop.eup %3795  ;;  %2913 = vperm.xlu1 %3676, %v3794_v14   ;;  %v5683_v46 = vpop.f32.mrf.mxu0 }
 0x167   : > { %v1716_v59 = vmul.f32 0.00390625, %v1228_v21  ;;  %v936_v18 = vrot.slane %v5569_v24, 2  ;;  %3801 = vrsqrt.f32 %v1825_v60  ;;  %v770_v23 = vadd.f32 %v706_v6, %v5435_v7  ;;  %2918 = vperm.xlu0 %3675, %v3796_v27   ;;  %6602 = vst [vmem:[#allocation19_spill] sm:$0xff] %v5683_v46  ;;  %v5685_v43 = vpop.permute.xlu1 %2615 }
 0x168   : > { %v1165_v53 = vrot.slane %v5483_v26, 3  ;;  %v1163_v40 = vrot.slane %v5569_v24, 3  ;;  %3803 = vrsqrt.f32 %v1826_v29  ;;  %v771_v56 = vadd.f32 %v708_v36, %v5533_v19  ;;  %v5693_v19 = vpop.f32.mrf.mxu1 }
 0x169   : > { %v1771_v37 = vsub.f32 %v1715_v2, %v5324_v11  ;;  %v1772_v50 = vsub.f32 %v1716_v59, %v5217_v8  ;;  %v710_v21 = vsel %vm523_vm2, %v707_v25, %v709_v45  ;;  %v712_v7 = vsel %vm523_vm2, %v709_v45, %v711_v51  ;;  %6604 = vst [vmem:[#allocation25_spill] sm:$0xff] %v5693_v19  ;;  %v5695_v2 = vpop.xlane.xlu0 %489 }
 0x16a   : > { %v6603_v6 = vrot.slane %v5456_v62, 2  ;;  %v939_v29 = vsel %vm782_vm4, %v936_v18, %v938_v1  ;;  %v6605_v59 = vrot.slane %v5456_v62, 3  ;;  %v1166_v45 = vsel %vm1012_vm5, %v1163_v40, %v1165_v53 }
 0x16b   : > { %v1799_v11 = vmax.f32 %v1771_v37, 0.0  ;;  %v1800_v36 = vmax.f32 %v1772_v50, 0.0  ;;  %v1003_v14 = vadd.f32 %v939_v29, %v770_v23  ;;  %v942_v27 = vrot.slane %v5515_v9, 2  ;;  %v5703_v37 = vpop.f32.mrf.mxu0  ;;  %v5711_v29 = vpop.f32.mrf.mxu1 }
 0x16c   : > { %v937_v60 = vsel %vm782_vm4, %v6603_v6, %v936_v18  ;;  %v1164_v25 = vsel %vm1012_vm5, %v6605_v59, %v1163_v40  ;;  %v713_v6 = vrot.slane %v5601_v4, 1  ;;  %6606 = vst [vmem:[#allocation20_spill] sm:$0xff] %v5703_v37  ;;  %v1167_v40 = vrot.slane %v5601_v4, 3  ;;  %6608 = vst [vmem:[#allocation35_spill] sm:$0xff] %v5711_v29  ;;  %v6609_v29 = vld [vmem:[#allocation21_spill] sm:$0xff] }
 0x16d   : > { %v1002_v8 = vadd.f32 %v937_v60, %v769_v17  ;;  %v1827_v46 = vadd.f32 1e-05, %v1799_v11  ;;  %v1828_v18 = vadd.f32 1e-05, %v1800_v36  ;;  %v1230_v19 = vadd.f32 %v1166_v45, %v1003_v14  ;;  %v5705_v17 = vpop.permute.xlu1 %2620  ;;  %v5714_v14 = vpop.permute.xlu0 %2600 }
 0x16e   : > { %6607 = vst [vmem:[#allocation23_spill] sm:$0xff] %v5705_v17  ;;  %v940_v60 = vrot.slane %v5601_v4, 2  ;;  %v772_v11 = vadd.f32 %v710_v21, %v5456_v62  ;;  %v714_v45 = vsel %vm523_vm2, %v711_v51, %v713_v6  ;;  %v5721_v62 = vpop.f32.mrf.mxu0  ;;  %v1168_v21 = vsel %vm1012_vm5, %v1165_v53, %v1167_v40 }
 0x16f   : > { %v1229_v63 = vadd.f32 %v1164_v25, %v1002_v8  ;;  %v3798_v59 = vpop.eup %3797  ;;  %3805 = vrsqrt.f32 %v1827_v46  ;;  %v1718_v8 = vmul.f32 0.00390625, %v1230_v19  ;;  %v6610_v51 = vrot.slane %v5515_v9, 3 }
 0x170   : > { %v3800_v25 = vpop.eup %3799  ;;  %3807 = vrsqrt.f32 %v1828_v18  ;;  %v941_v23 = vsel %vm782_vm4, %v938_v1, %v940_v60  ;;  %v943_v50 = vsel %vm782_vm4, %v940_v60, %v942_v27  ;;  %2923 = vperm.xlu1 %3676, %v3798_v59   ;;  %v6455_v19 = vrot.slane %v5555_v31, 2  ;;  %v5729_v18 = vpop.f32.mrf.mxu1 }
 0x171   : > { %v1717_v36 = vmul.f32 0.00390625, %v1229_v63  ;;  %v1774_v13 = vsub.f32 %v1718_v8, %v6609_v29  ;;  %v1004_v46 = vadd.f32 %v941_v23, %v771_v56  ;;  %v1005_v17 = vadd.f32 %v943_v50, %v772_v11  ;;  %2928 = vperm.xlu0 %3675, %v3800_v25   ;;  %v5733_v29 = vpop.permute.xlu0 %2645 }
 0x172   : > { %v773_v63 = vadd.f32 %v712_v7, %v5569_v24  ;;  %v1170_v1 = vsel %vm1012_vm5, %v1167_v40, %v6610_v51  ;;  %6611 = vst [vmem:[#allocation26_spill] sm:$0xff] %v5733_v29  ;;  %v774_v24 = vadd.f32 %v714_v45, %v5483_v26  ;;  %v944_v7 = vrot.slane %v5629_v61, 2  ;;  %v5739_v51 = vpop.f32.mrf.mxu0 }
 0x173   : > { %v1773_v37 = vsub.f32 %v1717_v36, %v5351_v28  ;;  %v5731_v28 = vpop.permute.xlu1 %2625  ;;  %v1802_v56 = vmax.f32 %v1774_v13, 0.0  ;;  %v1231_v23 = vadd.f32 %v1168_v21, %v1004_v46  ;;  %v1232_v50 = vadd.f32 %v1170_v1, %v1005_v17  ;;  %v5747_v46 = vpop.f32.mrf.mxu1 }
 0x174   : > { %v1171_v40 = vrot.slane %v5629_v61, 3  ;;  %v3802_v59 = vpop.eup %3801  ;;  %v717_v17 = vrot.slane %v5629_v61, 1  ;;  %v945_v26 = vsel %vm782_vm4, %v942_v27, %v944_v7  ;;  %v947_v45 = vsel %vm782_vm4, %v944_v7, %v6455_v19 }
 0x175   : > { %v1801_v60 = vmax.f32 %v1773_v37, 0.0  ;;  %v1830_v36 = vadd.f32 1e-05, %v1802_v56  ;;  %v1719_v8 = vmul.f32 0.00390625, %v1231_v23  ;;  %v1720_v25 = vmul.f32 0.00390625, %v1232_v50  ;;  %v3804_v13 = vpop.eup %3803  ;;  %2933 = vperm.xlu1 %3676, %v3802_v59   ;;  %v6613_v56 = vld [vmem:[#allocation24_spill] sm:$0xff] }
 0x176   : > { %v719_v37 = vrot.slane %v5555_v31, 1  ;;  %v6612_v21 = vrot.slane %v5515_v9, 1  ;;  %2938 = vperm.xlu0 %3675, %v3804_v13   ;;  %v5756_v27 = vmul.f32 %v5425_v52, %v5425_v52  ;;  %v1006_v50 = vadd.f32 %v945_v26, %v773_v63  ;;  %v5768_v13 = vpop.permute.xlu0 %2655  ;;  %v5772_v26 = vpop.f32.mrf.mxu1 }
 0x177   : > { %v1829_v11 = vadd.f32 1e-05, %v1801_v60  ;;  %v1775_v60 = vsub.f32 %v1719_v8, %v5381_v12  ;;  %v1776_v23 = vsub.f32 %v1720_v25, %v6613_v56  ;;  %v1007_v7 = vadd.f32 %v947_v45, %v774_v24  ;;  %v5758_v59 = vpop.permute.xlu1 %2630  ;;  %v5766_v25 = vpop.f32.mrf.mxu0  ;;  %6616 = vst [vmem:[#allocation28_spill] sm:$0xff] %v5768_v13 }
 0x178   : > { %v716_v1 = vsel %vm523_vm2, %v713_v6, %v6612_v21  ;;  %v6614_v53 = vrot.slane %v5515_v9, 3  ;;  %v6615_v12 = vrot.slane %v5555_v31, 3  ;;  %v720_v63 = vsel %vm523_vm2, %v717_v17, %v719_v37 }
 0x179   : > { %3809 = vrsqrt.f32 %v1829_v11  ;;  %v1803_v19 = vmax.f32 %v1775_v60, 0.0  ;;  %v1804_v11 = vmax.f32 %v1776_v23, 0.0  ;;  %v775_v52 = vadd.f32 %v716_v1, %v5601_v4 }
 0x17a   : > { %3811 = vrsqrt.f32 %v1830_v36  ;;  %v1172_v6 = vsel %vm1012_vm5, %v6614_v53, %v1171_v40  ;;  %v1174_v8 = vsel %vm1012_vm5, %v1171_v40, %v6615_v12  ;;  %v6617_v53 = vrot.slane %v5515_v9, 1 }
 0x17b   : > { %v1233_v24 = vadd.f32 %v1172_v6, %v1006_v50  ;;  %v1234_v36 = vadd.f32 %v1174_v8, %v1007_v7  ;;  %v1831_v45 = vadd.f32 1e-05, %v1803_v19  ;;  %v1832_v21 = vadd.f32 1e-05, %v1804_v11  ;;  %v5783_v11 = vpop.f32.mrf.mxu0  ;;  %v6618_v6 = vld [vmem:[#allocation16_spill] sm:$0xff] }
 0x17c   : > { %v718_v60 = vsel %vm523_vm2, %v6617_v53, %v717_v17  ;;  %v950_v40 = vrot.slane %v5589_v32, 2  ;;  %v3806_v56 = vpop.eup %3805  ;;  %v721_v13 = vrot.slane %v5663_v30, 1  ;;  %v948_v4 = vrot.slane %v5663_v30, 2  ;;  %v5800_v53 = vpop.permute.xlu0 %2665 }
 0x17d   : > { %v1721_v23 = vmul.f32 0.00390625, %v1233_v24  ;;  %v1722_v12 = vmul.f32 0.00390625, %v1234_v36  ;;  %v3808_v1 = vpop.eup %3807  ;;  %3813 = vrsqrt.f32 %v1831_v45  ;;  %v777_v50 = vadd.f32 %v720_v63, %v5629_v61  ;;  %2943 = vperm.xlu1 %3676, %v3806_v56   ;;  %v5788_v36 = vpop.f32.mrf.mxu1  ;;  %6622 = vst [vmem:[#allocation33_spill] sm:$0xff] %v5800_v53 }
 0x17e   : > { %v1177_v19 = vrot.slane %v5589_v32, 3  ;;  %v1175_v7 = vrot.slane %v5663_v30, 3  ;;  %3815 = vrsqrt.f32 %v1832_v21  ;;  %v776_v24 = vadd.f32 %v718_v60, %v5515_v9  ;;  %2948 = vperm.xlu0 %3675, %v3808_v1   ;;  %6619 = vst [vmem:[#allocation32_spill] sm:$0xff] %v5788_v36  ;;  %v5790_v45 = vpop.permute.xlu1 %2635 }
 0x17f   : > { %v1777_v17 = vsub.f32 %v1721_v23, %v5460_v58  ;;  %v1778_v8 = vsub.f32 %v1722_v12, %v6618_v6  ;;  %v722_v61 = vsel %vm523_vm2, %v719_v37, %v721_v13  ;;  %v6620_v32 = vrot.slane %v5555_v31, 2  ;;  %v5806_v6 = vpop.f32.mrf.mxu0  ;;  %v5808_v36 = vpop.f32.mrf.mxu1 }
 0x180   : > { %v951_v63 = vsel %vm782_vm4, %v948_v4, %v950_v40  ;;  %v6621_v21 = vrot.slane %v5555_v31, 3  ;;  %v1178_v12 = vsel %vm1012_vm5, %v1175_v7, %v1177_v19  ;;  %v954_v37 = vrot.slane %v5615_v39, 2 }
 0x181   : > { %v949_v30 = vsel %vm782_vm4, %v6620_v32, %v948_v4  ;;  %v1805_v9 = vmax.f32 %v1777_v17, 0.0  ;;  %v1806_v60 = vmax.f32 %v1778_v8, 0.0  ;;  %v1009_v23 = vadd.f32 %v951_v63, %v776_v24 }
 0x182   : > { %v1176_v58 = vsel %vm1012_vm5, %v6621_v21, %v1175_v7  ;;  %v1008_v56 = vadd.f32 %v949_v30, %v775_v52  ;;  %v1181_v13 = vrot.slane %v5615_v39, 3  ;;  %v952_v1 = vrot.slane %v5695_v2, 2  ;;  %v5814_v53 = vpop.permute.xlu1 %2640 }
 0x183   : > { %v1833_v4 = vadd.f32 1e-05, %v1805_v9  ;;  %v1834_v32 = vadd.f32 1e-05, %v1806_v60  ;;  %v1236_v21 = vadd.f32 %v1178_v12, %v1009_v23  ;;  %v778_v17 = vadd.f32 %v722_v61, %v5555_v31  ;;  %v5817_v31 = vpop.f32.mrf.mxu0 }
 0x184   : > { %v1235_v29 = vadd.f32 %v1176_v58, %v1008_v56  ;;  %v953_v52 = vsel %vm782_vm4, %v950_v40, %v952_v1  ;;  %v955_v7 = vsel %vm782_vm4, %v952_v1, %v954_v37  ;;  %v1179_v8 = vrot.slane %v5695_v2, 3  ;;  %v5819_v40 = vpop.permute.xlu0 %2675  ;;  %v6624_v2 = vld [vmem:[#allocation29_spill] sm:$0xff] }
 0x185   : > { %3817 = vrsqrt.f32 %v1833_v4  ;;  %v1724_v30 = vmul.f32 0.00390625, %v1236_v21  ;;  %v1010_v63 = vadd.f32 %v953_v52, %v777_v50  ;;  %v1011_v58 = vadd.f32 %v955_v7, %v778_v17  ;;  %6623 = vst [vmem:[#allocation41_spill] sm:$0xff] %v5819_v40  ;;  %v5824_v50 = vpop.f32.mrf.mxu1 }
 0x186   : > { %v3810_v24 = vpop.eup %3809  ;;  %v1723_v39 = vmul.f32 0.00390625, %v1235_v29  ;;  %3819 = vrsqrt.f32 %v1834_v32  ;;  %v1180_v60 = vsel %vm1012_vm5, %v1177_v19, %v1179_v8  ;;  %v1182_v29 = vsel %vm1012_vm5, %v1179_v8, %v1181_v13  ;;  %v6625_v32 = vld [vmem:[#allocation27_spill] sm:$0xff] }
 0x187   : > { %v3812_v9 = vpop.eup %3811  ;;  %2953 = vperm.xlu1 %3676, %v3810_v24   ;;  %v1780_v56 = vsub.f32 %v1724_v30, %v6624_v2  ;;  %v1237_v23 = vadd.f32 %v1180_v60, %v1010_v63  ;;  %v1238_v12 = vadd.f32 %v1182_v29, %v1011_v58  ;;  %v1753_v37 = vmul.f32 %v5462_v38, %v5462_v38  ;;  %v5832_v24 = vpop.f32.mrf.mxu1 }
 0x188   : > { %v1779_v61 = vsub.f32 %v1723_v39, %v5756_v27  ;;  %2958 = vperm.xlu0 %3675, %v3812_v9   ;;  %v1754_v21 = vmul.f32 %v6625_v32, %v6625_v32  ;;  %v5830_v27 = vpop.f32.mrf.mxu0  ;;  %v5834_v39 = vpop.permute.xlu1 %2650  ;;  %v2739_v60 = vlaneseq }
 0x189   : > { %v1808_v1 = vmax.f32 %v1780_v56, 0.0  ;;  %v1725_v4 = vmul.f32 0.00390625, %v1237_v23  ;;  %v1726_v17 = vmul.f32 0.00390625, %v1238_v12  ;;  %v5836_v38 = vpop.permute.xlu0 %2685  ;;  %v5840_v56 = vpop.f32.mrf.mxu1 }
 0x18a   : > { %v1807_v19 = vmax.f32 %v1779_v61, 0.0  ;;  %v3814_v52 = vpop.eup %3813  ;;  %6626 = vst [vmem:[#allocation34_spill] sm:$0xff] %v5836_v38  ;;  %v5838_v61 = vpop.f32.mrf.mxu0 }
 0x18b   : > { %v1836_v13 = vadd.f32 1e-05, %v1808_v1  ;;  %v1781_v8 = vsub.f32 %v1725_v4, %v1753_v37  ;;  %v3816_v30 = vpop.eup %3815  ;;  %v1782_v63 = vsub.f32 %v1726_v17, %v1754_v21  ;;  %2963 = vperm.xlu1 %3676, %v3814_v52   ;;  %v5844_v37 = vshrl.u32 %v2739_v60, 7  ;;  %v5848_v32 = vpop.f32.mrf.mxu1 }
 0x18c   : > { %v1835_v7 = vadd.f32 1e-05, %v1807_v19  ;;  %2968 = vperm.xlu0 %3675, %v3816_v30   ;;  %v5842_v23 = vpop.permute.xlu1 %2660  ;;  %v5846_v19 = vpop.f32.mrf.mxu0 }
 0x18d   : > { %v1809_v9 = vmax.f32 %v1781_v8, 0.0  ;;  %v1810_v58 = vmax.f32 %v1782_v63, 0.0  ;;  %v2696_v1 = vpop.permute.xlu0 %2695  ;;  %v6460_v21 = vsub.s32 0, %v5844_v37  ;;  %v5859_v8 = vpop.f32.mrf.mxu1 }
 0x18e   : > { %3821 = vrsqrt.f32 %v1835_v7  ;;  %v5851_v17 = vpop.f32.mrf.mxu0  ;;  %v2597_v7 = vld [vmem:[%s6387_s2] sm:$0x3] }
 0x18f   : > { %3823 = vrsqrt.f32 %v1836_v13  ;;  %v1837_v2 = vadd.f32 1e-05, %v1809_v9  ;;  %v1838_v29 = vadd.f32 1e-05, %v1810_v58  ;;  %v6464_v13 = vsub.s32 1, %v5844_v37 }
 0x190   : > { %v5853_v52 = vpop.permute.xlu1 %2670  ;;  %v5863_v9 = vrot.slane %v2597_v7, %v6460_v21  ;;  %v5865_v58 = vpop.f32.mrf.mxu0 }
 0x191   : > { %3825 = vrsqrt.f32 %v1837_v2  ;;  %6627 = vst [vmem:[#allocation36_spill] sm:$0xff] %v5853_v52  ;;  %v2706_v30 = vpop.permute.xlu0 %2705 }
 0x192   : > { %v3818_v12 = vpop.eup %3817  ;;  %3827 = vrsqrt.f32 %v1838_v29  ;;  %v5871_v29 = vrot.slane %v2597_v7, %v6464_v13  ;;  %v5881_v52 = vpop.f32.mrf.mxu0 }
 0x193   : > { %v3820_v4 = vpop.eup %3819  ;;  %2973 = vperm.xlu1 %3676, %v3818_v12   ;;  %v5873_v12 = vpop.f32.mrf.mxu1 }
 0x194   : > { %2978 = vperm.xlu0 %3675, %v3820_v4   ;;  %v5867_v60 = vpop.permute.xlu1 %2680  ;;  %v5876_v4 = vmul.f32 %v5863_v9, %v2696_v1  ;;  %v5879_v38 = vmul.f32 %v5871_v29, %v2696_v1  ;;  %v5887_v7 = vmul.f32 %v5871_v29, %v2706_v30 }
 0x195   : > { %6628 = vst [vmem:[#allocation13_spill] sm:$0xff] %v5867_v60  ;;  %v5884_v60 = vmul.f32 %v5863_v9, %v2706_v30 }
 0x196   : > { %6629 = vst [vmem:[#allocation37_spill] sm:$0xff] %v5876_v4  ;;  %6630 = vst [vmem:[#allocation38_spill] sm:$0xff] %v5879_v38 }
 0x197   : > { %v2716_v21 = vpop.permute.xlu0 %2715  ;;  %6631 = vst [vmem:[#allocation39_spill] sm:$0xff] %v5884_v60  ;;  %6632 = vst [vmem:[#allocation40_spill] sm:$0xff] %v5887_v7  ;;  %v5903_v7 = vpop.f32.mrf.mxu0 }
 0x198   : > { %v5892_v4 = vmul.f32 %v5863_v9, %v2716_v21  ;;  %v5895_v1 = vmul.f32 %v5871_v29, %v2716_v21  ;;  %6638 = vst [vmem:[#allocation27_spill] sm:$0xff] %v5903_v7 }
 0x19a   : > { %6634 = vst [vmem:[#allocation21_spill] sm:$0xff] %v5892_v4  ;;  %6635 = vst [vmem:[#allocation24_spill] sm:$0xff] %v5895_v1 }
 0x19b   : > { %v3822_v63 = vpop.eup %3821 }
 0x19c   : > { %v3824_v2 = vpop.eup %3823  ;;  %2983 = vperm.xlu1 %3676, %v3822_v63   ;;  %v2691_v63 = vpop.permute.xlu1 %2690 }
 0x19d   : > { %2988 = vperm.xlu0 %3675, %v3824_v2   ;;  %v5889_v2 = vpop.f32.mrf.mxu1  ;;  %v5898_v38 = vmul.f32 %v5863_v9, %v2691_v63  ;;  %v5901_v60 = vmul.f32 %v5871_v29, %v2691_v63  ;;  %v2726_v30 = vpop.permute.xlu0 %2725 }
 0x19e   : > { %v3826_v40 = vpop.eup %3825  ;;  %6633 = vst [vmem:[#allocation17_spill] sm:$0xff] %v5889_v2  ;;  %v5919_v63 = vpop.f32.mrf.mxu0 }
 0x19f   : > { %v3828_v13 = vpop.eup %3827  ;;  %6636 = vst [vmem:[#allocation16_spill] sm:$0xff] %v5898_v38  ;;  %6637 = vst [vmem:[#allocation29_spill] sm:$0xff] %v5901_v60  ;;  %v5911_v2 = vpop.f32.mrf.mxu1 }
 0x1a0   : > { %2993 = vperm.xlu1 %3676, %v3826_v40   ;;  %v5906_v40 = vmul.f32 %v5863_v9, %v2726_v30  ;;  %6641 = vst [vmem:[#allocation44_spill] sm:$0xff] %v5911_v2  ;;  %v2701_v4 = vpop.permute.xlu1 %2700  ;;  %6644 = vst [vmem:[#allocation47_spill] sm:$0xff] %v5919_v63 }
 0x1a1   : > { %2998 = vperm.xlu0 %3675, %v3828_v13   ;;  %v5909_v13 = vmul.f32 %v5871_v29, %v2726_v30  ;;  %v5914_v21 = vmul.f32 %v5863_v9, %v2701_v4  ;;  %v5917_v1 = vmul.f32 %v5871_v29, %v2701_v4  ;;  %v2736_v38 = vpop.permute.xlu0 %2735  ;;  %v5921_v60 = vpop.f32.mrf.mxu1 }
 0x1a2   : > { %6639 = vst [vmem:[#allocation42_spill] sm:$0xff] %v5906_v40  ;;  %6645 = vst [vmem:[#allocation48_spill] sm:$0xff] %v5921_v60  ;;  %v5924_v7 = vmul.f32 %v5863_v9, %v2736_v38  ;;  %v5927_v30 = vmul.f32 %v5871_v29, %v2736_v38 }
 0x1a3   : > { %6640 = vst [vmem:[#allocation43_spill] sm:$0xff] %v5909_v13  ;;  %6642 = vst [vmem:[#allocation45_spill] sm:$0xff] %v5914_v21  ;;  %v5929_v13 = vpop.f32.mrf.mxu0  ;;  %v5931_v40 = vpop.f32.mrf.mxu1 }
 0x1a4   : > { %6643 = vst [vmem:[#allocation46_spill] sm:$0xff] %v5917_v1  ;;  %6646 = vst [vmem:[#allocation49_spill] sm:$0xff] %v5924_v7 }
 0x1a5   : > { %6647 = vst [vmem:[#allocation50_spill] sm:$0xff] %v5927_v30  ;;  %6648 = vst [vmem:[#allocation51_spill] sm:$0xff] %v5929_v13  ;;  %v5939_v1 = vpop.f32.mrf.mxu0  ;;  %v5941_v60 = vpop.f32.mrf.mxu1 }
 0x1a6   : > { %6649 = vst [vmem:[#allocation52_spill] sm:$0xff] %v5931_v40  ;;  %6652 = vst [vmem:[#allocation55_spill] sm:$0xff] %v5941_v60 }
 0x1a7   : > { %v5943_v63 = vpop.f32.mrf.mxu0  ;;  %v5945_v7 = vpop.f32.mrf.mxu1 }
 0x1a8   : > { %v2711_v2 = vpop.permute.xlu1 %2710  ;;  %6653 = vst [vmem:[#allocation56_spill] sm:$0xff] %v5943_v63  ;;  %6654 = vst [vmem:[#allocation57_spill] sm:$0xff] %v5945_v7  ;;  %v2463_v7 = vadd.f32 %v5517_v15, %v5513_v20  ;;  %v2469_v15 = vadd.f32 %v5542_v3, %v5535_v42  ;;  %v6665_v42 = vsub.s32 0, %v5844_v37 }
 0x1a9   : > { %v5934_v21 = vmul.f32 %v5863_v9, %v2711_v2  ;;  %v5937_v4 = vmul.f32 %v5871_v29, %v2711_v2  ;;  %v5953_v13 = vpop.f32.mrf.mxu0  ;;  %v2459_v2 = vadd.f32 %v5492_v47, %v5489_v33  ;;  %v2749_v33 = vmul.f32 %v5863_v9, %v5714_v14 }
 0x1aa   : > { %6657 = vst [vmem:[#allocation60_spill] sm:$0xff] %v5953_v13  ;;  %v2750_v47 = vmul.f32 %v5871_v29, %v5714_v14  ;;  %v2473_v14 = vadd.f32 %v5565_v57, %v5561_v0  ;;  %v2753_v0 = vmul.f32 %v5863_v9, %v5669_v48  ;;  %v2754_v57 = vmul.f32 %v5871_v29, %v5669_v48 }
 0x1ab   : > { %6650 = vst [vmem:[#allocation53_spill] sm:$0xff] %v5934_v21  ;;  %6651 = vst [vmem:[#allocation54_spill] sm:$0xff] %v5937_v4  ;;  %v5955_v21 = vpop.f32.mrf.mxu1  ;;  %v2461_v4 = vadd.f32 %v5503_v41, %v5499_v5  ;;  %v5965_v63 = vpop.f32.mrf.mxu0  ;;  %v3057_v41 = vld [vmem:[%s6388_s3] sm:$0x3] }
 0x1ac   : > { %6658 = vst [vmem:[#allocation61_spill] sm:$0xff] %v5955_v21  ;;  %6659 = vst [vmem:[#allocation62_spill] sm:$0xff] %v5965_v63  ;;  %v5999_v3 = vrot.slane %v3057_v41, %v6665_v42  ;;  %v2809_v42 = vsub.f32 %v2469_v15, %v2753_v0 }
 0x1ad   : > { %v5975_v5 = vpop.f32.mrf.mxu1  ;;  %v5995_v21 = vpop.f32.mrf.mxu0 }
 0x1ae   : > { %6660 = vst [vmem:[#allocation63_spill] sm:$0xff] %v5975_v5  ;;  %v6663_v5 = vld [vmem:[#allocation11_spill] sm:$0xff] }
 0x1af   : > { %v2475_v63 = vadd.f32 %v6663_v5, %v5571_v34  ;;  %6664 = vst [vmem:[#allocation11_spill] sm:$0xff] %v5995_v21  ;;  %v2755_v34 = vmul.f32 %v5863_v9, %v5685_v43 }
 0x1b1   : > { %v2721_v38 = vpop.permute.xlu1 %2720 }
 0x1b2   : > { %v5948_v30 = vmul.f32 %v5863_v9, %v2721_v38  ;;  %v5951_v40 = vmul.f32 %v5871_v29, %v2721_v38  ;;  %v2751_v38 = vmul.f32 %v5863_v9, %v5637_v10 }
 0x1b4   : > { %6655 = vst [vmem:[#allocation58_spill] sm:$0xff] %v5948_v30  ;;  %6656 = vst [vmem:[#allocation59_spill] sm:$0xff] %v5951_v40  ;;  %v2465_v30 = vadd.f32 %v5525_v16, %v5523_v49  ;;  %v2752_v40 = vmul.f32 %v5871_v29, %v5637_v10  ;;  %v2471_v49 = vadd.f32 %v5557_v55, %v5547_v54  ;;  %v6666_v54 = vsub.s32 1, %v5844_v37 }
 0x1b5   : > { %v2807_v13 = vsub.f32 %v2463_v7, %v2751_v38  ;;  %v2756_v37 = vmul.f32 %v5871_v29, %v5685_v43 }
 0x1b6   : > { %v6003_v55 = vrot.slane %v3057_v41, %v6666_v54  ;;  %v2808_v60 = vsub.f32 %v2465_v30, %v2752_v40  ;;  %v6017_v30 = vpop.f32.mrf.mxu0  ;;  %v2810_v54 = vsub.f32 %v2471_v49, %v2754_v57 }
 0x1b7   : > { %6668 = vst [vmem:[#allocation67_spill] sm:$0xff] %v6017_v30 }
 0x1ba   : > { %v2731_v20 = vpop.permute.xlu1 %2730 }
 0x1bb   : > { %v5985_v16 = vmul.f32 %v5863_v9, %v2731_v20  ;;  %v5988_v10 = vmul.f32 %v5871_v29, %v2731_v20  ;;  %v6005_v20 = vpop.f32.mrf.mxu1 }
 0x1bc   : > { %6667 = vst [vmem:[#allocation66_spill] sm:$0xff] %v6005_v20  ;;  %v2869_v41 = vpop.permute.xlu0 %2868 }
 0x1bd   : > { %6661 = vst [vmem:[#allocation64_spill] sm:$0xff] %v5985_v16  ;;  %6662 = vst [vmem:[#allocation65_spill] sm:$0xff] %v5988_v10  ;;  %v2805_v10 = vsub.f32 %v2459_v2, %v2749_v33  ;;  %v2806_v16 = vsub.f32 %v2461_v4, %v2750_v47  ;;  %v3003_v7 = vmul.f32 %v2869_v41, %v2807_v13  ;;  %v6019_v38 = vpop.f32.mrf.mxu1 }
 0x1be   : > { %v2864_v5 = vpop.permute.xlu1 %2863  ;;  %v3004_v40 = vmul.f32 %v2869_v41, %v2808_v60  ;;  %6669 = vst [vmem:[#allocation68_spill] sm:$0xff] %v6019_v38  ;;  %v2812_v13 = vsub.f32 %v2475_v63, %v2756_v37  ;;  %v6025_v60 = vpop.f32.mrf.mxu0 }
 0x1bf   : > { %v3001_v2 = vmul.f32 %v2864_v5, %v2805_v10  ;;  %v3002_v4 = vmul.f32 %v2864_v5, %v2806_v16  ;;  %v3071_v47 = vadd.f32 %v5999_v3, %v3003_v7  ;;  %v2811_v16 = vsub.f32 %v2473_v14, %v2755_v34  ;;  %v6027_v30 = vpop.f32.mrf.mxu1  ;;  %v6670_v14 = vld [vmem:[#allocation31_spill] sm:$0xff]  ;;  %v6671_v34 = vld [vmem:[#allocation12_spill] sm:$0xff] }
 0x1c0   : > { %v3072_v43 = vadd.f32 %v6003_v55, %v3004_v40  ;;  %v2479_v57 = vadd.f32 %v5593_v22, %v6670_v14  ;;  %v2481_v37 = vadd.f32 %v5610_v44, %v6671_v34  ;;  %v6673_v7 = vld [vmem:[#allocation23_spill] sm:$0xff]  ;;  %v6674_v22 = vld [vmem:[#allocation22_spill] sm:$0xff]  ;;  %v2759_v44 = vmul.f32 %v5863_v9, %v5731_v28 }
 0x1c1   : > { %v3069_v48 = vadd.f32 %v5999_v3, %v3001_v2  ;;  %v3070_v33 = vadd.f32 %v6003_v55, %v3002_v4  ;;  %v2757_v40 = vmul.f32 %v5863_v9, %v6673_v7  ;;  %v6678_v34 = vld [vmem:[#allocation19_spill] sm:$0xff] }
 0x1c2   : > { %v3561_v21 = vpack.c.bf16 %v3072_v43, %v3071_v47  ;;  %v2874_v10 = vpop.permute.xlu1 %2873  ;;  %v6675_v47 = vld [vmem:[#allocation14_spill] sm:$0xff] }
 0x1c3   : > { %v3560_v20 = vpack.c.bf16 %v3070_v33, %v3069_v48  ;;  %v3005_v5 = vmul.f32 %v2874_v10, %v2809_v42  ;;  %v3006_v41 = vmul.f32 %v2874_v10, %v2810_v54  ;;  %v2879_v38 = vpop.permute.xlu0 %2878  ;;  %v6047_v48 = vpop.f32.mrf.mxu0  ;;  %v2485_v43 = vadd.f32 %v6675_v47, %v6674_v22 }
 0x1c4   : > { %3294 = vst [vmem:[%s6029_s14 + $0x8] sm:$0xff] %v3561_v21  ;;  %v3007_v15 = vmul.f32 %v2879_v38, %v2811_v16  ;;  %v3008_v49 = vmul.f32 %v2879_v38, %v2812_v13  ;;  %v6672_v21 = vld [vmem:[#allocation30_spill] sm:$0xff]  ;;  %v2758_v38 = vmul.f32 %v5871_v29, %v6673_v7  ;;  %v2760_v42 = vmul.f32 %v5871_v29, %v5731_v28  ;;  %v6055_v54 = vpop.f32.mrf.mxu1 }
 0x1c5   : > { %3293 = vst [vmem:[%s6029_s14] sm:$0xff] %v3560_v20  ;;  %v3073_v0 = vadd.f32 %v5999_v3, %v3005_v5  ;;  %v3074_v63 = vadd.f32 %v6003_v55, %v3006_v41  ;;  %v2483_v20 = vadd.f32 %v6672_v21, %v5627_v35  ;;  %v6059_v10 = vpop.f32.mrf.mxu0  ;;  %v2813_v16 = vsub.f32 %v2479_v57, %v2757_v40  ;;  %v6679_v21 = vld [vmem:[#allocation25_spill] sm:$0xff] }
 0x1c6   : > { %v3075_v2 = vadd.f32 %v5999_v3, %v3007_v15  ;;  %v3076_v4 = vadd.f32 %v6003_v55, %v3008_v49  ;;  %v2814_v13 = vsub.f32 %v2481_v37, %v2758_v38  ;;  %v6061_v5 = vpop.f32.mrf.mxu1  ;;  %v2816_v49 = vsub.f32 %v2485_v43, %v2760_v42 }
 0x1c7   : > { %v3562_v33 = vpack.c.bf16 %v3074_v63, %v3073_v0  ;;  %v2815_v15 = vsub.f32 %v2483_v20, %v2759_v44  ;;  %v6676_v0 = vld [vmem:[#allocation15_spill] sm:$0xff]  ;;  %v6677_v63 = vld [vmem:[#allocation18_spill] sm:$0xff]  ;;  %v2491_v28 = vadd.f32 %v6679_v21, %v6678_v34  ;;  %v2495_v57 = vadd.f32 %v5729_v18, %v5721_v62  ;;  %v6075_v43 = vpop.f32.mrf.mxu0 }
 0x1c8   : > { %v3563_v35 = vpack.c.bf16 %v3076_v4, %v3075_v2  ;;  %v2489_v14 = vadd.f32 %v6677_v63, %v6676_v0  ;;  %v6680_v4 = vld [vmem:[#allocation20_spill] sm:$0xff]  ;;  %v2761_v20 = vmul.f32 %v5863_v9, %v5758_v59  ;;  %v2762_v38 = vmul.f32 %v5871_v29, %v5758_v59  ;;  %v6083_v18 = vpop.f32.mrf.mxu1 }
 0x1c9   : > { %3295 = vst [vmem:[%s6029_s14 + $0x10] sm:$0xff] %v3562_v33  ;;  %v6681_v33 = vld [vmem:[#allocation35_spill] sm:$0xff]  ;;  %v2764_v62 = vmul.f32 %v5871_v29, %v5790_v45  ;;  %v6091_v0 = vpop.f32.mrf.mxu0 }
 0x1ca   : > { %3296 = vst [vmem:[%s6029_s14 + $0x18] sm:$0xff] %v3563_v35  ;;  %v2493_v47 = vadd.f32 %v6681_v33, %v6680_v4  ;;  %v2763_v35 = vmul.f32 %v5863_v9, %v5790_v45  ;;  %v2817_v63 = vsub.f32 %v2489_v14, %v2761_v20  ;;  %v2818_v34 = vsub.f32 %v2491_v28, %v2762_v38  ;;  %v6682_v45 = vld [vmem:[#allocation32_spill] sm:$0xff]  ;;  %v6683_v33 = vld [vmem:[#allocation26_spill] sm:$0xff] }
 0x1cb   : > { %v2503_v21 = vadd.f32 %v6682_v45, %v5783_v11  ;;  %v2767_v11 = vmul.f32 %v5863_v9, %v6683_v33  ;;  %v2515_v45 = vadd.f32 %v5848_v32, %v5846_v19 }
 0x1cc   : > { %v2884_v41 = vpop.permute.xlu1 %2883  ;;  %v2819_v4 = vsub.f32 %v2493_v47, %v2763_v35 }
 0x1cd   : > { %v3009_v7 = vmul.f32 %v2884_v41, %v2813_v16  ;;  %v3010_v22 = vmul.f32 %v2884_v41, %v2814_v13  ;;  %v2889_v2 = vpop.permute.xlu0 %2888 }
 0x1ce   : > { %v3011_v37 = vmul.f32 %v2889_v2, %v2815_v15  ;;  %v3012_v40 = vmul.f32 %v2889_v2, %v2816_v49  ;;  %v2499_v15 = vadd.f32 %v5747_v46, %v5739_v51  ;;  %v2501_v49 = vadd.f32 %v5772_v26, %v5766_v25 }
 0x1cf   : > { %v3077_v44 = vadd.f32 %v5999_v3, %v3009_v7  ;;  %v3078_v42 = vadd.f32 %v6003_v55, %v3010_v22  ;;  %v2505_v7 = vadd.f32 %v5808_v36, %v5806_v6  ;;  %v6098_v22 = vpop.f32.mrf.mxu1  ;;  %v2820_v51 = vsub.f32 %v2495_v57, %v2764_v62 }
 0x1d0   : > { %v3079_v16 = vadd.f32 %v5999_v3, %v3011_v37  ;;  %v3080_v13 = vadd.f32 %v6003_v55, %v3012_v40  ;;  %v2765_v46 = vmul.f32 %v5863_v9, %v5814_v53  ;;  %v2766_v25 = vmul.f32 %v5871_v29, %v5814_v53  ;;  %v6109_v40 = vpop.f32.mrf.mxu0 }
 0x1d1   : > { %v3564_v59 = vpack.c.bf16 %v3078_v42, %v3077_v44  ;;  %v2768_v36 = vmul.f32 %v5871_v29, %v6683_v33  ;;  %v6113_v20 = vpop.f32.mrf.mxu1  ;;  %v2509_v44 = vadd.f32 %v5824_v50, %v5817_v31 }
 0x1d2   : > { %v3565_v41 = vpack.c.bf16 %v3080_v13, %v3079_v16  ;;  %v2821_v35 = vsub.f32 %v2499_v15, %v2765_v46  ;;  %v2822_v62 = vsub.f32 %v2501_v49, %v2766_v25  ;;  %v2511_v16 = vadd.f32 %v5832_v24, %v5830_v27 }
 0x1d3   : > { %3297 = vst [vmem:[%s6029_s14 + $0x20] sm:$0xff] %v3564_v59  ;;  %v2769_v49 = vmul.f32 %v5863_v9, %v5834_v39  ;;  %v2770_v27 = vmul.f32 %v5871_v29, %v5834_v39  ;;  %v6132_v24 = vpop.f32.mrf.mxu1 }
 0x1d4   : > { %3298 = vst [vmem:[%s6029_s14 + $0x28] sm:$0xff] %v3565_v41  ;;  %v2894_v2 = vpop.permute.xlu1 %2893  ;;  %v2823_v41 = vsub.f32 %v2503_v21, %v2767_v11  ;;  %v6684_v21 = vld [vmem:[#allocation28_spill] sm:$0xff] }
 0x1d5   : > { %v3013_v26 = vmul.f32 %v2894_v2, %v2817_v63  ;;  %v3014_v14 = vmul.f32 %v2894_v2, %v2818_v34  ;;  %v2899_v28 = vpop.permute.xlu0 %2898  ;;  %v2824_v63 = vsub.f32 %v2505_v7, %v2768_v36  ;;  %v2513_v34 = vadd.f32 %v5840_v56, %v5838_v61  ;;  %v6125_v2 = vpop.f32.mrf.mxu0 }
 0x1d6   : > { %v3015_v6 = vmul.f32 %v2899_v28, %v2819_v4  ;;  %v3016_v37 = vmul.f32 %v2899_v28, %v2820_v51  ;;  %v2771_v19 = vmul.f32 %v5863_v9, %v6684_v21  ;;  %v2772_v32 = vmul.f32 %v5871_v29, %v6684_v21 }
 0x1d7   : > { %v3081_v47 = vadd.f32 %v5999_v3, %v3013_v26  ;;  %v3082_v57 = vadd.f32 %v6003_v55, %v3014_v14  ;;  %v6143_v46 = vpop.f32.mrf.mxu0  ;;  %v6145_v26 = vpop.f32.mrf.mxu1  ;;  %v2825_v28 = vsub.f32 %v2509_v44, %v2769_v49  ;;  %v2826_v33 = vsub.f32 %v2511_v16, %v2770_v27 }
 0x1d8   : > { %v3083_v53 = vadd.f32 %v5999_v3, %v3015_v6  ;;  %v3084_v38 = vadd.f32 %v6003_v55, %v3016_v37  ;;  %v2828_v11 = vsub.f32 %v2515_v45, %v2772_v32  ;;  %v2827_v6 = vsub.f32 %v2513_v34, %v2771_v19  ;;  %v6689_v32 = vld [vmem:[#allocation47_spill] sm:$0xff] }
 0x1d9   : > { %v3566_v42 = vpack.c.bf16 %v3082_v57, %v3081_v47  ;;  %v2773_v44 = vmul.f32 %v5863_v9, %v5842_v23  ;;  %v2774_v16 = vmul.f32 %v5871_v29, %v5842_v23 }
 0x1da   : > { %v3567_v13 = vpack.c.bf16 %v3084_v38, %v3083_v53  ;;  %v2904_v59 = vpop.permute.xlu1 %2903  ;;  %v2519_v53 = vadd.f32 %v5859_v8, %v5851_v17  ;;  %v2521_v38 = vadd.f32 %v5873_v12, %v5865_v58  ;;  %v6685_v8 = vld [vmem:[#allocation17_spill] sm:$0xff]  ;;  %v6686_v12 = vld [vmem:[#allocation27_spill] sm:$0xff] }
 0x1db   : > { %3299 = vst [vmem:[%s6029_s14 + $0x30] sm:$0xff] %v3566_v42  ;;  %v3017_v31 = vmul.f32 %v2904_v59, %v2821_v35  ;;  %v3018_v50 = vmul.f32 %v2904_v59, %v2822_v62  ;;  %v2909_v15 = vpop.permute.xlu0 %2908  ;;  %v6153_v42 = vpop.f32.mrf.mxu0  ;;  %v2523_v58 = vadd.f32 %v6685_v8, %v5881_v52 }
 0x1dc   : > { %3300 = vst [vmem:[%s6029_s14 + $0x38] sm:$0xff] %v3567_v13  ;;  %v3019_v61 = vmul.f32 %v2909_v15, %v2823_v41  ;;  %v3020_v56 = vmul.f32 %v2909_v15, %v2824_v63  ;;  %v6159_v13 = vpop.f32.mrf.mxu1  ;;  %v6687_v41 = vld [vmem:[#allocation44_spill] sm:$0xff]  ;;  %v2829_v52 = vsub.f32 %v2519_v53, %v2773_v44 }
 0x1dd   : > { %v3085_v7 = vadd.f32 %v5999_v3, %v3017_v31  ;;  %v3086_v4 = vadd.f32 %v6003_v55, %v3018_v50  ;;  %v2525_v63 = vadd.f32 %v6687_v41, %v6686_v12  ;;  %v6688_v50 = vld [vmem:[#allocation33_spill] sm:$0xff]  ;;  %v6173_v49 = vpop.f32.mrf.mxu0  ;;  %v6695_v53 = vld [vmem:[#allocation56_spill] sm:$0xff] }
 0x1de   : > { %v3087_v51 = vadd.f32 %v5999_v3, %v3019_v61  ;;  %v3088_v39 = vadd.f32 %v6003_v55, %v3020_v56  ;;  %v2775_v23 = vmul.f32 %v5863_v9, %v6688_v50  ;;  %v2776_v15 = vmul.f32 %v5871_v29, %v6688_v50  ;;  %v6175_v61 = vpop.f32.mrf.mxu1 }
 0x1df   : > { %v3568_v25 = vpack.c.bf16 %v3086_v4, %v3085_v7  ;;  %v2830_v56 = vsub.f32 %v2521_v38, %v2774_v16  ;;  %v6690_v7 = vld [vmem:[#allocation48_spill] sm:$0xff]  ;;  %v6696_v38 = vld [vmem:[#allocation57_spill] sm:$0xff] }
 0x1e0   : > { %v3569_v14 = vpack.c.bf16 %v3088_v39, %v3087_v51  ;;  %v2831_v21 = vsub.f32 %v2523_v58, %v2775_v23  ;;  %v2832_v19 = vsub.f32 %v2525_v63, %v2776_v15  ;;  %v2529_v4 = vadd.f32 %v6690_v7, %v6689_v32  ;;  %v6691_v51 = vld [vmem:[#allocation51_spill] sm:$0xff]  ;;  %v6692_v39 = vld [vmem:[#allocation52_spill] sm:$0xff]  ;;  %v6697_v58 = vld [vmem:[#allocation41_spill] sm:$0xff] }
 0x1e1   : > { %3301 = vst [vmem:[%s6029_s14 + $0x40] sm:$0xff] %v3568_v25  ;;  %v2914_v36 = vpop.permute.xlu1 %2913  ;;  %v2531_v25 = vadd.f32 %v6692_v39, %v6691_v51  ;;  %v2779_v12 = vmul.f32 %v5863_v9, %v6697_v58  ;;  %v6700_v32 = vld [vmem:[#allocation62_spill] sm:$0xff]  ;;  %v6701_v7 = vld [vmem:[#allocation63_spill] sm:$0xff] }
 0x1e2   : > { %3302 = vst [vmem:[%s6029_s14 + $0x48] sm:$0xff] %v3569_v14  ;;  %v3021_v37 = vmul.f32 %v2914_v36, %v2825_v28  ;;  %v3022_v47 = vmul.f32 %v2914_v36, %v2826_v33  ;;  %v2919_v57 = vpop.permute.xlu0 %2918  ;;  %v6693_v28 = vld [vmem:[#allocation36_spill] sm:$0xff]  ;;  %v2541_v51 = vadd.f32 %v6701_v7, %v6700_v32 }
 0x1e3   : > { %v3023_v35 = vmul.f32 %v2919_v57, %v2827_v6  ;;  %v3024_v62 = vmul.f32 %v2919_v57, %v2828_v11  ;;  %v2777_v33 = vmul.f32 %v5863_v9, %v6693_v28  ;;  %v2778_v11 = vmul.f32 %v5871_v29, %v6693_v28 }
 0x1e4   : > { %v3089_v59 = vadd.f32 %v5999_v3, %v3021_v37  ;;  %v3090_v17 = vadd.f32 %v6003_v55, %v3022_v47  ;;  %v6694_v47 = vld [vmem:[#allocation55_spill] sm:$0xff] }
 0x1e5   : > { %v3091_v34 = vadd.f32 %v5999_v3, %v3023_v35  ;;  %v3092_v45 = vadd.f32 %v6003_v55, %v3024_v62  ;;  %v2533_v57 = vadd.f32 %v6694_v47, %v5939_v1  ;;  %v2535_v35 = vadd.f32 %v6696_v38, %v6695_v53  ;;  %v6191_v62 = vpop.f32.mrf.mxu0  ;;  %v6704_v47 = vld [vmem:[#allocation66_spill] sm:$0xff]  ;;  %v6705_v53 = vld [vmem:[#allocation67_spill] sm:$0xff]  ;;  %v6706_v38 = vld [vmem:[#allocation68_spill] sm:$0xff] }
 0x1e6   : > { %v3570_v31 = vpack.c.bf16 %v3090_v17, %v3089_v59  ;;  %v6193_v59 = vpop.f32.mrf.mxu1  ;;  %v2780_v1 = vmul.f32 %v5871_v29, %v6697_v58 }
 0x1e7   : > { %v3571_v27 = vpack.c.bf16 %v3092_v45, %v3091_v34  ;;  %v2833_v45 = vsub.f32 %v2529_v4, %v2777_v33  ;;  %v2835_v50 = vsub.f32 %v2533_v57, %v2779_v12  ;;  %v6203_v15 = vpop.f32.mrf.mxu0  ;;  %v6702_v33 = vld [vmem:[#allocation13_spill] sm:$0xff]  ;;  %v6707_v12 = vld [vmem:[#allocation34_spill] sm:$0xff] }
 0x1e8   : > { %3303 = vst [vmem:[%s6029_s14 + $0x50] sm:$0xff] %v3570_v31  ;;  %v2834_v31 = vsub.f32 %v2531_v25, %v2778_v11  ;;  %v2836_v23 = vsub.f32 %v2535_v35, %v2780_v1  ;;  %v6209_v39 = vpop.f32.mrf.mxu1  ;;  %v2781_v25 = vmul.f32 %v5863_v9, %v6702_v33  ;;  %v2782_v11 = vmul.f32 %v5871_v29, %v6702_v33 }
 0x1e9   : > { %3304 = vst [vmem:[%s6029_s14 + $0x58] sm:$0xff] %v3571_v27  ;;  %v2545_v35 = vadd.f32 %v6706_v38, %v6705_v53  ;;  %v2783_v1 = vmul.f32 %v5863_v9, %v6707_v12  ;;  %v2553_v33 = vadd.f32 %v6061_v5, %v6059_v10  ;;  %v6710_v53 = vld [vmem:[#allocation37_spill] sm:$0xff]  ;;  %v6711_v5 = vld [vmem:[#allocation38_spill] sm:$0xff] }
 0x1eb   : > { %v2924_v14 = vpop.permute.xlu1 %2923  ;;  %v2843_v10 = vsub.f32 %v2553_v33, %v6710_v53 }
 0x1ec   : > { %v3025_v36 = vmul.f32 %v2924_v14, %v2829_v52  ;;  %v3026_v6 = vmul.f32 %v2924_v14, %v2830_v56  ;;  %v2929_v37 = vpop.permute.xlu0 %2928  ;;  %v6698_v56 = vld [vmem:[#allocation60_spill] sm:$0xff] }
 0x1ed   : > { %v3027_v44 = vmul.f32 %v2929_v37, %v2831_v21  ;;  %v3028_v16 = vmul.f32 %v2929_v37, %v2832_v19  ;;  %v6699_v21 = vld [vmem:[#allocation61_spill] sm:$0xff]  ;;  %v6703_v37 = vld [vmem:[#allocation11_spill] sm:$0xff] }
 0x1ee   : > { %v3093_v17 = vadd.f32 %v5999_v3, %v3025_v36  ;;  %v3094_v8 = vadd.f32 %v6003_v55, %v3026_v6  ;;  %v2539_v19 = vadd.f32 %v6699_v21, %v6698_v56  ;;  %v2543_v57 = vadd.f32 %v6704_v47, %v6703_v37  ;;  %v6709_v47 = vld [vmem:[#allocation16_spill] sm:$0xff] }
 0x1ef   : > { %v3095_v41 = vadd.f32 %v5999_v3, %v3027_v44  ;;  %v3096_v63 = vadd.f32 %v6003_v55, %v3028_v16 }
 0x1f0   : > { %v3572_v34 = vpack.c.bf16 %v3094_v8, %v3093_v17  ;;  %v2934_v52 = vpop.permute.xlu1 %2933  ;;  %v6223_v17 = vpop.f32.mrf.mxu0 }
 0x1f1   : > { %v3573_v27 = vpack.c.bf16 %v3096_v63, %v3095_v41  ;;  %v3029_v14 = vmul.f32 %v2934_v52, %v2833_v45  ;;  %v3030_v28 = vmul.f32 %v2934_v52, %v2834_v31  ;;  %v2939_v4 = vpop.permute.xlu0 %2938  ;;  %v2784_v41 = vmul.f32 %v5871_v29, %v6707_v12  ;;  %v6231_v63 = vpop.f32.mrf.mxu1 }
 0x1f2   : > { %3305 = vst [vmem:[%s6029_s14 + $0x60] sm:$0xff] %v3572_v34  ;;  %v3031_v36 = vmul.f32 %v2939_v4, %v2835_v50  ;;  %v3032_v6 = vmul.f32 %v2939_v4, %v2836_v23  ;;  %v2837_v31 = vsub.f32 %v2539_v19, %v2781_v25  ;;  %v2838_v50 = vsub.f32 %v2541_v51, %v2782_v11  ;;  %v6234_v56 = vpop.f32.mrf.mxu0 }
 0x1f3   : > { %3306 = vst [vmem:[%s6029_s14 + $0x68] sm:$0xff] %v3573_v27  ;;  %v3097_v44 = vadd.f32 %v5999_v3, %v3029_v14  ;;  %v3098_v16 = vadd.f32 %v6003_v55, %v3030_v28  ;;  %v2839_v23 = vsub.f32 %v2543_v57, %v2783_v1  ;;  %v2840_v27 = vsub.f32 %v2545_v35, %v2784_v41  ;;  %v6237_v9 = vpop.f32.mrf.mxu1 }
 0x1f4   : > { %v3099_v8 = vadd.f32 %v5999_v3, %v3031_v36  ;;  %v3100_v58 = vadd.f32 %v6003_v55, %v3032_v6  ;;  %v2549_v28 = vadd.f32 %v6027_v30, %v6025_v60  ;;  %v2551_v19 = vadd.f32 %v6055_v54, %v6047_v48  ;;  %v6251_v6 = vpop.f32.mrf.mxu0  ;;  %v6708_v54 = vld [vmem:[#allocation29_spill] sm:$0xff] }
 0x1f5   : > { %v3574_v34 = vpack.c.bf16 %v3098_v16, %v3097_v44  ;;  %v2555_v25 = vadd.f32 %v6083_v18, %v6075_v43  ;;  %v6253_v60 = vpop.f32.mrf.mxu1  ;;  %v2559_v18 = vadd.f32 %v6098_v22, %v6091_v0  ;;  %v2561_v35 = vadd.f32 %v6113_v20, %v6109_v40  ;;  %v6712_v20 = vld [vmem:[#allocation45_spill] sm:$0xff] }
 0x1f6   : > { %v3575_v45 = vpack.c.bf16 %v3100_v58, %v3099_v8  ;;  %v2842_v37 = vsub.f32 %v2551_v19, %v6708_v54  ;;  %v2841_v57 = vsub.f32 %v2549_v28, %v6709_v47  ;;  %v2411_v44 = vpop.f32.mrf.mxu0  ;;  %v2563_v12 = vadd.f32 %v6132_v24, %v6125_v2 }
 0x1f7   : > { %3307 = vst [vmem:[%s6029_s14 + $0x70] sm:$0xff] %v3574_v34  ;;  %v2844_v38 = vsub.f32 %v2555_v25, %v6711_v5  ;;  %v2565_v1 = vadd.f32 %v6145_v26, %v6143_v46  ;;  %v2584_v41 = vpop.f32.mrf.mxu1  ;;  %v6714_v46 = vld [vmem:[#allocation39_spill] sm:$0xff] }
 0x1f8   : > { %v2944_v52 = vpop.permute.xlu1 %2943  ;;  %3308 = vst [vmem:[%s6029_s14 + $0x78] sm:$0xff] %v3575_v45  ;;  %v2415_v24 = vpop.f32.mrf.mxu0  ;;  %v2847_v26 = vsub.f32 %v2563_v12, %v6714_v46  ;;  %v2579_v12 = vadd.f32 %v6231_v63, %v6223_v17 }
 0x1f9   : > { %v3033_v21 = vmul.f32 %v2944_v52, %v2837_v31  ;;  %v3034_v32 = vmul.f32 %v2944_v52, %v2838_v50  ;;  %v2949_v7 = vpop.permute.xlu0 %2948  ;;  %v2845_v50 = vsub.f32 %v2559_v18, %v6712_v20  ;;  %v6715_v52 = vld [vmem:[#allocation40_spill] sm:$0xff] }
 0x1fa   : > { %v3035_v29 = vmul.f32 %v2949_v7, %v2839_v23  ;;  %v3036_v14 = vmul.f32 %v2949_v7, %v2840_v27  ;;  %v6713_v23 = vld [vmem:[#allocation46_spill] sm:$0xff] }
 0x1fb   : > { %v3101_v51 = vadd.f32 %v5999_v3, %v3033_v21  ;;  %v3102_v4 = vadd.f32 %v6003_v55, %v3034_v32  ;;  %v2846_v2 = vsub.f32 %v2561_v35, %v6713_v23  ;;  %v2848_v21 = vsub.f32 %v2565_v1, %v6715_v52  ;;  %v2588_v32 = vpop.f32.mrf.mxu1  ;;  %v6720_v23 = vld [vmem:[#allocation58_spill] sm:$0xff] }
 0x1fc   : > { %v3103_v11 = vadd.f32 %v5999_v3, %v3035_v29  ;;  %v3104_v36 = vadd.f32 %v6003_v55, %v3036_v14  ;;  %v2581_v1 = vadd.f32 %v6237_v9, %v6234_v56  ;;  %v6721_v56 = vld [vmem:[#allocation59_spill] sm:$0xff] }
 0x1fd   : > { %v3576_v30 = vpack.c.bf16 %v3102_v4, %v3101_v51  ;;  %v2569_v51 = vadd.f32 %v6159_v13, %v6153_v42  ;;  %v2571_v4 = vadd.f32 %v6175_v61, %v6173_v49  ;;  %v2590_v42 = vpop.f32.mrf.mxu1 }
 0x1fe   : > { %v3577_v48 = vpack.c.bf16 %v3104_v36, %v3103_v11  ;;  %v2573_v11 = vadd.f32 %v6193_v59, %v6191_v62  ;;  %v2575_v36 = vadd.f32 %v6209_v39, %v6203_v15  ;;  %v6718_v59 = vld [vmem:[#allocation21_spill] sm:$0xff]  ;;  %v6719_v15 = vld [vmem:[#allocation24_spill] sm:$0xff]  ;;  %v2854_v9 = vsub.f32 %v2581_v1, %v6721_v56 }
 0x1ff   : > { %3309 = vst [vmem:[%s6029_s14 + $0x80] sm:$0xff] %v3576_v30  ;;  %v2417_v30 = vpop.f32.mrf.mxu0 }
 0x200   : > { %3310 = vst [vmem:[%s6029_s14 + $0x88] sm:$0xff] %v3577_v48  ;;  %v2852_v39 = vsub.f32 %v2575_v36, %v6719_v15  ;;  %v2591_v46 = vadd.f32 %v2590_v42, %v2417_v30  ;;  %v6727_v42 = vld [vmem:[#allocation50_spill] sm:$0xff] }
 0x201   : > { %v2419_v5 = vpop.f32.mrf.mxu0 }
 0x202   : > { %v2954_v43 = vpop.permute.xlu1 %2953 }
 0x203   : > { %v3037_v16 = vmul.f32 %v2954_v43, %v2841_v57  ;;  %v3038_v8 = vmul.f32 %v2954_v43, %v2842_v37  ;;  %v2959_v58 = vpop.permute.xlu0 %2958  ;;  %v6716_v37 = vld [vmem:[#allocation53_spill] sm:$0xff]  ;;  %v6717_v57 = vld [vmem:[#allocation54_spill] sm:$0xff]  ;;  %v2592_v43 = vpop.f32.mrf.mxu1 }
 0x204   : > { %v3039_v34 = vmul.f32 %v2959_v58, %v2843_v10  ;;  %v3040_v45 = vmul.f32 %v2959_v58, %v2844_v38  ;;  %v2849_v47 = vsub.f32 %v2569_v51, %v6716_v37  ;;  %v2850_v53 = vsub.f32 %v2571_v4, %v6717_v57  ;;  %v2421_v20 = vpop.f32.mrf.mxu0 }
 0x205   : > { %v3105_v31 = vadd.f32 %v5999_v3, %v3037_v16  ;;  %v3106_v0 = vadd.f32 %v6003_v55, %v3038_v8  ;;  %v2851_v10 = vsub.f32 %v2573_v11, %v6718_v59 }
 0x206   : > { %v3107_v22 = vadd.f32 %v5999_v3, %v3039_v34  ;;  %v3108_v40 = vadd.f32 %v6003_v55, %v3040_v45  ;;  %v2964_v29 = vpop.permute.xlu1 %2963 }
 0x207   : > { %v3578_v27 = vpack.c.bf16 %v3106_v0, %v3105_v31  ;;  %v3041_v14 = vmul.f32 %v2964_v29, %v2845_v50  ;;  %v3042_v28 = vmul.f32 %v2964_v29, %v2846_v2  ;;  %v2969_v19 = vpop.permute.xlu0 %2968  ;;  %v2583_v31 = vadd.f32 %v6253_v60, %v6251_v6  ;;  %v2594_v50 = vpop.f32.mrf.mxu1  ;;  %v6723_v6 = vld [vmem:[#allocation43_spill] sm:$0xff] }
 0x208   : > { %v3579_v7 = vpack.c.bf16 %v3108_v40, %v3107_v22  ;;  %v3043_v33 = vmul.f32 %v2969_v19, %v2847_v26  ;;  %v3044_v25 = vmul.f32 %v2969_v19, %v2848_v21  ;;  %v2585_v0 = vadd.f32 %v2584_v41, %v2411_v44  ;;  %v6722_v26 = vld [vmem:[#allocation42_spill] sm:$0xff] }
 0x209   : > { %3311 = vst [vmem:[%s6029_s14 + $0x90] sm:$0xff] %v3578_v27  ;;  %v3109_v48 = vadd.f32 %v5999_v3, %v3041_v14  ;;  %v3110_v54 = vadd.f32 %v6003_v55, %v3042_v28  ;;  %v2853_v2 = vsub.f32 %v2579_v12, %v6720_v23  ;;  %v2589_v27 = vadd.f32 %v2588_v32, %v2415_v24  ;;  %v6724_v32 = vld [vmem:[#allocation64_spill] sm:$0xff] }
 0x20a   : > { %3312 = vst [vmem:[%s6029_s14 + $0x98] sm:$0xff] %v3579_v7  ;;  %v3111_v13 = vadd.f32 %v5999_v3, %v3043_v33  ;;  %v3112_v49 = vadd.f32 %v6003_v55, %v3044_v25  ;;  %v2855_v52 = vsub.f32 %v2583_v31, %v6722_v26  ;;  %v2856_v60 = vsub.f32 %v2585_v0, %v6723_v6  ;;  %v6725_v33 = vld [vmem:[#allocation65_spill] sm:$0xff] }
 0x20b   : > { %v3580_v61 = vpack.c.bf16 %v3110_v54, %v3109_v48  ;;  %v2593_v44 = vadd.f32 %v2592_v43, %v2419_v5  ;;  %v2595_v41 = vadd.f32 %v2594_v50, %v2421_v20  ;;  %v2857_v4 = vsub.f32 %v2589_v27, %v6724_v32  ;;  %v6726_v48 = vld [vmem:[#allocation49_spill] sm:$0xff] }
 0x20c   : > { %v3581_v62 = vpack.c.bf16 %v3112_v49, %v3111_v13  ;;  %v2858_v25 = vsub.f32 %v2591_v46, %v6725_v33 }
 0x20d   : > { %3313 = vst [vmem:[%s6029_s14 + $0xa0] sm:$0xff] %v3580_v61  ;;  %v2859_v54 = vsub.f32 %v2593_v44, %v6726_v48  ;;  %v2860_v13 = vsub.f32 %v2595_v41, %v6727_v42 }
 0x20e   : > { %v2974_v38 = vpop.permute.xlu1 %2973  ;;  %3314 = vst [vmem:[%s6029_s14 + $0xa8] sm:$0xff] %v3581_v62 }
 0x20f   : > { %v3045_v18 = vmul.f32 %v2974_v38, %v2849_v47  ;;  %v3046_v35 = vmul.f32 %v2974_v38, %v2850_v53  ;;  %v2979_v16 = vpop.permute.xlu0 %2978 }
 0x210   : > { %v3047_v8 = vmul.f32 %v2979_v16, %v2851_v10  ;;  %v3048_v58 = vmul.f32 %v2979_v16, %v2852_v39 }
 0x211   : > { %v3113_v34 = vadd.f32 %v5999_v3, %v3045_v18  ;;  %v3114_v45 = vadd.f32 %v6003_v55, %v3046_v35 }
 0x212   : > { %v3115_v22 = vadd.f32 %v5999_v3, %v3047_v8  ;;  %v3116_v40 = vadd.f32 %v6003_v55, %v3048_v58 }
 0x213   : > { %v3582_v17 = vpack.c.bf16 %v3114_v45, %v3113_v34 }
 0x214   : > { %v3583_v63 = vpack.c.bf16 %v3116_v40, %v3115_v22 }
 0x215   : > { %3315 = vst [vmem:[%s6029_s14 + $0xb0] sm:$0xff] %v3582_v17 }
 0x216   : > { %3316 = vst [vmem:[%s6029_s14 + $0xb8] sm:$0xff] %v3583_v63 }
 0x217   : > { %v2984_v21 = vpop.permute.xlu1 %2983 }
 0x218   : > { %v3049_v7 = vmul.f32 %v2984_v21, %v2853_v2  ;;  %v3050_v29 = vmul.f32 %v2984_v21, %v2854_v9  ;;  %v2989_v14 = vpop.permute.xlu0 %2988 }
 0x219   : > { %v3051_v28 = vmul.f32 %v2989_v14, %v2855_v52  ;;  %v3052_v19 = vmul.f32 %v2989_v14, %v2856_v60 }
 0x21a   : > { %v3117_v51 = vadd.f32 %v5999_v3, %v3049_v7  ;;  %v3118_v24 = vadd.f32 %v6003_v55, %v3050_v29 }
 0x21b   : > { %v3119_v11 = vadd.f32 %v5999_v3, %v3051_v28  ;;  %v3120_v36 = vadd.f32 %v6003_v55, %v3052_v19  ;;  %v2994_v30 = vpop.permute.xlu1 %2993 }
 0x21c   : > { %v3584_v49 = vpack.c.bf16 %v3118_v24, %v3117_v51  ;;  %v3053_v61 = vmul.f32 %v2994_v30, %v2857_v4  ;;  %v3054_v37 = vmul.f32 %v2994_v30, %v2858_v25  ;;  %v2999_v47 = vpop.permute.xlu0 %2998 }
 0x21d   : > { %v3585_v57 = vpack.c.bf16 %v3120_v36, %v3119_v11  ;;  %v3055_v53 = vmul.f32 %v2999_v47, %v2859_v54  ;;  %v3056_v62 = vmul.f32 %v2999_v47, %v2860_v13 }
 0x21e   : > { %3317 = vst [vmem:[%s6029_s14 + $0xc0] sm:$0xff] %v3584_v49  ;;  %v3121_v59 = vadd.f32 %v5999_v3, %v3053_v61  ;;  %v3122_v10 = vadd.f32 %v6003_v55, %v3054_v37 }
 0x21f   : > { %3318 = vst [vmem:[%s6029_s14 + $0xc8] sm:$0xff] %v3585_v57  ;;  %v3123_v15 = vadd.f32 %v5999_v3, %v3055_v53  ;;  %v3124_v39 = vadd.f32 %v6003_v55, %v3056_v62 }
 0x220   : > { %v3586_v5 = vpack.c.bf16 %v3122_v10, %v3121_v59 }
 0x221   : > { %v3587_v38 = vpack.c.bf16 %v3124_v39, %v3123_v15 }
 0x222   : > { %3319 = vst [vmem:[%s6029_s14 + $0xd0] sm:$0xff] %v3586_v5 }
 0x223   : > { %3320 = vst [vmem:[%s6029_s14 + $0xd8] sm:$0xff] %v3587_v38 }
 0x224   : > { %3894 = shalt.err (!%p3891_p7)
}
 0x225   : > { %s3895_s30 = scalar_lea.hbm %s6334_s26, 3584  ;;  %s3899_s11 = scalar_lea.hbm %s6389_s4, 10752 }
 0x226   : > { %p3896_p9 = scmp.ne.s32.totalorder %s6334_s26, %s3895_s30  ;;  %p3900_p2 = scmp.lt.s32.totalorder %s6334_s26, %s6389_s4 }
 0x227   : > { %p3901_p5 = scmp.lt.s32.totalorder %s3899_s11, %s3895_s30 }
 0x228   : > { %p3897_p12 = pnand %p3896_p9, %p6728_p8 }
 0x229   : > { %p3902_p3 = por %p3901_p5, %p3900_p2 }
 0x22a   : > { %p3898_p1 = pneg %p3897_p12 }
 0x22c   : > { %p3903_p4 = pnand %p3902_p3, %p3898_p1 }
 0x22e   : > { %3906 = shalt.err (!%p3903_p4)
}
 0x22f   : > { %s3975_s14 = smov 128   ;;  %s3976_s21 = smov 8  }
 0x230   : > { %3600 = dma.vmem_to_hbm [thread:$0]  (%p6728_p8), %s6329_s22, 3584, %s6334_s26, %s6340_s5, %s3975_s14, %s3975_s14, %s3976_s21  }
 0x231 PF: > { %p3617_p10 = scmp.ge.s32.totalorder %s3965_s20, 2  ;;  %s3353_s18 = sand.u32 1, %s3945_s15  }
 0x232   : > { %p6729_p11 = scmp.ne.s32.totalorder %s6466_s27, 0  ;;  %s3354_s24 = scalar_lea.sflag [#allocation4], %s3353_s18 }
 0x234   : > { %p3610_p13 = pnand %p3617_p10, %p6729_p11 }
 0x236   : > { %p3611_p0 = pneg %p3610_p13 }
 0x238   : > { %3940 = dma.done.wait (%p3611_p0), %s3354_s24, 3584  }
 0x239   : > { %3942 = vsyncadd (%p3611_p0), %s3354_s24, 4294963712  ;;  %s19_s20 = sadd.s32 1, %s3965_s20   ;;  %s6730_s15 = smov %s3949_s16 }
 0x23a   : > { %p16_p6 = scmp.ge.s32.totalorder %s19_s20, 5   ;;  %s6731_s16 = smov %s3953_s17 }
 0x23b   : > { %s6732_s17 = smov %s4055_s28  ;;  %s6733_s18 = smov %s3961_s19 }
 0x23c   : > { %s6734_s19 = smov %s6736_s23  ;;  %18 = sbr.rel (!%p16_p6) target bundleno = 6 (0x6), region = 79 }
 0x241   :  { %3359 = vsyncpa [#allocation3], 1 }
 0x242   :  { %3361 = vsyncpa [#allocation3 + $0x1], 1 }
 0x243   :  { %3362 = vsyncpa [#allocation6], 1 }
 0x244   :  { %3363 = vsyncpa [#allocation4], 1 }
 0x245   :  { %3365 = vsyncpa [#allocation4 + $0x1], 1 }

</bundles_post_ra>
